<compile_context>
chip_gen: v5e
topology: v5e:2x2
jax: 0.10.0
libtpu: 0.0.40
codegen_flags: <defaults>
</compile_context>

<pallas_src>
import functools
import math

import jax
import jax.numpy as jnp
from jax.experimental import pallas as pl
from jax.experimental.pallas import tpu as pltpu


def _softmax_lastdim(s, approx_recip):
    """Numerically-stable softmax over the last dim (f32)."""
    s = s - jnp.max(s, axis=-1, keepdims=True)
    e = jnp.exp(s)
    denom = jnp.sum(e, axis=-1, keepdims=True)
    if approx_recip:
        return e * pl.reciprocal(denom, approx=True)   # EUP slot (bf16 path)
    return e / denom                                   # exact (strict f32 path)


def mha_kernel(x_ref, wqkv_ref, bqkv_ref, w1_ref, b1_ref, gamma_ref, beta_ref,
               out_ref, *, num_heads, head_dim, block_b, seq_len, scale, eps,
               approx_recip, head_major):
    H, hd, S = num_heads, head_dim, seq_len
    D = H * hd
    M = block_b * S
    cd = wqkv_ref.dtype                      # MXU input dtype (bf16 or f32)

    # ---- Fused Q|K|V projection, batch folded into the matmul M dim ---------
    x2d = x_ref[...].reshape(M, D)
    qkv = jnp.dot(x2d, wqkv_ref[...],
                  preferred_element_type=jnp.float32) + bqkv_ref[...]  # (M,3D) f32

    if head_major:
        # One rearrangement to head-major, then a single batched einsum pair
        # over all heads (no per-head lane slices / per-head matmul issues).
        heads = jnp.transpose(qkv.reshape(block_b, S, 3 * H, hd), (0, 2, 1, 3))
        qh = (heads[:, 0:H] * scale).reshape(block_b * H, S, hd).astype(cd)
        kh = heads[:, H:2 * H].reshape(block_b * H, S, hd).astype(cd)
        vh = heads[:, 2 * H:].reshape(block_b * H, S, hd).astype(cd)

        s = jnp.einsum('bqd,bkd->bqk', qh, kh,
                       preferred_element_type=jnp.float32)             # (Bb*H,S,S)
        p = _softmax_lastdim(s, approx_recip)
        ctx = jnp.einsum('bqk,bkd->bqd', p.astype(cd), vh,
                         preferred_element_type=jnp.float32)           # (Bb*H,S,hd)

        # Back to row-major (M, D) and a single K=D output dense.
        ctx2d = jnp.transpose(ctx.reshape(block_b, H, S, hd),
                              (0, 2, 1, 3)).reshape(M, D)
        out = jnp.dot(ctx2d.astype(cd), w1_ref[...],
                      preferred_element_type=jnp.float32)
    else:
        # Compat fallback (always lowers): per-head lane slices + per-head
        # K=head_dim output matmuls accumulated into (M, D).
        w1 = w1_ref[...]
        out = None
        for h in range(H):
            o = h * hd
            qh = (qkv[:, o:o + hd] * scale).astype(cd).reshape(block_b, S, hd)
            kh = qkv[:, D + o:D + o + hd].astype(cd).reshape(block_b, S, hd)
            vh = qkv[:, 2 * D + o:2 * D + o + hd].astype(cd).reshape(block_b, S, hd)
            s = jnp.einsum('bqd,bkd->bqk', qh, kh,
                           preferred_element_type=jnp.float32)
            p = _softmax_lastdim(s, approx_recip)
            ctx = jnp.einsum('bqk,bkd->bqd', p.astype(cd), vh,
                             preferred_element_type=jnp.float32)
            part = jnp.dot(ctx.reshape(M, hd).astype(cd), w1[o:o + hd, :],
                           preferred_element_type=jnp.float32)
            out = part if out is None else out + part

    out = out + b1_ref[...]                                            # (M, D) f32

    # ---- LayerNorm over the model dim (f32, eps matches PyTorch default) ----
    mean = jnp.mean(out, axis=-1, keepdims=True)
    var = jnp.mean(jnp.square(out - mean), axis=-1, keepdims=True)
    y = (out - mean) * jax.lax.rsqrt(var + eps)
    y = y * gamma_ref[...] + beta_ref[...]
    out_ref[...] = y.reshape(out_ref.shape).astype(out_ref.dtype)


def _pick_block_b(batch, seq, num_heads, *, sublane_tiled,
                  target_rows=512, score_budget_bytes=8 << 20):
    """Batch block: target ~512 matmul rows per grid step, cap the f32 score
    footprint, respect sublane tiling on merged (B, S*D) views, and prefer an
    even grid >= 2 so both v7x TensorCores get work when possible."""
    per_b_scores = num_heads * seq * seq * 4
    cap = min(batch,
              max(1, target_rows // max(seq, 1)),
              max(1, score_budget_bytes // max(per_b_scores, 1)))
    divisors = [d for d in range(1, batch + 1) if batch % d == 0]
    compliant = [d for d in divisors
                 if (not sublane_tiled) or d % 8 == 0 or d == batch]
    if not compliant:
        compliant = [batch]
    fitting = [d for d in compliant if d <= cap] or [min(compliant)]
    even_grid = [d for d in fitting
                 if (batch // d) >= 2 and (batch // d) % 2 == 0]
    return max(even_grid or fitting)


def _vmem_limit_bytes(block_b, seq, d_model, num_heads, mxu_bytes, out_bytes):
    """Scoped VMEM limit sized from the block footprint, capped per generation."""
    m = block_b * seq
    io = 2 * m * d_model * (mxu_bytes + out_bytes)          # double-buffered x/out
    weights = 4 * d_model * d_model * mxu_bytes + 10 * d_model * 4
    scores = block_b * num_heads * seq * seq * (8 + mxu_bytes)
    acts = m * d_model * (3 * 4 + 3 * mxu_bytes + 8 + mxu_bytes + 4)
    want = int(1.5 * (io + weights + scores + acts)) + (4 << 20)
    try:
        phys = pltpu.get_tpu_info().vmem_capacity_bytes
    except Exception:
        phys = 64 << 20                                     # conservative default
    budget = (phys * 3) // 4      # ~96 MiB on v5e/v6e (128 MiB), ~48 MiB on v7x
    return int(min(max(32 << 20, want), budget))


def multihead_attention1(x, params, *, num_heads, mxu_dtype=jnp.bfloat16,
                         out_dtype=jnp.float32, block_b=None):
    """Fused MHA block (QKV proj -> softmax attention -> dense -> LayerNorm).

    x: (B, S, D) f32.  params: (in, out) Linear weights, (1, out) biases,
    LayerNorm gamma/beta.  mxu_dtype feeds the MXU matmuls (bf16 is the fast
    path on every TPU generation, v5e included); softmax / LayerNorm /
    accumulation always run in f32.  out_dtype=bf16 halves HBM writeback.
    """
    B, S, D = x.shape
    assert D % num_heads == 0
    hd = D // num_heads
    eps = 1e-5
    scale = 1.0 / math.sqrt(hd)
    approx_recip = jnp.dtype(mxu_dtype) != jnp.dtype(jnp.float32)

    # Lane-dense I/O: for D < 128 run on (B, S*D) views so stores are unmasked.
    merge_ok = (D % 128 != 0) and ((S * D) % 128 == 0)

    if block_b is None:
        block_b = _pick_block_b(B, S, num_heads, sublane_tiled=merge_ok)
    assert B % block_b == 0
    grid = (B // block_b,)

    wqkv = jnp.concatenate([params["wq"], params["wk"], params["wv"]], axis=1)
    bqkv = jnp.concatenate([params["bq"], params["bk"], params["bv"]], axis=1)

    x_c = x.astype(mxu_dtype)
    wqkv_c = wqkv.astype(mxu_dtype)
    w1_c = params["w1"].astype(mxu_dtype)
    bqkv_f = bqkv.astype(jnp.float32)
    b1_f = params["b1"].astype(jnp.float32)
    gamma_f = params["gamma"].astype(jnp.float32)
    beta_f = params["beta"].astype(jnp.float32)

    vmem_limit = _vmem_limit_bytes(block_b, S, D, num_heads,
                                   jnp.dtype(mxu_dtype).itemsize,
                                   jnp.dtype(out_dtype).itemsize)

    def run(head_major, merge_io, single_buffer_weights):
        kernel = functools.partial(
            mha_kernel, num_heads=num_heads, head_dim=hd, block_b=block_b,
            seq_len=S, scale=scale, eps=eps, approx_recip=approx_recip,
            head_major=head_major)

        if merge_io:
            x_in = x_c.reshape(B, S * D)
            io_block = (block_b, S * D)
            io_map = lambda b: (b, 0)
            out_struct = jax.ShapeDtypeStruct((B, S * D), out_dtype)
        else:
            x_in = x_c
            io_block = (block_b, S, D)
            io_map = lambda b: (b, 0, 0)
            out_struct = jax.ShapeDtypeStruct((B, S, D), out_dtype)

        def const_spec(shape):
            idx = lambda b: (0,) * len(shape)
            if single_buffer_weights:
                # Resident blocks don't need double buffering (halves their
                # VMEM footprint; matters on v7x's 64 MiB VMEM).
                return pl.BlockSpec(shape, idx, pipeline_mode=pl.Buffered(1))
            return pl.BlockSpec(shape, idx)

        out = pl.pallas_call(
            kernel,
            out_shape=out_struct,
            grid_spec=pltpu.PrefetchScalarGridSpec(
                num_scalar_prefetch=0,
                grid=grid,
                in_specs=[
                    pl.BlockSpec(io_block, io_map),      # x
                    const_spec((D, 3 * D)),              # Wqkv
                    const_spec((1, 3 * D)),              # bqkv
                    const_spec((D, D)),                  # W1
                    const_spec((1, D)),                  # b1
                    const_spec((1, D)),                  # gamma
                    const_spec((1, D)),                  # beta
                ],
                out_specs=pl.BlockSpec(io_block, io_map)),
            compiler_params=pltpu.CompilerParams(
                dimension_semantics=("parallel",),       # batch blocks -> both TCs
                vmem_limit_bytes=vmem_limit),
        )(x_in, wqkv_c, bqkv_f, w1_c, b1_f, gamma_f, beta_f)
        return out.reshape(B, S, D)

    # Most-optimized config first; degrade gracefully if the installed Mosaic
    # rejects an optional feature (Buffered(1) specs, the lane-folding merged
    # I/O reshape, or the head-major in-kernel rearrangement).
    has_buf = hasattr(pl, "Buffered")
    attempts, seen = [], set()
    for cfg in ((True, merge_ok, has_buf),
                (True, merge_ok, False),
                (True, False, has_buf),
                (True, False, False),
                (False, False, False)):
        if cfg not in seen:
            seen.add(cfg)
            attempts.append(cfg)
    err = None
    for head_major, merge_io, buffered in attempts:
        try:
            return run(head_major, merge_io, buffered)
        except Exception as e:          # compat fallback; re-raised if all fail
            err = e
    raise err


def _reference(x, params, *, num_heads, matmul_dtype=jnp.float32):
    """Pure-JAX reference mirroring the PyTorch forward (eval mode)."""
    B, S, D = x.shape
    hd = D // num_heads

    def mm(a, b):
        return jnp.dot(a.astype(matmul_dtype), b.astype(matmul_dtype),
                       preferred_element_type=jnp.float32)

    q = mm(x, params["wq"]) + params["bq"]
    k = mm(x, params["wk"]) + params["bk"]
    v = mm(x, params["wv"]) + params["bv"]

    def split(t):  # (B,S,D) -> (B,H,S,hd)
        return t.reshape(B, S, num_heads, hd).transpose(0, 2, 1, 3)

    qh, kh, vh = split(q), split(k), split(v)
    scores = jnp.einsum("bhqd,bhkd->bhqk",
                        qh.astype(matmul_dtype), kh.astype(matmul_dtype),
                        preferred_element_type=jnp.float32) / math.sqrt(hd)
    probs = jax.nn.softmax(scores, axis=-1)
    ctx = jnp.einsum("bhqk,bhkd->bhqd",
                     probs.astype(matmul_dtype), vh.astype(matmul_dtype),
                     preferred_element_type=jnp.float32)
    ctx = ctx.transpose(0, 2, 1, 3).reshape(B, S, D)
    out = mm(ctx, params["w1"]) + params["b1"]
    mean = out.mean(-1, keepdims=True)
    var = ((out - mean) ** 2).mean(-1, keepdims=True)
    return (out - mean) * jax.lax.rsqrt(var + 1e-5) * params["gamma"] + params["beta"]


if __name__ == "__main__":
    B, S, D = 2, 8, 32
    HEADS = 4

    key = jax.random.PRNGKey(0)
    ks = jax.random.split(key, 10)

    def lin_w(k):  # (in, out), modest scale
        return jax.random.normal(k, (D, D), jnp.float32) * (1.0 / math.sqrt(D))

    def lin_b(k):
        return jax.random.normal(k, (1, D), jnp.float32) * 0.02

    params = {
        "wq": lin_w(ks[0]), "bq": lin_b(ks[1]),
        "wk": lin_w(ks[2]), "bk": lin_b(ks[3]),
        "wv": lin_w(ks[4]), "bv": lin_b(ks[5]),
        "w1": lin_w(ks[6]), "b1": lin_b(ks[7]),
        "gamma": jnp.ones((1, D), jnp.float32),
        "beta": jnp.zeros((1, D), jnp.float32),
    }
    x = jax.random.normal(ks[8], (B, S, D), jnp.float32)

    # Default path: bf16 MXU inputs (fast on v5e/v6e/v7x), f32 softmax/LN/accum.
    out_bf16 = jax.block_until_ready(
        multihead_attention1(x, params, num_heads=HEADS))
    assert out_bf16.shape == (B, S, D)
    ref_bf16 = _reference(x, params, num_heads=HEADS, matmul_dtype=jnp.bfloat16)
    assert jnp.allclose(out_bf16, ref_bf16, atol=3e-2, rtol=3e-2), (
        f"bf16 MXU path: max abs diff {jnp.max(jnp.abs(out_bf16 - ref_bf16))}")

    # Strict-f32 path (f32 MXU matmuls, exact softmax reciprocal).
    out_f32 = jax.block_until_ready(
        multihead_attention1(x, params, num_heads=HEADS, mxu_dtype=jnp.float32))
    ref_f32 = _reference(x, params, num_heads=HEADS, matmul_dtype=jnp.float32)
    assert jnp.allclose(out_f32, ref_f32, atol=1e-3, rtol=1e-3), (
        f"f32 MXU path: max abs diff {jnp.max(jnp.abs(out_f32 - ref_f32))}")

    print("KERNEL_OK")
</pallas_src>

<mosaic_0001>
module attributes {stable_mosaic.version = 11 : i64} {
  func.func @mha_kernel(%arg0: i32, %arg1: memref<2x256xbf16, #tpu.memory_space<vmem>>, %arg2: memref<32x96xbf16, #tpu.memory_space<vmem>>, %arg3: memref<1x96xf32, #tpu.memory_space<vmem>>, %arg4: memref<32x32xbf16, #tpu.memory_space<vmem>>, %arg5: memref<1x32xf32, #tpu.memory_space<vmem>>, %arg6: memref<1x32xf32, #tpu.memory_space<vmem>>, %arg7: memref<1x32xf32, #tpu.memory_space<vmem>>, %arg8: memref<2x256xf32, #tpu.memory_space<vmem>>) attributes {dimension_semantics = [#tpu.dimension_semantics<parallel>], iteration_bounds = array<i64: 1>, scalar_prefetch = 0 : i64, scratch_operands = 0 : i64, tpu.core_type = #tpu.core_type<tc>, window_params = [{transform_indices = @transform_0, window_bounds = array<i64: 2, 256>}, {pipeline_mode = #tpu.pipeline_mode<synchronous>, transform_indices = @transform_1, window_bounds = array<i64: 32, 96>}, {pipeline_mode = #tpu.pipeline_mode<synchronous>, transform_indices = @transform_2, window_bounds = array<i64: 1, 96>}, {pipeline_mode = #tpu.pipeline_mode<synchronous>, transform_indices = @transform_3, window_bounds = array<i64: 32, 32>}, {pipeline_mode = #tpu.pipeline_mode<synchronous>, transform_indices = @transform_4, window_bounds = array<i64: 1, 32>}, {pipeline_mode = #tpu.pipeline_mode<synchronous>, transform_indices = @transform_5, window_bounds = array<i64: 1, 32>}, {pipeline_mode = #tpu.pipeline_mode<synchronous>, transform_indices = @transform_6, window_bounds = array<i64: 1, 32>}, {transform_indices = @transform_7, window_bounds = array<i64: 2, 256>}]} {
    %c0 = arith.constant 0 : index
    %c0_0 = arith.constant 0 : index
    %0 = vector.load %arg1[%c0, %c0_0] : memref<2x256xbf16, #tpu.memory_space<vmem>>, vector<2x256xbf16>
    %1 = vector.shape_cast %0 : vector<2x256xbf16> to vector<16x32xbf16>
    %c0_1 = arith.constant 0 : index
    %c0_2 = arith.constant 0 : index
    %2 = vector.load %arg2[%c0_1, %c0_2] : memref<32x96xbf16, #tpu.memory_space<vmem>>, vector<32x96xbf16>
    %cst = arith.constant dense<0.000000e+00> : vector<16x96xf32>
    %3 = tpu.matmul %1, %2, %cst {dimension_numbers = #tpu.dot_dimension_numbers<[1], [0], [0], [1], [0, 0, 1, 1], [], []>} : vector<16x32xbf16>, vector<32x96xbf16>, vector<16x96xf32> -> vector<16x96xf32>
    %c0_3 = arith.constant 0 : index
    %c0_4 = arith.constant 0 : index
    %4 = vector.load %arg3[%c0_3, %c0_4] : memref<1x96xf32, #tpu.memory_space<vmem>>, vector<1x96xf32>
    %5 = vector.broadcast %4 : vector<1x96xf32> to vector<16x96xf32>
    %6 = arith.addf %3, %5 : vector<16x96xf32>
    %7 = vector.shape_cast %6 : vector<16x96xf32> to vector<2x8x12x8xf32>
    %8 = tpu.transpose %7, [0, 2, 1, 3] : vector<2x8x12x8xf32> -> vector<2x12x8x8xf32>
    %9 = vector.extract_strided_slice %8 {offsets = [0, 0, 0, 0], sizes = [2, 4, 8, 8], strides = [1, 1, 1, 1]} : vector<2x12x8x8xf32> to vector<2x4x8x8xf32>
    %cst_5 = arith.constant 0.353553385 : f32
    %10 = vector.broadcast %cst_5 : f32 to vector<2x4x8x8xf32>
    %11 = arith.mulf %9, %10 : vector<2x4x8x8xf32>
    %12 = vector.shape_cast %11 : vector<2x4x8x8xf32> to vector<8x8x8xf32>
    %13 = arith.truncf %12 : vector<8x8x8xf32> to vector<8x8x8xbf16>
    %14 = vector.extract_strided_slice %8 {offsets = [0, 4, 0, 0], sizes = [2, 4, 8, 8], strides = [1, 1, 1, 1]} : vector<2x12x8x8xf32> to vector<2x4x8x8xf32>
    %15 = vector.shape_cast %14 : vector<2x4x8x8xf32> to vector<8x8x8xf32>
    %16 = arith.truncf %15 : vector<8x8x8xf32> to vector<8x8x8xbf16>
    %17 = vector.extract_strided_slice %8 {offsets = [0, 8, 0, 0], sizes = [2, 4, 8, 8], strides = [1, 1, 1, 1]} : vector<2x12x8x8xf32> to vector<2x4x8x8xf32>
    %18 = vector.shape_cast %17 : vector<2x4x8x8xf32> to vector<8x8x8xf32>
    %19 = arith.truncf %18 : vector<8x8x8xf32> to vector<8x8x8xbf16>
    "tpu.trace_start"() <{level = 10 : i32, message = "bqd,bkd->bqk"}> : () -> ()
    %cst_6 = arith.constant dense<0.000000e+00> : vector<8x8x8xf32>
    %20 = tpu.matmul %13, %16, %cst_6 {dimension_numbers = #tpu.dot_dimension_numbers<[2], [2], [1], [1], [0, 0, 0, 1, 1, 1], [0], [0]>} : vector<8x8x8xbf16>, vector<8x8x8xbf16>, vector<8x8x8xf32> -> vector<8x8x8xf32>
    "tpu.trace_stop"() : () -> ()
    %cst_7 = arith.constant dense<0xFF800000> : vector<8x8xf32>
    %21 = vector.multi_reduction <maximumf>, %20, %cst_7 [2] : vector<8x8x8xf32> to vector<8x8xf32>
    %22 = vector.shape_cast %21 : vector<8x8xf32> to vector<8x8x1xf32>
    %23 = vector.broadcast %22 : vector<8x8x1xf32> to vector<8x8x8xf32>
    %24 = arith.subf %20, %23 : vector<8x8x8xf32>
    %25 = math.exp %24 : vector<8x8x8xf32>
    %cst_8 = arith.constant dense<0.000000e+00> : vector<8x8xf32>
    %26 = vector.multi_reduction <add>, %25, %cst_8 [2] : vector<8x8x8xf32> to vector<8x8xf32>
    %27 = vector.shape_cast %26 : vector<8x8xf32> to vector<8x8x1xf32>
    %28 = tpu.reciprocal %27 {approx = true} : vector<8x8x1xf32> -> vector<8x8x1xf32>
    %29 = vector.broadcast %28 : vector<8x8x1xf32> to vector<8x8x8xf32>
    %30 = arith.mulf %25, %29 : vector<8x8x8xf32>
    %31 = arith.truncf %30 : vector<8x8x8xf32> to vector<8x8x8xbf16>
    "tpu.trace_start"() <{level = 10 : i32, message = "bqk,bkd->bqd"}> : () -> ()
    %cst_9 = arith.constant dense<0.000000e+00> : vector<8x8x8xf32>
    %32 = tpu.matmul %31, %19, %cst_9 {dimension_numbers = #tpu.dot_dimension_numbers<[2], [1], [1], [2], [0, 0, 0, 1, 1, 2], [0], [0]>} : vector<8x8x8xbf16>, vector<8x8x8xbf16>, vector<8x8x8xf32> -> vector<8x8x8xf32>
    "tpu.trace_stop"() : () -> ()
    %33 = vector.shape_cast %32 : vector<8x8x8xf32> to vector<2x4x8x8xf32>
    %34 = tpu.transpose %33, [0, 2, 1, 3] : vector<2x4x8x8xf32> -> vector<2x8x4x8xf32>
    %35 = vector.shape_cast %34 : vector<2x8x4x8xf32> to vector<16x32xf32>
    %36 = arith.truncf %35 : vector<16x32xf32> to vector<16x32xbf16>
    %c0_10 = arith.constant 0 : index
    %c0_11 = arith.constant 0 : index
    %37 = vector.load %arg4[%c0_10, %c0_11] : memref<32x32xbf16, #tpu.memory_space<vmem>>, vector<32x32xbf16>
    %cst_12 = arith.constant dense<0.000000e+00> : vector<16x32xf32>
    %38 = tpu.matmul %36, %37, %cst_12 {dimension_numbers = #tpu.dot_dimension_numbers<[1], [0], [0], [1], [0, 0, 1, 1], [], []>} : vector<16x32xbf16>, vector<32x32xbf16>, vector<16x32xf32> -> vector<16x32xf32>
    %c0_13 = arith.constant 0 : index
    %c0_14 = arith.constant 0 : index
    %39 = vector.load %arg5[%c0_13, %c0_14] : memref<1x32xf32, #tpu.memory_space<vmem>>, vector<1x32xf32>
    %40 = vector.broadcast %39 : vector<1x32xf32> to vector<16x32xf32>
    %41 = arith.addf %38, %40 : vector<16x32xf32>
    %cst_15 = arith.constant dense<0.000000e+00> : vector<16xf32>
    %42 = vector.multi_reduction <add>, %41, %cst_15 [1] : vector<16x32xf32> to vector<16xf32>
    %43 = vector.shape_cast %42 : vector<16xf32> to vector<16x1xf32>
    %cst_16 = arith.constant 3.200000e+01 : f32
    %44 = vector.broadcast %cst_16 : f32 to vector<16x1xf32>
    %45 = arith.divf %43, %44 : vector<16x1xf32>
    %46 = vector.broadcast %45 : vector<16x1xf32> to vector<16x32xf32>
    %47 = arith.subf %41, %46 : vector<16x32xf32>
    %48 = arith.mulf %47, %47 : vector<16x32xf32>
    %cst_17 = arith.constant dense<0.000000e+00> : vector<16xf32>
    %49 = vector.multi_reduction <add>, %48, %cst_17 [1] : vector<16x32xf32> to vector<16xf32>
    %50 = vector.shape_cast %49 : vector<16xf32> to vector<16x1xf32>
    %cst_18 = arith.constant 3.200000e+01 : f32
    %51 = vector.broadcast %cst_18 : f32 to vector<16x1xf32>
    %52 = arith.divf %50, %51 : vector<16x1xf32>
    %53 = vector.broadcast %45 : vector<16x1xf32> to vector<16x32xf32>
    %54 = arith.subf %41, %53 : vector<16x32xf32>
    %cst_19 = arith.constant 9.99999974E-6 : f32
    %55 = vector.broadcast %cst_19 : f32 to vector<16x1xf32>
    %56 = arith.addf %52, %55 : vector<16x1xf32>
    %57 = math.rsqrt %56 : vector<16x1xf32>
    %58 = vector.broadcast %57 : vector<16x1xf32> to vector<16x32xf32>
    %59 = arith.mulf %54, %58 : vector<16x32xf32>
    %c0_20 = arith.constant 0 : index
    %c0_21 = arith.constant 0 : index
    %60 = vector.load %arg6[%c0_20, %c0_21] : memref<1x32xf32, #tpu.memory_space<vmem>>, vector<1x32xf32>
    %61 = vector.broadcast %60 : vector<1x32xf32> to vector<16x32xf32>
    %62 = arith.mulf %59, %61 : vector<16x32xf32>
    %c0_22 = arith.constant 0 : index
    %c0_23 = arith.constant 0 : index
    %63 = vector.load %arg7[%c0_22, %c0_23] : memref<1x32xf32, #tpu.memory_space<vmem>>, vector<1x32xf32>
    %64 = vector.broadcast %63 : vector<1x32xf32> to vector<16x32xf32>
    %65 = arith.addf %62, %64 : vector<16x32xf32>
    %66 = vector.shape_cast %65 : vector<16x32xf32> to vector<2x256xf32>
    %c0_24 = arith.constant 0 : index
    %c0_25 = arith.constant 0 : index
    %67 = vector.load %arg8[%c0_24, %c0_25] : memref<2x256xf32, #tpu.memory_space<vmem>>, vector<2x256xf32>
    tpu.vector_store %arg8[%c0_24, %c0_25], %66 {strides = array<i32>} : memref<2x256xf32, #tpu.memory_space<vmem>>, vector<2x256xf32>,
    return
  }
  func.func @transform_0(%arg0: i32) -> (i32, i32) {
    %c0_i32 = arith.constant 0 : i32
    %c0_i32_0 = arith.constant 0 : i32
    return %arg0, %c0_i32 : i32, i32
  }
  func.func @transform_1(%arg0: i32) -> (i32, i32) {
    %c0_i32 = arith.constant 0 : i32
    %c0_i32_0 = arith.constant 0 : i32
    %c0_i32_1 = arith.constant 0 : i32
    return %c0_i32, %c0_i32_0 : i32, i32
  }
  func.func @transform_2(%arg0: i32) -> (i32, i32) {
    %c0_i32 = arith.constant 0 : i32
    %c0_i32_0 = arith.constant 0 : i32
    %c0_i32_1 = arith.constant 0 : i32
    return %c0_i32, %c0_i32_0 : i32, i32
  }
  func.func @transform_3(%arg0: i32) -> (i32, i32) {
    %c0_i32 = arith.constant 0 : i32
    %c0_i32_0 = arith.constant 0 : i32
    %c0_i32_1 = arith.constant 0 : i32
    return %c0_i32, %c0_i32_0 : i32, i32
  }
  func.func @transform_4(%arg0: i32) -> (i32, i32) {
    %c0_i32 = arith.constant 0 : i32
    %c0_i32_0 = arith.constant 0 : i32
    %c0_i32_1 = arith.constant 0 : i32
    return %c0_i32, %c0_i32_0 : i32, i32
  }
  func.func @transform_5(%arg0: i32) -> (i32, i32) {
    %c0_i32 = arith.constant 0 : i32
    %c0_i32_0 = arith.constant 0 : i32
    %c0_i32_1 = arith.constant 0 : i32
    return %c0_i32, %c0_i32_0 : i32, i32
  }
  func.func @transform_6(%arg0: i32) -> (i32, i32) {
    %c0_i32 = arith.constant 0 : i32
    %c0_i32_0 = arith.constant 0 : i32
    %c0_i32_1 = arith.constant 0 : i32
    return %c0_i32, %c0_i32_0 : i32, i32
  }
  func.func @transform_7(%arg0: i32) -> (i32, i32) {
    %c0_i32 = arith.constant 0 : i32
    %c0_i32_0 = arith.constant 0 : i32
    return %arg0, %c0_i32 : i32, i32
  }
}

module attributes {stable_mosaic.version = 11 : i64} {
  func.func @mha_kernel(%arg0: i32, %arg1: memref<2x256xbf16, #tpu.memory_space<vmem>>, %arg2: memref<32x96xbf16, #tpu.memory_space<vmem>>, %arg3: memref<1x96xf32, #tpu.memory_space<vmem>>, %arg4: memref<32x32xbf16, #tpu.memory_space<vmem>>, %arg5: memref<1x32xf32, #tpu.memory_space<vmem>>, %arg6: memref<1x32xf32, #tpu.memory_space<vmem>>, %arg7: memref<1x32xf32, #tpu.memory_space<vmem>>, %arg8: memref<2x256xf32, #tpu.memory_space<vmem>>) attributes {dimension_semantics = [#tpu.dimension_semantics<parallel>], iteration_bounds = array<i64: 1>, scalar_prefetch = 0 : i64, scratch_operands = 0 : i64, tpu.core_type = #tpu.core_type<tc>, window_params = [{transform_indices = @transform_0, window_bounds = array<i64: 2, 256>}, {pipeline_mode = #tpu.pipeline_mode<synchronous>, transform_indices = @transform_1, window_bounds = array<i64: 32, 96>}, {pipeline_mode = #tpu.pipeline_mode<synchronous>, transform_indices = @transform_2, window_bounds = array<i64: 1, 96>}, {pipeline_mode = #tpu.pipeline_mode<synchronous>, transform_indices = @transform_3, window_bounds = array<i64: 32, 32>}, {pipeline_mode = #tpu.pipeline_mode<synchronous>, transform_indices = @transform_4, window_bounds = array<i64: 1, 32>}, {pipeline_mode = #tpu.pipeline_mode<synchronous>, transform_indices = @transform_5, window_bounds = array<i64: 1, 32>}, {pipeline_mode = #tpu.pipeline_mode<synchronous>, transform_indices = @transform_6, window_bounds = array<i64: 1, 32>}, {transform_indices = @transform_7, window_bounds = array<i64: 2, 256>}]} {
    %c0 = arith.constant 0 : index
    %c0_0 = arith.constant 0 : index
    %0 = vector.load %arg1[%c0, %c0_0] : memref<2x256xbf16, #tpu.memory_space<vmem>>, vector<2x256xbf16>
    %1 = vector.shape_cast %0 : vector<2x256xbf16> to vector<16x32xbf16>
    %c0_1 = arith.constant 0 : index
    %c0_2 = arith.constant 0 : index
    %2 = vector.load %arg2[%c0_1, %c0_2] : memref<32x96xbf16, #tpu.memory_space<vmem>>, vector<32x96xbf16>
    %cst = arith.constant dense<0.000000e+00> : vector<16x96xf32>
    %3 = tpu.matmul %1, %2, %cst {dimension_numbers = #tpu.dot_dimension_numbers<[1], [0], [0], [1], [0, 0, 1, 1], [], []>} : vector<16x32xbf16>, vector<32x96xbf16>, vector<16x96xf32> -> vector<16x96xf32>
    %c0_3 = arith.constant 0 : index
    %c0_4 = arith.constant 0 : index
    %4 = vector.load %arg3[%c0_3, %c0_4] : memref<1x96xf32, #tpu.memory_space<vmem>>, vector<1x96xf32>
    %5 = vector.broadcast %4 : vector<1x96xf32> to vector<16x96xf32>
    %6 = arith.addf %3, %5 : vector<16x96xf32>
    %7 = vector.shape_cast %6 : vector<16x96xf32> to vector<2x8x12x8xf32>
    %8 = tpu.transpose %7, [0, 2, 1, 3] : vector<2x8x12x8xf32> -> vector<2x12x8x8xf32>
    %9 = vector.extract_strided_slice %8 {offsets = [0, 0, 0, 0], sizes = [2, 4, 8, 8], strides = [1, 1, 1, 1]} : vector<2x12x8x8xf32> to vector<2x4x8x8xf32>
    %cst_5 = arith.constant 0.353553385 : f32
    %10 = vector.broadcast %cst_5 : f32 to vector<2x4x8x8xf32>
    %11 = arith.mulf %9, %10 : vector<2x4x8x8xf32>
    %12 = vector.shape_cast %11 : vector<2x4x8x8xf32> to vector<8x8x8xf32>
    %13 = arith.truncf %12 : vector<8x8x8xf32> to vector<8x8x8xbf16>
    %14 = vector.extract_strided_slice %8 {offsets = [0, 4, 0, 0], sizes = [2, 4, 8, 8], strides = [1, 1, 1, 1]} : vector<2x12x8x8xf32> to vector<2x4x8x8xf32>
    %15 = vector.shape_cast %14 : vector<2x4x8x8xf32> to vector<8x8x8xf32>
    %16 = arith.truncf %15 : vector<8x8x8xf32> to vector<8x8x8xbf16>
    %17 = vector.extract_strided_slice %8 {offsets = [0, 8, 0, 0], sizes = [2, 4, 8, 8], strides = [1, 1, 1, 1]} : vector<2x12x8x8xf32> to vector<2x4x8x8xf32>
    %18 = vector.shape_cast %17 : vector<2x4x8x8xf32> to vector<8x8x8xf32>
    %19 = arith.truncf %18 : vector<8x8x8xf32> to vector<8x8x8xbf16>
    "tpu.trace_start"() <{level = 10 : i32, message = "bqd,bkd->bqk"}> : () -> ()
    %cst_6 = arith.constant dense<0.000000e+00> : vector<8x8x8xf32>
    %20 = tpu.matmul %13, %16, %cst_6 {dimension_numbers = #tpu.dot_dimension_numbers<[2], [2], [1], [1], [0, 0, 0, 1, 1, 1], [0], [0]>} : vector<8x8x8xbf16>, vector<8x8x8xbf16>, vector<8x8x8xf32> -> vector<8x8x8xf32>
    "tpu.trace_stop"() : () -> ()
    %cst_7 = arith.constant dense<0xFF800000> : vector<8x8xf32>
    %21 = vector.multi_reduction <maximumf>, %20, %cst_7 [2] : vector<8x8x8xf32> to vector<8x8xf32>
    %22 = vector.shape_cast %21 : vector<8x8xf32> to vector<8x8x1xf32>
    %23 = vector.broadcast %22 : vector<8x8x1xf32> to vector<8x8x8xf32>
    %24 = arith.subf %20, %23 : vector<8x8x8xf32>
    %25 = math.exp %24 : vector<8x8x8xf32>
    %cst_8 = arith.constant dense<0.000000e+00> : vector<8x8xf32>
    %26 = vector.multi_reduction <add>, %25, %cst_8 [2] : vector<8x8x8xf32> to vector<8x8xf32>
    %27 = vector.shape_cast %26 : vector<8x8xf32> to vector<8x8x1xf32>
    %28 = tpu.reciprocal %27 {approx = true} : vector<8x8x1xf32> -> vector<8x8x1xf32>
    %29 = vector.broadcast %28 : vector<8x8x1xf32> to vector<8x8x8xf32>
    %30 = arith.mulf %25, %29 : vector<8x8x8xf32>
    %31 = arith.truncf %30 : vector<8x8x8xf32> to vector<8x8x8xbf16>
    "tpu.trace_start"() <{level = 10 : i32, message = "bqk,bkd->bqd"}> : () -> ()
    %cst_9 = arith.constant dense<0.000000e+00> : vector<8x8x8xf32>
    %32 = tpu.matmul %31, %19, %cst_9 {dimension_numbers = #tpu.dot_dimension_numbers<[2], [1], [1], [2], [0, 0, 0, 1, 1, 2], [0], [0]>} : vector<8x8x8xbf16>, vector<8x8x8xbf16>, vector<8x8x8xf32> -> vector<8x8x8xf32>
    "tpu.trace_stop"() : () -> ()
    %33 = vector.shape_cast %32 : vector<8x8x8xf32> to vector<2x4x8x8xf32>
    %34 = tpu.transpose %33, [0, 2, 1, 3] : vector<2x4x8x8xf32> -> vector<2x8x4x8xf32>
    %35 = vector.shape_cast %34 : vector<2x8x4x8xf32> to vector<16x32xf32>
    %36 = arith.truncf %35 : vector<16x32xf32> to vector<16x32xbf16>
    %c0_10 = arith.constant 0 : index
    %c0_11 = arith.constant 0 : index
    %37 = vector.load %arg4[%c0_10, %c0_11] : memref<32x32xbf16, #tpu.memory_space<vmem>>, vector<32x32xbf16>
    %cst_12 = arith.constant dense<0.000000e+00> : vector<16x32xf32>
    %38 = tpu.matmul %36, %37, %cst_12 {dimension_numbers = #tpu.dot_dimension_numbers<[1], [0], [0], [1], [0, 0, 1, 1], [], []>} : vector<16x32xbf16>, vector<32x32xbf16>, vector<16x32xf32> -> vector<16x32xf32>
    %c0_13 = arith.constant 0 : index
    %c0_14 = arith.constant 0 : index
    %39 = vector.load %arg5[%c0_13, %c0_14] : memref<1x32xf32, #tpu.memory_space<vmem>>, vector<1x32xf32>
    %40 = vector.broadcast %39 : vector<1x32xf32> to vector<16x32xf32>
    %41 = arith.addf %38, %40 : vector<16x32xf32>
    %cst_15 = arith.constant dense<0.000000e+00> : vector<16xf32>
    %42 = vector.multi_reduction <add>, %41, %cst_15 [1] : vector<16x32xf32> to vector<16xf32>
    %43 = vector.shape_cast %42 : vector<16xf32> to vector<16x1xf32>
    %cst_16 = arith.constant 3.200000e+01 : f32
    %44 = vector.broadcast %cst_16 : f32 to vector<16x1xf32>
    %45 = arith.divf %43, %44 : vector<16x1xf32>
    %46 = vector.broadcast %45 : vector<16x1xf32> to vector<16x32xf32>
    %47 = arith.subf %41, %46 : vector<16x32xf32>
    %48 = arith.mulf %47, %47 : vector<16x32xf32>
    %cst_17 = arith.constant dense<0.000000e+00> : vector<16xf32>
    %49 = vector.multi_reduction <add>, %48, %cst_17 [1] : vector<16x32xf32> to vector<16xf32>
    %50 = vector.shape_cast %49 : vector<16xf32> to vector<16x1xf32>
    %cst_18 = arith.constant 3.200000e+01 : f32
    %51 = vector.broadcast %cst_18 : f32 to vector<16x1xf32>
    %52 = arith.divf %50, %51 : vector<16x1xf32>
    %53 = vector.broadcast %45 : vector<16x1xf32> to vector<16x32xf32>
    %54 = arith.subf %41, %53 : vector<16x32xf32>
    %cst_19 = arith.constant 9.99999974E-6 : f32
    %55 = vector.broadcast %cst_19 : f32 to vector<16x1xf32>
    %56 = arith.addf %52, %55 : vector<16x1xf32>
    %57 = math.rsqrt %56 : vector<16x1xf32>
    %58 = vector.broadcast %57 : vector<16x1xf32> to vector<16x32xf32>
    %59 = arith.mulf %54, %58 : vector<16x32xf32>
    %c0_20 = arith.constant 0 : index
    %c0_21 = arith.constant 0 : index
    %60 = vector.load %arg6[%c0_20, %c0_21] : memref<1x32xf32, #tpu.memory_space<vmem>>, vector<1x32xf32>
    %61 = vector.broadcast %60 : vector<1x32xf32> to vector<16x32xf32>
    %62 = arith.mulf %59, %61 : vector<16x32xf32>
    %c0_22 = arith.constant 0 : index
    %c0_23 = arith.constant 0 : index
    %63 = vector.load %arg7[%c0_22, %c0_23] : memref<1x32xf32, #tpu.memory_space<vmem>>, vector<1x32xf32>
    %64 = vector.broadcast %63 : vector<1x32xf32> to vector<16x32xf32>
    %65 = arith.addf %62, %64 : vector<16x32xf32>
    %66 = vector.shape_cast %65 : vector<16x32xf32> to vector<2x256xf32>
    %c0_24 = arith.constant 0 : index
    %c0_25 = arith.constant 0 : index
    %67 = vector.load %arg8[%c0_24, %c0_25] : memref<2x256xf32, #tpu.memory_space<vmem>>, vector<2x256xf32>
    tpu.vector_store %arg8[%c0_24, %c0_25], %66 {strides = array<i32>} : memref<2x256xf32, #tpu.memory_space<vmem>>, vector<2x256xf32>,
    return
  }
  func.func @transform_0(%arg0: i32) -> (i32, i32) {
    %c0_i32 = arith.constant 0 : i32
    %c0_i32_0 = arith.constant 0 : i32
    return %arg0, %c0_i32 : i32, i32
  }
  func.func @transform_1(%arg0: i32) -> (i32, i32) {
    %c0_i32 = arith.constant 0 : i32
    %c0_i32_0 = arith.constant 0 : i32
    %c0_i32_1 = arith.constant 0 : i32
    return %c0_i32, %c0_i32_0 : i32, i32
  }
  func.func @transform_2(%arg0: i32) -> (i32, i32) {
    %c0_i32 = arith.constant 0 : i32
    %c0_i32_0 = arith.constant 0 : i32
    %c0_i32_1 = arith.constant 0 : i32
    return %c0_i32, %c0_i32_0 : i32, i32
  }
  func.func @transform_3(%arg0: i32) -> (i32, i32) {
    %c0_i32 = arith.constant 0 : i32
    %c0_i32_0 = arith.constant 0 : i32
    %c0_i32_1 = arith.constant 0 : i32
    return %c0_i32, %c0_i32_0 : i32, i32
  }
  func.func @transform_4(%arg0: i32) -> (i32, i32) {
    %c0_i32 = arith.constant 0 : i32
    %c0_i32_0 = arith.constant 0 : i32
    %c0_i32_1 = arith.constant 0 : i32
    return %c0_i32, %c0_i32_0 : i32, i32
  }
  func.func @transform_5(%arg0: i32) -> (i32, i32) {
    %c0_i32 = arith.constant 0 : i32
    %c0_i32_0 = arith.constant 0 : i32
    %c0_i32_1 = arith.constant 0 : i32
    return %c0_i32, %c0_i32_0 : i32, i32
  }
  func.func @transform_6(%arg0: i32) -> (i32, i32) {
    %c0_i32 = arith.constant 0 : i32
    %c0_i32_0 = arith.constant 0 : i32
    %c0_i32_1 = arith.constant 0 : i32
    return %c0_i32, %c0_i32_0 : i32, i32
  }
  func.func @transform_7(%arg0: i32) -> (i32, i32) {
    %c0_i32 = arith.constant 0 : i32
    %c0_i32_0 = arith.constant 0 : i32
    return %arg0, %c0_i32 : i32, i32
  }
}

module attributes {stable_mosaic.version = 11 : i64} {
  func.func @mha_kernel(%arg0: i32, %arg1: memref<2x8x32xbf16, #tpu.memory_space<vmem>>, %arg2: memref<32x96xbf16, #tpu.memory_space<vmem>>, %arg3: memref<1x96xf32, #tpu.memory_space<vmem>>, %arg4: memref<32x32xbf16, #tpu.memory_space<vmem>>, %arg5: memref<1x32xf32, #tpu.memory_space<vmem>>, %arg6: memref<1x32xf32, #tpu.memory_space<vmem>>, %arg7: memref<1x32xf32, #tpu.memory_space<vmem>>, %arg8: memref<2x8x32xf32, #tpu.memory_space<vmem>>) attributes {dimension_semantics = [#tpu.dimension_semantics<parallel>], iteration_bounds = array<i64: 1>, scalar_prefetch = 0 : i64, scratch_operands = 0 : i64, tpu.core_type = #tpu.core_type<tc>, window_params = [{transform_indices = @transform_0, window_bounds = array<i64: 2, 8, 32>}, {pipeline_mode = #tpu.pipeline_mode<synchronous>, transform_indices = @transform_1, window_bounds = array<i64: 32, 96>}, {pipeline_mode = #tpu.pipeline_mode<synchronous>, transform_indices = @transform_2, window_bounds = array<i64: 1, 96>}, {pipeline_mode = #tpu.pipeline_mode<synchronous>, transform_indices = @transform_3, window_bounds = array<i64: 32, 32>}, {pipeline_mode = #tpu.pipeline_mode<synchronous>, transform_indices = @transform_4, window_bounds = array<i64: 1, 32>}, {pipeline_mode = #tpu.pipeline_mode<synchronous>, transform_indices = @transform_5, window_bounds = array<i64: 1, 32>}, {pipeline_mode = #tpu.pipeline_mode<synchronous>, transform_indices = @transform_6, window_bounds = array<i64: 1, 32>}, {transform_indices = @transform_7, window_bounds = array<i64: 2, 8, 32>}]} {
    %c0 = arith.constant 0 : index
    %c0_0 = arith.constant 0 : index
    %c0_1 = arith.constant 0 : index
    %0 = vector.load %arg1[%c0, %c0_0, %c0_1] : memref<2x8x32xbf16, #tpu.memory_space<vmem>>, vector<2x8x32xbf16>
    %1 = vector.shape_cast %0 : vector<2x8x32xbf16> to vector<16x32xbf16>
    %c0_2 = arith.constant 0 : index
    %c0_3 = arith.constant 0 : index
    %2 = vector.load %arg2[%c0_2, %c0_3] : memref<32x96xbf16, #tpu.memory_space<vmem>>, vector<32x96xbf16>
    %cst = arith.constant dense<0.000000e+00> : vector<16x96xf32>
    %3 = tpu.matmul %1, %2, %cst {dimension_numbers = #tpu.dot_dimension_numbers<[1], [0], [0], [1], [0, 0, 1, 1], [], []>} : vector<16x32xbf16>, vector<32x96xbf16>, vector<16x96xf32> -> vector<16x96xf32>
    %c0_4 = arith.constant 0 : index
    %c0_5 = arith.constant 0 : index
    %4 = vector.load %arg3[%c0_4, %c0_5] : memref<1x96xf32, #tpu.memory_space<vmem>>, vector<1x96xf32>
    %5 = vector.broadcast %4 : vector<1x96xf32> to vector<16x96xf32>
    %6 = arith.addf %3, %5 : vector<16x96xf32>
    %7 = vector.shape_cast %6 : vector<16x96xf32> to vector<2x8x12x8xf32>
    %8 = tpu.transpose %7, [0, 2, 1, 3] : vector<2x8x12x8xf32> -> vector<2x12x8x8xf32>
    %9 = vector.extract_strided_slice %8 {offsets = [0, 0, 0, 0], sizes = [2, 4, 8, 8], strides = [1, 1, 1, 1]} : vector<2x12x8x8xf32> to vector<2x4x8x8xf32>
    %cst_6 = arith.constant 0.353553385 : f32
    %10 = vector.broadcast %cst_6 : f32 to vector<2x4x8x8xf32>
    %11 = arith.mulf %9, %10 : vector<2x4x8x8xf32>
    %12 = vector.shape_cast %11 : vector<2x4x8x8xf32> to vector<8x8x8xf32>
    %13 = arith.truncf %12 : vector<8x8x8xf32> to vector<8x8x8xbf16>
    %14 = vector.extract_strided_slice %8 {offsets = [0, 4, 0, 0], sizes = [2, 4, 8, 8], strides = [1, 1, 1, 1]} : vector<2x12x8x8xf32> to vector<2x4x8x8xf32>
    %15 = vector.shape_cast %14 : vector<2x4x8x8xf32> to vector<8x8x8xf32>
    %16 = arith.truncf %15 : vector<8x8x8xf32> to vector<8x8x8xbf16>
    %17 = vector.extract_strided_slice %8 {offsets = [0, 8, 0, 0], sizes = [2, 4, 8, 8], strides = [1, 1, 1, 1]} : vector<2x12x8x8xf32> to vector<2x4x8x8xf32>
    %18 = vector.shape_cast %17 : vector<2x4x8x8xf32> to vector<8x8x8xf32>
    %19 = arith.truncf %18 : vector<8x8x8xf32> to vector<8x8x8xbf16>
    "tpu.trace_start"() <{level = 10 : i32, message = "bqd,bkd->bqk"}> : () -> ()
    %cst_7 = arith.constant dense<0.000000e+00> : vector<8x8x8xf32>
    %20 = tpu.matmul %13, %16, %cst_7 {dimension_numbers = #tpu.dot_dimension_numbers<[2], [2], [1], [1], [0, 0, 0, 1, 1, 1], [0], [0]>} : vector<8x8x8xbf16>, vector<8x8x8xbf16>, vector<8x8x8xf32> -> vector<8x8x8xf32>
    "tpu.trace_stop"() : () -> ()
    %cst_8 = arith.constant dense<0xFF800000> : vector<8x8xf32>
    %21 = vector.multi_reduction <maximumf>, %20, %cst_8 [2] : vector<8x8x8xf32> to vector<8x8xf32>
    %22 = vector.shape_cast %21 : vector<8x8xf32> to vector<8x8x1xf32>
    %23 = vector.broadcast %22 : vector<8x8x1xf32> to vector<8x8x8xf32>
    %24 = arith.subf %20, %23 : vector<8x8x8xf32>
    %25 = math.exp %24 : vector<8x8x8xf32>
    %cst_9 = arith.constant dense<0.000000e+00> : vector<8x8xf32>
    %26 = vector.multi_reduction <add>, %25, %cst_9 [2] : vector<8x8x8xf32> to vector<8x8xf32>
    %27 = vector.shape_cast %26 : vector<8x8xf32> to vector<8x8x1xf32>
    %28 = tpu.reciprocal %27 {approx = true} : vector<8x8x1xf32> -> vector<8x8x1xf32>
    %29 = vector.broadcast %28 : vector<8x8x1xf32> to vector<8x8x8xf32>
    %30 = arith.mulf %25, %29 : vector<8x8x8xf32>
    %31 = arith.truncf %30 : vector<8x8x8xf32> to vector<8x8x8xbf16>
    "tpu.trace_start"() <{level = 10 : i32, message = "bqk,bkd->bqd"}> : () -> ()
    %cst_10 = arith.constant dense<0.000000e+00> : vector<8x8x8xf32>
    %32 = tpu.matmul %31, %19, %cst_10 {dimension_numbers = #tpu.dot_dimension_numbers<[2], [1], [1], [2], [0, 0, 0, 1, 1, 2], [0], [0]>} : vector<8x8x8xbf16>, vector<8x8x8xbf16>, vector<8x8x8xf32> -> vector<8x8x8xf32>
    "tpu.trace_stop"() : () -> ()
    %33 = vector.shape_cast %32 : vector<8x8x8xf32> to vector<2x4x8x8xf32>
    %34 = tpu.transpose %33, [0, 2, 1, 3] : vector<2x4x8x8xf32> -> vector<2x8x4x8xf32>
    %35 = vector.shape_cast %34 : vector<2x8x4x8xf32> to vector<16x32xf32>
    %36 = arith.truncf %35 : vector<16x32xf32> to vector<16x32xbf16>
    %c0_11 = arith.constant 0 : index
    %c0_12 = arith.constant 0 : index
    %37 = vector.load %arg4[%c0_11, %c0_12] : memref<32x32xbf16, #tpu.memory_space<vmem>>, vector<32x32xbf16>
    %cst_13 = arith.constant dense<0.000000e+00> : vector<16x32xf32>
    %38 = tpu.matmul %36, %37, %cst_13 {dimension_numbers = #tpu.dot_dimension_numbers<[1], [0], [0], [1], [0, 0, 1, 1], [], []>} : vector<16x32xbf16>, vector<32x32xbf16>, vector<16x32xf32> -> vector<16x32xf32>
    %c0_14 = arith.constant 0 : index
    %c0_15 = arith.constant 0 : index
    %39 = vector.load %arg5[%c0_14, %c0_15] : memref<1x32xf32, #tpu.memory_space<vmem>>, vector<1x32xf32>
    %40 = vector.broadcast %39 : vector<1x32xf32> to vector<16x32xf32>
    %41 = arith.addf %38, %40 : vector<16x32xf32>
    %cst_16 = arith.constant dense<0.000000e+00> : vector<16xf32>
    %42 = vector.multi_reduction <add>, %41, %cst_16 [1] : vector<16x32xf32> to vector<16xf32>
    %43 = vector.shape_cast %42 : vector<16xf32> to vector<16x1xf32>
    %cst_17 = arith.constant 3.200000e+01 : f32
    %44 = vector.broadcast %cst_17 : f32 to vector<16x1xf32>
    %45 = arith.divf %43, %44 : vector<16x1xf32>
    %46 = vector.broadcast %45 : vector<16x1xf32> to vector<16x32xf32>
    %47 = arith.subf %41, %46 : vector<16x32xf32>
    %48 = arith.mulf %47, %47 : vector<16x32xf32>
    %cst_18 = arith.constant dense<0.000000e+00> : vector<16xf32>
    %49 = vector.multi_reduction <add>, %48, %cst_18 [1] : vector<16x32xf32> to vector<16xf32>
    %50 = vector.shape_cast %49 : vector<16xf32> to vector<16x1xf32>
    %cst_19 = arith.constant 3.200000e+01 : f32
    %51 = vector.broadcast %cst_19 : f32 to vector<16x1xf32>
    %52 = arith.divf %50, %51 : vector<16x1xf32>
    %53 = vector.broadcast %45 : vector<16x1xf32> to vector<16x32xf32>
    %54 = arith.subf %41, %53 : vector<16x32xf32>
    %cst_20 = arith.constant 9.99999974E-6 : f32
    %55 = vector.broadcast %cst_20 : f32 to vector<16x1xf32>
    %56 = arith.addf %52, %55 : vector<16x1xf32>
    %57 = math.rsqrt %56 : vector<16x1xf32>
    %58 = vector.broadcast %57 : vector<16x1xf32> to vector<16x32xf32>
    %59 = arith.mulf %54, %58 : vector<16x32xf32>
    %c0_21 = arith.constant 0 : index
    %c0_22 = arith.constant 0 : index
    %60 = vector.load %arg6[%c0_21, %c0_22] : memref<1x32xf32, #tpu.memory_space<vmem>>, vector<1x32xf32>
    %61 = vector.broadcast %60 : vector<1x32xf32> to vector<16x32xf32>
    %62 = arith.mulf %59, %61 : vector<16x32xf32>
    %c0_23 = arith.constant 0 : index
    %c0_24 = arith.constant 0 : index
    %63 = vector.load %arg7[%c0_23, %c0_24] : memref<1x32xf32, #tpu.memory_space<vmem>>, vector<1x32xf32>
    %64 = vector.broadcast %63 : vector<1x32xf32> to vector<16x32xf32>
    %65 = arith.addf %62, %64 : vector<16x32xf32>
    %66 = vector.shape_cast %65 : vector<16x32xf32> to vector<2x8x32xf32>
    %c0_25 = arith.constant 0 : index
    %c0_26 = arith.constant 0 : index
    %c0_27 = arith.constant 0 : index
    %67 = vector.load %arg8[%c0_25, %c0_26, %c0_27] : memref<2x8x32xf32, #tpu.memory_space<vmem>>, vector<2x8x32xf32>
    tpu.vector_store %arg8[%c0_25, %c0_26, %c0_27], %66 {strides = array<i32>} : memref<2x8x32xf32, #tpu.memory_space<vmem>>, vector<2x8x32xf32>,
    return
  }
  func.func @transform_0(%arg0: i32) -> (i32, i32, i32) {
    %c0_i32 = arith.constant 0 : i32
    %c0_i32_0 = arith.constant 0 : i32
    %c0_i32_1 = arith.constant 0 : i32
    return %arg0, %c0_i32, %c0_i32_0 : i32, i32, i32
  }
  func.func @transform_1(%arg0: i32) -> (i32, i32) {
    %c0_i32 = arith.constant 0 : i32
    %c0_i32_0 = arith.constant 0 : i32
    %c0_i32_1 = arith.constant 0 : i32
    return %c0_i32, %c0_i32_0 : i32, i32
  }
  func.func @transform_2(%arg0: i32) -> (i32, i32) {
    %c0_i32 = arith.constant 0 : i32
    %c0_i32_0 = arith.constant 0 : i32
    %c0_i32_1 = arith.constant 0 : i32
    return %c0_i32, %c0_i32_0 : i32, i32
  }
  func.func @transform_3(%arg0: i32) -> (i32, i32) {
    %c0_i32 = arith.constant 0 : i32
    %c0_i32_0 = arith.constant 0 : i32
    %c0_i32_1 = arith.constant 0 : i32
    return %c0_i32, %c0_i32_0 : i32, i32
  }
  func.func @transform_4(%arg0: i32) -> (i32, i32) {
    %c0_i32 = arith.constant 0 : i32
    %c0_i32_0 = arith.constant 0 : i32
    %c0_i32_1 = arith.constant 0 : i32
    return %c0_i32, %c0_i32_0 : i32, i32
  }
  func.func @transform_5(%arg0: i32) -> (i32, i32) {
    %c0_i32 = arith.constant 0 : i32
    %c0_i32_0 = arith.constant 0 : i32
    %c0_i32_1 = arith.constant 0 : i32
    return %c0_i32, %c0_i32_0 : i32, i32
  }
  func.func @transform_6(%arg0: i32) -> (i32, i32) {
    %c0_i32 = arith.constant 0 : i32
    %c0_i32_0 = arith.constant 0 : i32
    %c0_i32_1 = arith.constant 0 : i32
    return %c0_i32, %c0_i32_0 : i32, i32
  }
  func.func @transform_7(%arg0: i32) -> (i32, i32, i32) {
    %c0_i32 = arith.constant 0 : i32
    %c0_i32_0 = arith.constant 0 : i32
    %c0_i32_1 = arith.constant 0 : i32
    return %arg0, %c0_i32, %c0_i32_0 : i32, i32, i32
  }
}

module attributes {stable_mosaic.version = 11 : i64} {
  func.func @mha_kernel(%arg0: i32, %arg1: memref<2x8x32xbf16, #tpu.memory_space<vmem>>, %arg2: memref<32x96xbf16, #tpu.memory_space<vmem>>, %arg3: memref<1x96xf32, #tpu.memory_space<vmem>>, %arg4: memref<32x32xbf16, #tpu.memory_space<vmem>>, %arg5: memref<1x32xf32, #tpu.memory_space<vmem>>, %arg6: memref<1x32xf32, #tpu.memory_space<vmem>>, %arg7: memref<1x32xf32, #tpu.memory_space<vmem>>, %arg8: memref<2x8x32xf32, #tpu.memory_space<vmem>>) attributes {dimension_semantics = [#tpu.dimension_semantics<parallel>], iteration_bounds = array<i64: 1>, scalar_prefetch = 0 : i64, scratch_operands = 0 : i64, tpu.core_type = #tpu.core_type<tc>, window_params = [{transform_indices = @transform_0, window_bounds = array<i64: 2, 8, 32>}, {pipeline_mode = #tpu.pipeline_mode<synchronous>, transform_indices = @transform_1, window_bounds = array<i64: 32, 96>}, {pipeline_mode = #tpu.pipeline_mode<synchronous>, transform_indices = @transform_2, window_bounds = array<i64: 1, 96>}, {pipeline_mode = #tpu.pipeline_mode<synchronous>, transform_indices = @transform_3, window_bounds = array<i64: 32, 32>}, {pipeline_mode = #tpu.pipeline_mode<synchronous>, transform_indices = @transform_4, window_bounds = array<i64: 1, 32>}, {pipeline_mode = #tpu.pipeline_mode<synchronous>, transform_indices = @transform_5, window_bounds = array<i64: 1, 32>}, {pipeline_mode = #tpu.pipeline_mode<synchronous>, transform_indices = @transform_6, window_bounds = array<i64: 1, 32>}, {transform_indices = @transform_7, window_bounds = array<i64: 2, 8, 32>}]} {
    %c0 = arith.constant 0 : index
    %c0_0 = arith.constant 0 : index
    %c0_1 = arith.constant 0 : index
    %0 = vector.load %arg1[%c0, %c0_0, %c0_1] : memref<2x8x32xbf16, #tpu.memory_space<vmem>>, vector<2x8x32xbf16>
    %1 = vector.shape_cast %0 : vector<2x8x32xbf16> to vector<16x32xbf16>
    %c0_2 = arith.constant 0 : index
    %c0_3 = arith.constant 0 : index
    %2 = vector.load %arg2[%c0_2, %c0_3] : memref<32x96xbf16, #tpu.memory_space<vmem>>, vector<32x96xbf16>
    %cst = arith.constant dense<0.000000e+00> : vector<16x96xf32>
    %3 = tpu.matmul %1, %2, %cst {dimension_numbers = #tpu.dot_dimension_numbers<[1], [0], [0], [1], [0, 0, 1, 1], [], []>} : vector<16x32xbf16>, vector<32x96xbf16>, vector<16x96xf32> -> vector<16x96xf32>
    %c0_4 = arith.constant 0 : index
    %c0_5 = arith.constant 0 : index
    %4 = vector.load %arg3[%c0_4, %c0_5] : memref<1x96xf32, #tpu.memory_space<vmem>>, vector<1x96xf32>
    %5 = vector.broadcast %4 : vector<1x96xf32> to vector<16x96xf32>
    %6 = arith.addf %3, %5 : vector<16x96xf32>
    %7 = vector.shape_cast %6 : vector<16x96xf32> to vector<2x8x12x8xf32>
    %8 = tpu.transpose %7, [0, 2, 1, 3] : vector<2x8x12x8xf32> -> vector<2x12x8x8xf32>
    %9 = vector.extract_strided_slice %8 {offsets = [0, 0, 0, 0], sizes = [2, 4, 8, 8], strides = [1, 1, 1, 1]} : vector<2x12x8x8xf32> to vector<2x4x8x8xf32>
    %cst_6 = arith.constant 0.353553385 : f32
    %10 = vector.broadcast %cst_6 : f32 to vector<2x4x8x8xf32>
    %11 = arith.mulf %9, %10 : vector<2x4x8x8xf32>
    %12 = vector.shape_cast %11 : vector<2x4x8x8xf32> to vector<8x8x8xf32>
    %13 = arith.truncf %12 : vector<8x8x8xf32> to vector<8x8x8xbf16>
    %14 = vector.extract_strided_slice %8 {offsets = [0, 4, 0, 0], sizes = [2, 4, 8, 8], strides = [1, 1, 1, 1]} : vector<2x12x8x8xf32> to vector<2x4x8x8xf32>
    %15 = vector.shape_cast %14 : vector<2x4x8x8xf32> to vector<8x8x8xf32>
    %16 = arith.truncf %15 : vector<8x8x8xf32> to vector<8x8x8xbf16>
    %17 = vector.extract_strided_slice %8 {offsets = [0, 8, 0, 0], sizes = [2, 4, 8, 8], strides = [1, 1, 1, 1]} : vector<2x12x8x8xf32> to vector<2x4x8x8xf32>
    %18 = vector.shape_cast %17 : vector<2x4x8x8xf32> to vector<8x8x8xf32>
    %19 = arith.truncf %18 : vector<8x8x8xf32> to vector<8x8x8xbf16>
    "tpu.trace_start"() <{level = 10 : i32, message = "bqd,bkd->bqk"}> : () -> ()
    %cst_7 = arith.constant dense<0.000000e+00> : vector<8x8x8xf32>
    %20 = tpu.matmul %13, %16, %cst_7 {dimension_numbers = #tpu.dot_dimension_numbers<[2], [2], [1], [1], [0, 0, 0, 1, 1, 1], [0], [0]>} : vector<8x8x8xbf16>, vector<8x8x8xbf16>, vector<8x8x8xf32> -> vector<8x8x8xf32>
    "tpu.trace_stop"() : () -> ()
    %cst_8 = arith.constant dense<0xFF800000> : vector<8x8xf32>
    %21 = vector.multi_reduction <maximumf>, %20, %cst_8 [2] : vector<8x8x8xf32> to vector<8x8xf32>
    %22 = vector.shape_cast %21 : vector<8x8xf32> to vector<8x8x1xf32>
    %23 = vector.broadcast %22 : vector<8x8x1xf32> to vector<8x8x8xf32>
    %24 = arith.subf %20, %23 : vector<8x8x8xf32>
    %25 = math.exp %24 : vector<8x8x8xf32>
    %cst_9 = arith.constant dense<0.000000e+00> : vector<8x8xf32>
    %26 = vector.multi_reduction <add>, %25, %cst_9 [2] : vector<8x8x8xf32> to vector<8x8xf32>
    %27 = vector.shape_cast %26 : vector<8x8xf32> to vector<8x8x1xf32>
    %28 = tpu.reciprocal %27 {approx = true} : vector<8x8x1xf32> -> vector<8x8x1xf32>
    %29 = vector.broadcast %28 : vector<8x8x1xf32> to vector<8x8x8xf32>
    %30 = arith.mulf %25, %29 : vector<8x8x8xf32>
    %31 = arith.truncf %30 : vector<8x8x8xf32> to vector<8x8x8xbf16>
    "tpu.trace_start"() <{level = 10 : i32, message = "bqk,bkd->bqd"}> : () -> ()
    %cst_10 = arith.constant dense<0.000000e+00> : vector<8x8x8xf32>
    %32 = tpu.matmul %31, %19, %cst_10 {dimension_numbers = #tpu.dot_dimension_numbers<[2], [1], [1], [2], [0, 0, 0, 1, 1, 2], [0], [0]>} : vector<8x8x8xbf16>, vector<8x8x8xbf16>, vector<8x8x8xf32> -> vector<8x8x8xf32>
    "tpu.trace_stop"() : () -> ()
    %33 = vector.shape_cast %32 : vector<8x8x8xf32> to vector<2x4x8x8xf32>
    %34 = tpu.transpose %33, [0, 2, 1, 3] : vector<2x4x8x8xf32> -> vector<2x8x4x8xf32>
    %35 = vector.shape_cast %34 : vector<2x8x4x8xf32> to vector<16x32xf32>
    %36 = arith.truncf %35 : vector<16x32xf32> to vector<16x32xbf16>
    %c0_11 = arith.constant 0 : index
    %c0_12 = arith.constant 0 : index
    %37 = vector.load %arg4[%c0_11, %c0_12] : memref<32x32xbf16, #tpu.memory_space<vmem>>, vector<32x32xbf16>
    %cst_13 = arith.constant dense<0.000000e+00> : vector<16x32xf32>
    %38 = tpu.matmul %36, %37, %cst_13 {dimension_numbers = #tpu.dot_dimension_numbers<[1], [0], [0], [1], [0, 0, 1, 1], [], []>} : vector<16x32xbf16>, vector<32x32xbf16>, vector<16x32xf32> -> vector<16x32xf32>
    %c0_14 = arith.constant 0 : index
    %c0_15 = arith.constant 0 : index
    %39 = vector.load %arg5[%c0_14, %c0_15] : memref<1x32xf32, #tpu.memory_space<vmem>>, vector<1x32xf32>
    %40 = vector.broadcast %39 : vector<1x32xf32> to vector<16x32xf32>
    %41 = arith.addf %38, %40 : vector<16x32xf32>
    %cst_16 = arith.constant dense<0.000000e+00> : vector<16xf32>
    %42 = vector.multi_reduction <add>, %41, %cst_16 [1] : vector<16x32xf32> to vector<16xf32>
    %43 = vector.shape_cast %42 : vector<16xf32> to vector<16x1xf32>
    %cst_17 = arith.constant 3.200000e+01 : f32
    %44 = vector.broadcast %cst_17 : f32 to vector<16x1xf32>
    %45 = arith.divf %43, %44 : vector<16x1xf32>
    %46 = vector.broadcast %45 : vector<16x1xf32> to vector<16x32xf32>
    %47 = arith.subf %41, %46 : vector<16x32xf32>
    %48 = arith.mulf %47, %47 : vector<16x32xf32>
    %cst_18 = arith.constant dense<0.000000e+00> : vector<16xf32>
    %49 = vector.multi_reduction <add>, %48, %cst_18 [1] : vector<16x32xf32> to vector<16xf32>
    %50 = vector.shape_cast %49 : vector<16xf32> to vector<16x1xf32>
    %cst_19 = arith.constant 3.200000e+01 : f32
    %51 = vector.broadcast %cst_19 : f32 to vector<16x1xf32>
    %52 = arith.divf %50, %51 : vector<16x1xf32>
    %53 = vector.broadcast %45 : vector<16x1xf32> to vector<16x32xf32>
    %54 = arith.subf %41, %53 : vector<16x32xf32>
    %cst_20 = arith.constant 9.99999974E-6 : f32
    %55 = vector.broadcast %cst_20 : f32 to vector<16x1xf32>
    %56 = arith.addf %52, %55 : vector<16x1xf32>
    %57 = math.rsqrt %56 : vector<16x1xf32>
    %58 = vector.broadcast %57 : vector<16x1xf32> to vector<16x32xf32>
    %59 = arith.mulf %54, %58 : vector<16x32xf32>
    %c0_21 = arith.constant 0 : index
    %c0_22 = arith.constant 0 : index
    %60 = vector.load %arg6[%c0_21, %c0_22] : memref<1x32xf32, #tpu.memory_space<vmem>>, vector<1x32xf32>
    %61 = vector.broadcast %60 : vector<1x32xf32> to vector<16x32xf32>
    %62 = arith.mulf %59, %61 : vector<16x32xf32>
    %c0_23 = arith.constant 0 : index
    %c0_24 = arith.constant 0 : index
    %63 = vector.load %arg7[%c0_23, %c0_24] : memref<1x32xf32, #tpu.memory_space<vmem>>, vector<1x32xf32>
    %64 = vector.broadcast %63 : vector<1x32xf32> to vector<16x32xf32>
    %65 = arith.addf %62, %64 : vector<16x32xf32>
    %66 = vector.shape_cast %65 : vector<16x32xf32> to vector<2x8x32xf32>
    %c0_25 = arith.constant 0 : index
    %c0_26 = arith.constant 0 : index
    %c0_27 = arith.constant 0 : index
    %67 = vector.load %arg8[%c0_25, %c0_26, %c0_27] : memref<2x8x32xf32, #tpu.memory_space<vmem>>, vector<2x8x32xf32>
    tpu.vector_store %arg8[%c0_25, %c0_26, %c0_27], %66 {strides = array<i32>} : memref<2x8x32xf32, #tpu.memory_space<vmem>>, vector<2x8x32xf32>,
    return
  }
  func.func @transform_0(%arg0: i32) -> (i32, i32, i32) {
    %c0_i32 = arith.constant 0 : i32
    %c0_i32_0 = arith.constant 0 : i32
    %c0_i32_1 = arith.constant 0 : i32
    return %arg0, %c0_i32, %c0_i32_0 : i32, i32, i32
  }
  func.func @transform_1(%arg0: i32) -> (i32, i32) {
    %c0_i32 = arith.constant 0 : i32
    %c0_i32_0 = arith.constant 0 : i32
    %c0_i32_1 = arith.constant 0 : i32
    return %c0_i32, %c0_i32_0 : i32, i32
  }
  func.func @transform_2(%arg0: i32) -> (i32, i32) {
    %c0_i32 = arith.constant 0 : i32
    %c0_i32_0 = arith.constant 0 : i32
    %c0_i32_1 = arith.constant 0 : i32
    return %c0_i32, %c0_i32_0 : i32, i32
  }
  func.func @transform_3(%arg0: i32) -> (i32, i32) {
    %c0_i32 = arith.constant 0 : i32
    %c0_i32_0 = arith.constant 0 : i32
    %c0_i32_1 = arith.constant 0 : i32
    return %c0_i32, %c0_i32_0 : i32, i32
  }
  func.func @transform_4(%arg0: i32) -> (i32, i32) {
    %c0_i32 = arith.constant 0 : i32
    %c0_i32_0 = arith.constant 0 : i32
    %c0_i32_1 = arith.constant 0 : i32
    return %c0_i32, %c0_i32_0 : i32, i32
  }
  func.func @transform_5(%arg0: i32) -> (i32, i32) {
    %c0_i32 = arith.constant 0 : i32
    %c0_i32_0 = arith.constant 0 : i32
    %c0_i32_1 = arith.constant 0 : i32
    return %c0_i32, %c0_i32_0 : i32, i32
  }
  func.func @transform_6(%arg0: i32) -> (i32, i32) {
    %c0_i32 = arith.constant 0 : i32
    %c0_i32_0 = arith.constant 0 : i32
    %c0_i32_1 = arith.constant 0 : i32
    return %c0_i32, %c0_i32_0 : i32, i32
  }
  func.func @transform_7(%arg0: i32) -> (i32, i32, i32) {
    %c0_i32 = arith.constant 0 : i32
    %c0_i32_0 = arith.constant 0 : i32
    %c0_i32_1 = arith.constant 0 : i32
    return %arg0, %c0_i32, %c0_i32_0 : i32, i32, i32
  }
}

module attributes {stable_mosaic.version = 11 : i64} {
  func.func @mha_kernel(%arg0: i32, %arg1: memref<2x8x32xbf16, #tpu.memory_space<vmem>>, %arg2: memref<32x96xbf16, #tpu.memory_space<vmem>>, %arg3: memref<1x96xf32, #tpu.memory_space<vmem>>, %arg4: memref<32x32xbf16, #tpu.memory_space<vmem>>, %arg5: memref<1x32xf32, #tpu.memory_space<vmem>>, %arg6: memref<1x32xf32, #tpu.memory_space<vmem>>, %arg7: memref<1x32xf32, #tpu.memory_space<vmem>>, %arg8: memref<2x8x32xf32, #tpu.memory_space<vmem>>) attributes {dimension_semantics = [#tpu.dimension_semantics<parallel>], iteration_bounds = array<i64: 1>, scalar_prefetch = 0 : i64, scratch_operands = 0 : i64, tpu.core_type = #tpu.core_type<tc>, window_params = [{transform_indices = @transform_0, window_bounds = array<i64: 2, 8, 32>}, {pipeline_mode = #tpu.pipeline_mode<synchronous>, transform_indices = @transform_1, window_bounds = array<i64: 32, 96>}, {pipeline_mode = #tpu.pipeline_mode<synchronous>, transform_indices = @transform_2, window_bounds = array<i64: 1, 96>}, {pipeline_mode = #tpu.pipeline_mode<synchronous>, transform_indices = @transform_3, window_bounds = array<i64: 32, 32>}, {pipeline_mode = #tpu.pipeline_mode<synchronous>, transform_indices = @transform_4, window_bounds = array<i64: 1, 32>}, {pipeline_mode = #tpu.pipeline_mode<synchronous>, transform_indices = @transform_5, window_bounds = array<i64: 1, 32>}, {pipeline_mode = #tpu.pipeline_mode<synchronous>, transform_indices = @transform_6, window_bounds = array<i64: 1, 32>}, {transform_indices = @transform_7, window_bounds = array<i64: 2, 8, 32>}]} {
    %c0 = arith.constant 0 : index
    %c0_0 = arith.constant 0 : index
    %c0_1 = arith.constant 0 : index
    %0 = vector.load %arg1[%c0, %c0_0, %c0_1] : memref<2x8x32xbf16, #tpu.memory_space<vmem>>, vector<2x8x32xbf16>
    %1 = vector.shape_cast %0 : vector<2x8x32xbf16> to vector<16x32xbf16>
    %c0_2 = arith.constant 0 : index
    %c0_3 = arith.constant 0 : index
    %2 = vector.load %arg2[%c0_2, %c0_3] : memref<32x96xbf16, #tpu.memory_space<vmem>>, vector<32x96xbf16>
    %cst = arith.constant dense<0.000000e+00> : vector<16x96xf32>
    %3 = tpu.matmul %1, %2, %cst {dimension_numbers = #tpu.dot_dimension_numbers<[1], [0], [0], [1], [0, 0, 1, 1], [], []>} : vector<16x32xbf16>, vector<32x96xbf16>, vector<16x96xf32> -> vector<16x96xf32>
    %c0_4 = arith.constant 0 : index
    %c0_5 = arith.constant 0 : index
    %4 = vector.load %arg3[%c0_4, %c0_5] : memref<1x96xf32, #tpu.memory_space<vmem>>, vector<1x96xf32>
    %5 = vector.broadcast %4 : vector<1x96xf32> to vector<16x96xf32>
    %6 = arith.addf %3, %5 : vector<16x96xf32>
    %c0_6 = arith.constant 0 : index
    %c0_7 = arith.constant 0 : index
    %7 = vector.load %arg4[%c0_6, %c0_7] : memref<32x32xbf16, #tpu.memory_space<vmem>>, vector<32x32xbf16>
    %8 = vector.extract_strided_slice %6 {offsets = [0, 0], sizes = [16, 8], strides = [1, 1]} : vector<16x96xf32> to vector<16x8xf32>
    %cst_8 = arith.constant 0.353553385 : f32
    %9 = vector.broadcast %cst_8 : f32 to vector<16x8xf32>
    %10 = arith.mulf %8, %9 : vector<16x8xf32>
    %11 = arith.truncf %10 : vector<16x8xf32> to vector<16x8xbf16>
    %12 = vector.shape_cast %11 : vector<16x8xbf16> to vector<2x8x8xbf16>
    %13 = vector.extract_strided_slice %6 {offsets = [0, 32], sizes = [16, 8], strides = [1, 1]} : vector<16x96xf32> to vector<16x8xf32>
    %14 = arith.truncf %13 : vector<16x8xf32> to vector<16x8xbf16>
    %15 = vector.shape_cast %14 : vector<16x8xbf16> to vector<2x8x8xbf16>
    %16 = vector.extract_strided_slice %6 {offsets = [0, 64], sizes = [16, 8], strides = [1, 1]} : vector<16x96xf32> to vector<16x8xf32>
    %17 = arith.truncf %16 : vector<16x8xf32> to vector<16x8xbf16>
    %18 = vector.shape_cast %17 : vector<16x8xbf16> to vector<2x8x8xbf16>
    "tpu.trace_start"() <{level = 10 : i32, message = "bqd,bkd->bqk"}> : () -> ()
    %cst_9 = arith.constant dense<0.000000e+00> : vector<2x8x8xf32>
    %19 = tpu.matmul %12, %15, %cst_9 {dimension_numbers = #tpu.dot_dimension_numbers<[2], [2], [1], [1], [0, 0, 0, 1, 1, 1], [0], [0]>} : vector<2x8x8xbf16>, vector<2x8x8xbf16>, vector<2x8x8xf32> -> vector<2x8x8xf32>
    "tpu.trace_stop"() : () -> ()
    %cst_10 = arith.constant dense<0xFF800000> : vector<2x8xf32>
    %20 = vector.multi_reduction <maximumf>, %19, %cst_10 [2] : vector<2x8x8xf32> to vector<2x8xf32>
    %21 = vector.shape_cast %20 : vector<2x8xf32> to vector<2x8x1xf32>
    %22 = vector.broadcast %21 : vector<2x8x1xf32> to vector<2x8x8xf32>
    %23 = arith.subf %19, %22 : vector<2x8x8xf32>
    %24 = math.exp %23 : vector<2x8x8xf32>
    %cst_11 = arith.constant dense<0.000000e+00> : vector<2x8xf32>
    %25 = vector.multi_reduction <add>, %24, %cst_11 [2] : vector<2x8x8xf32> to vector<2x8xf32>
    %26 = vector.shape_cast %25 : vector<2x8xf32> to vector<2x8x1xf32>
    %27 = tpu.reciprocal %26 {approx = true} : vector<2x8x1xf32> -> vector<2x8x1xf32>
    %28 = vector.broadcast %27 : vector<2x8x1xf32> to vector<2x8x8xf32>
    %29 = arith.mulf %24, %28 : vector<2x8x8xf32>
    %30 = arith.truncf %29 : vector<2x8x8xf32> to vector<2x8x8xbf16>
    "tpu.trace_start"() <{level = 10 : i32, message = "bqk,bkd->bqd"}> : () -> ()
    %cst_12 = arith.constant dense<0.000000e+00> : vector<2x8x8xf32>
    %31 = tpu.matmul %30, %18, %cst_12 {dimension_numbers = #tpu.dot_dimension_numbers<[2], [1], [1], [2], [0, 0, 0, 1, 1, 2], [0], [0]>} : vector<2x8x8xbf16>, vector<2x8x8xbf16>, vector<2x8x8xf32> -> vector<2x8x8xf32>
    "tpu.trace_stop"() : () -> ()
    %32 = vector.shape_cast %31 : vector<2x8x8xf32> to vector<16x8xf32>
    %33 = arith.truncf %32 : vector<16x8xf32> to vector<16x8xbf16>
    %34 = vector.extract_strided_slice %7 {offsets = [0, 0], sizes = [8, 32], strides = [1, 1]} : vector<32x32xbf16> to vector<8x32xbf16>
    %cst_13 = arith.constant dense<0.000000e+00> : vector<16x32xf32>
    %35 = tpu.matmul %33, %34, %cst_13 {dimension_numbers = #tpu.dot_dimension_numbers<[1], [0], [0], [1], [0, 0, 1, 1], [], []>} : vector<16x8xbf16>, vector<8x32xbf16>, vector<16x32xf32> -> vector<16x32xf32>
    %36 = vector.extract_strided_slice %6 {offsets = [0, 8], sizes = [16, 8], strides = [1, 1]} : vector<16x96xf32> to vector<16x8xf32>
    %cst_14 = arith.constant 0.353553385 : f32
    %37 = vector.broadcast %cst_14 : f32 to vector<16x8xf32>
    %38 = arith.mulf %36, %37 : vector<16x8xf32>
    %39 = arith.truncf %38 : vector<16x8xf32> to vector<16x8xbf16>
    %40 = vector.shape_cast %39 : vector<16x8xbf16> to vector<2x8x8xbf16>
    %41 = vector.extract_strided_slice %6 {offsets = [0, 40], sizes = [16, 8], strides = [1, 1]} : vector<16x96xf32> to vector<16x8xf32>
    %42 = arith.truncf %41 : vector<16x8xf32> to vector<16x8xbf16>
    %43 = vector.shape_cast %42 : vector<16x8xbf16> to vector<2x8x8xbf16>
    %44 = vector.extract_strided_slice %6 {offsets = [0, 72], sizes = [16, 8], strides = [1, 1]} : vector<16x96xf32> to vector<16x8xf32>
    %45 = arith.truncf %44 : vector<16x8xf32> to vector<16x8xbf16>
    %46 = vector.shape_cast %45 : vector<16x8xbf16> to vector<2x8x8xbf16>
    "tpu.trace_start"() <{level = 10 : i32, message = "bqd,bkd->bqk"}> : () -> ()
    %cst_15 = arith.constant dense<0.000000e+00> : vector<2x8x8xf32>
    %47 = tpu.matmul %40, %43, %cst_15 {dimension_numbers = #tpu.dot_dimension_numbers<[2], [2], [1], [1], [0, 0, 0, 1, 1, 1], [0], [0]>} : vector<2x8x8xbf16>, vector<2x8x8xbf16>, vector<2x8x8xf32> -> vector<2x8x8xf32>
    "tpu.trace_stop"() : () -> ()
    %cst_16 = arith.constant dense<0xFF800000> : vector<2x8xf32>
    %48 = vector.multi_reduction <maximumf>, %47, %cst_16 [2] : vector<2x8x8xf32> to vector<2x8xf32>
    %49 = vector.shape_cast %48 : vector<2x8xf32> to vector<2x8x1xf32>
    %50 = vector.broadcast %49 : vector<2x8x1xf32> to vector<2x8x8xf32>
    %51 = arith.subf %47, %50 : vector<2x8x8xf32>
    %52 = math.exp %51 : vector<2x8x8xf32>
    %cst_17 = arith.constant dense<0.000000e+00> : vector<2x8xf32>
    %53 = vector.multi_reduction <add>, %52, %cst_17 [2] : vector<2x8x8xf32> to vector<2x8xf32>
    %54 = vector.shape_cast %53 : vector<2x8xf32> to vector<2x8x1xf32>
    %55 = tpu.reciprocal %54 {approx = true} : vector<2x8x1xf32> -> vector<2x8x1xf32>
    %56 = vector.broadcast %55 : vector<2x8x1xf32> to vector<2x8x8xf32>
    %57 = arith.mulf %52, %56 : vector<2x8x8xf32>
    %58 = arith.truncf %57 : vector<2x8x8xf32> to vector<2x8x8xbf16>
    "tpu.trace_start"() <{level = 10 : i32, message = "bqk,bkd->bqd"}> : () -> ()
    %cst_18 = arith.constant dense<0.000000e+00> : vector<2x8x8xf32>
    %59 = tpu.matmul %58, %46, %cst_18 {dimension_numbers = #tpu.dot_dimension_numbers<[2], [1], [1], [2], [0, 0, 0, 1, 1, 2], [0], [0]>} : vector<2x8x8xbf16>, vector<2x8x8xbf16>, vector<2x8x8xf32> -> vector<2x8x8xf32>
    "tpu.trace_stop"() : () -> ()
    %60 = vector.shape_cast %59 : vector<2x8x8xf32> to vector<16x8xf32>
    %61 = arith.truncf %60 : vector<16x8xf32> to vector<16x8xbf16>
    %62 = vector.extract_strided_slice %7 {offsets = [8, 0], sizes = [8, 32], strides = [1, 1]} : vector<32x32xbf16> to vector<8x32xbf16>
    %cst_19 = arith.constant dense<0.000000e+00> : vector<16x32xf32>
    %63 = tpu.matmul %61, %62, %cst_19 {dimension_numbers = #tpu.dot_dimension_numbers<[1], [0], [0], [1], [0, 0, 1, 1], [], []>} : vector<16x8xbf16>, vector<8x32xbf16>, vector<16x32xf32> -> vector<16x32xf32>
    %64 = arith.addf %35, %63 : vector<16x32xf32>
    %65 = vector.extract_strided_slice %6 {offsets = [0, 16], sizes = [16, 8], strides = [1, 1]} : vector<16x96xf32> to vector<16x8xf32>
    %cst_20 = arith.constant 0.353553385 : f32
    %66 = vector.broadcast %cst_20 : f32 to vector<16x8xf32>
    %67 = arith.mulf %65, %66 : vector<16x8xf32>
    %68 = arith.truncf %67 : vector<16x8xf32> to vector<16x8xbf16>
    %69 = vector.shape_cast %68 : vector<16x8xbf16> to vector<2x8x8xbf16>
    %70 = vector.extract_strided_slice %6 {offsets = [0, 48], sizes = [16, 8], strides = [1, 1]} : vector<16x96xf32> to vector<16x8xf32>
    %71 = arith.truncf %70 : vector<16x8xf32> to vector<16x8xbf16>
    %72 = vector.shape_cast %71 : vector<16x8xbf16> to vector<2x8x8xbf16>
    %73 = vector.extract_strided_slice %6 {offsets = [0, 80], sizes = [16, 8], strides = [1, 1]} : vector<16x96xf32> to vector<16x8xf32>
    %74 = arith.truncf %73 : vector<16x8xf32> to vector<16x8xbf16>
    %75 = vector.shape_cast %74 : vector<16x8xbf16> to vector<2x8x8xbf16>
    "tpu.trace_start"() <{level = 10 : i32, message = "bqd,bkd->bqk"}> : () -> ()
    %cst_21 = arith.constant dense<0.000000e+00> : vector<2x8x8xf32>
    %76 = tpu.matmul %69, %72, %cst_21 {dimension_numbers = #tpu.dot_dimension_numbers<[2], [2], [1], [1], [0, 0, 0, 1, 1, 1], [0], [0]>} : vector<2x8x8xbf16>, vector<2x8x8xbf16>, vector<2x8x8xf32> -> vector<2x8x8xf32>
    "tpu.trace_stop"() : () -> ()
    %cst_22 = arith.constant dense<0xFF800000> : vector<2x8xf32>
    %77 = vector.multi_reduction <maximumf>, %76, %cst_22 [2] : vector<2x8x8xf32> to vector<2x8xf32>
    %78 = vector.shape_cast %77 : vector<2x8xf32> to vector<2x8x1xf32>
    %79 = vector.broadcast %78 : vector<2x8x1xf32> to vector<2x8x8xf32>
    %80 = arith.subf %76, %79 : vector<2x8x8xf32>
    %81 = math.exp %80 : vector<2x8x8xf32>
    %cst_23 = arith.constant dense<0.000000e+00> : vector<2x8xf32>
    %82 = vector.multi_reduction <add>, %81, %cst_23 [2] : vector<2x8x8xf32> to vector<2x8xf32>
    %83 = vector.shape_cast %82 : vector<2x8xf32> to vector<2x8x1xf32>
    %84 = tpu.reciprocal %83 {approx = true} : vector<2x8x1xf32> -> vector<2x8x1xf32>
    %85 = vector.broadcast %84 : vector<2x8x1xf32> to vector<2x8x8xf32>
    %86 = arith.mulf %81, %85 : vector<2x8x8xf32>
    %87 = arith.truncf %86 : vector<2x8x8xf32> to vector<2x8x8xbf16>
    "tpu.trace_start"() <{level = 10 : i32, message = "bqk,bkd->bqd"}> : () -> ()
    %cst_24 = arith.constant dense<0.000000e+00> : vector<2x8x8xf32>
    %88 = tpu.matmul %87, %75, %cst_24 {dimension_numbers = #tpu.dot_dimension_numbers<[2], [1], [1], [2], [0, 0, 0, 1, 1, 2], [0], [0]>} : vector<2x8x8xbf16>, vector<2x8x8xbf16>, vector<2x8x8xf32> -> vector<2x8x8xf32>
    "tpu.trace_stop"() : () -> ()
    %89 = vector.shape_cast %88 : vector<2x8x8xf32> to vector<16x8xf32>
    %90 = arith.truncf %89 : vector<16x8xf32> to vector<16x8xbf16>
    %91 = vector.extract_strided_slice %7 {offsets = [16, 0], sizes = [8, 32], strides = [1, 1]} : vector<32x32xbf16> to vector<8x32xbf16>
    %cst_25 = arith.constant dense<0.000000e+00> : vector<16x32xf32>
    %92 = tpu.matmul %90, %91, %cst_25 {dimension_numbers = #tpu.dot_dimension_numbers<[1], [0], [0], [1], [0, 0, 1, 1], [], []>} : vector<16x8xbf16>, vector<8x32xbf16>, vector<16x32xf32> -> vector<16x32xf32>
    %93 = arith.addf %64, %92 : vector<16x32xf32>
    %94 = vector.extract_strided_slice %6 {offsets = [0, 24], sizes = [16, 8], strides = [1, 1]} : vector<16x96xf32> to vector<16x8xf32>
    %cst_26 = arith.constant 0.353553385 : f32
    %95 = vector.broadcast %cst_26 : f32 to vector<16x8xf32>
    %96 = arith.mulf %94, %95 : vector<16x8xf32>
    %97 = arith.truncf %96 : vector<16x8xf32> to vector<16x8xbf16>
    %98 = vector.shape_cast %97 : vector<16x8xbf16> to vector<2x8x8xbf16>
    %99 = vector.extract_strided_slice %6 {offsets = [0, 56], sizes = [16, 8], strides = [1, 1]} : vector<16x96xf32> to vector<16x8xf32>
    %100 = arith.truncf %99 : vector<16x8xf32> to vector<16x8xbf16>
    %101 = vector.shape_cast %100 : vector<16x8xbf16> to vector<2x8x8xbf16>
    %102 = vector.extract_strided_slice %6 {offsets = [0, 88], sizes = [16, 8], strides = [1, 1]} : vector<16x96xf32> to vector<16x8xf32>
    %103 = arith.truncf %102 : vector<16x8xf32> to vector<16x8xbf16>
    %104 = vector.shape_cast %103 : vector<16x8xbf16> to vector<2x8x8xbf16>
    "tpu.trace_start"() <{level = 10 : i32, message = "bqd,bkd->bqk"}> : () -> ()
    %cst_27 = arith.constant dense<0.000000e+00> : vector<2x8x8xf32>
    %105 = tpu.matmul %98, %101, %cst_27 {dimension_numbers = #tpu.dot_dimension_numbers<[2], [2], [1], [1], [0, 0, 0, 1, 1, 1], [0], [0]>} : vector<2x8x8xbf16>, vector<2x8x8xbf16>, vector<2x8x8xf32> -> vector<2x8x8xf32>
    "tpu.trace_stop"() : () -> ()
    %cst_28 = arith.constant dense<0xFF800000> : vector<2x8xf32>
    %106 = vector.multi_reduction <maximumf>, %105, %cst_28 [2] : vector<2x8x8xf32> to vector<2x8xf32>
    %107 = vector.shape_cast %106 : vector<2x8xf32> to vector<2x8x1xf32>
    %108 = vector.broadcast %107 : vector<2x8x1xf32> to vector<2x8x8xf32>
    %109 = arith.subf %105, %108 : vector<2x8x8xf32>
    %110 = math.exp %109 : vector<2x8x8xf32>
    %cst_29 = arith.constant dense<0.000000e+00> : vector<2x8xf32>
    %111 = vector.multi_reduction <add>, %110, %cst_29 [2] : vector<2x8x8xf32> to vector<2x8xf32>
    %112 = vector.shape_cast %111 : vector<2x8xf32> to vector<2x8x1xf32>
    %113 = tpu.reciprocal %112 {approx = true} : vector<2x8x1xf32> -> vector<2x8x1xf32>
    %114 = vector.broadcast %113 : vector<2x8x1xf32> to vector<2x8x8xf32>
    %115 = arith.mulf %110, %114 : vector<2x8x8xf32>
    %116 = arith.truncf %115 : vector<2x8x8xf32> to vector<2x8x8xbf16>
    "tpu.trace_start"() <{level = 10 : i32, message = "bqk,bkd->bqd"}> : () -> ()
    %cst_30 = arith.constant dense<0.000000e+00> : vector<2x8x8xf32>
    %117 = tpu.matmul %116, %104, %cst_30 {dimension_numbers = #tpu.dot_dimension_numbers<[2], [1], [1], [2], [0, 0, 0, 1, 1, 2], [0], [0]>} : vector<2x8x8xbf16>, vector<2x8x8xbf16>, vector<2x8x8xf32> -> vector<2x8x8xf32>
    "tpu.trace_stop"() : () -> ()
    %118 = vector.shape_cast %117 : vector<2x8x8xf32> to vector<16x8xf32>
    %119 = arith.truncf %118 : vector<16x8xf32> to vector<16x8xbf16>
    %120 = vector.extract_strided_slice %7 {offsets = [24, 0], sizes = [8, 32], strides = [1, 1]} : vector<32x32xbf16> to vector<8x32xbf16>
    %cst_31 = arith.constant dense<0.000000e+00> : vector<16x32xf32>
    %121 = tpu.matmul %119, %120, %cst_31 {dimension_numbers = #tpu.dot_dimension_numbers<[1], [0], [0], [1], [0, 0, 1, 1], [], []>} : vector<16x8xbf16>, vector<8x32xbf16>, vector<16x32xf32> -> vector<16x32xf32>
    %122 = arith.addf %93, %121 : vector<16x32xf32>
    %c0_32 = arith.constant 0 : index
    %c0_33 = arith.constant 0 : index
    %123 = vector.load %arg5[%c0_32, %c0_33] : memref<1x32xf32, #tpu.memory_space<vmem>>, vector<1x32xf32>
    %124 = vector.broadcast %123 : vector<1x32xf32> to vector<16x32xf32>
    %125 = arith.addf %122, %124 : vector<16x32xf32>
    %cst_34 = arith.constant dense<0.000000e+00> : vector<16xf32>
    %126 = vector.multi_reduction <add>, %125, %cst_34 [1] : vector<16x32xf32> to vector<16xf32>
    %127 = vector.shape_cast %126 : vector<16xf32> to vector<16x1xf32>
    %cst_35 = arith.constant 3.200000e+01 : f32
    %128 = vector.broadcast %cst_35 : f32 to vector<16x1xf32>
    %129 = arith.divf %127, %128 : vector<16x1xf32>
    %130 = vector.broadcast %129 : vector<16x1xf32> to vector<16x32xf32>
    %131 = arith.subf %125, %130 : vector<16x32xf32>
    %132 = arith.mulf %131, %131 : vector<16x32xf32>
    %cst_36 = arith.constant dense<0.000000e+00> : vector<16xf32>
    %133 = vector.multi_reduction <add>, %132, %cst_36 [1] : vector<16x32xf32> to vector<16xf32>
    %134 = vector.shape_cast %133 : vector<16xf32> to vector<16x1xf32>
    %cst_37 = arith.constant 3.200000e+01 : f32
    %135 = vector.broadcast %cst_37 : f32 to vector<16x1xf32>
    %136 = arith.divf %134, %135 : vector<16x1xf32>
    %137 = vector.broadcast %129 : vector<16x1xf32> to vector<16x32xf32>
    %138 = arith.subf %125, %137 : vector<16x32xf32>
    %cst_38 = arith.constant 9.99999974E-6 : f32
    %139 = vector.broadcast %cst_38 : f32 to vector<16x1xf32>
    %140 = arith.addf %136, %139 : vector<16x1xf32>
    %141 = math.rsqrt %140 : vector<16x1xf32>
    %142 = vector.broadcast %141 : vector<16x1xf32> to vector<16x32xf32>
    %143 = arith.mulf %138, %142 : vector<16x32xf32>
    %c0_39 = arith.constant 0 : index
    %c0_40 = arith.constant 0 : index
    %144 = vector.load %arg6[%c0_39, %c0_40] : memref<1x32xf32, #tpu.memory_space<vmem>>, vector<1x32xf32>
    %145 = vector.broadcast %144 : vector<1x32xf32> to vector<16x32xf32>
    %146 = arith.mulf %143, %145 : vector<16x32xf32>
    %c0_41 = arith.constant 0 : index
    %c0_42 = arith.constant 0 : index
    %147 = vector.load %arg7[%c0_41, %c0_42] : memref<1x32xf32, #tpu.memory_space<vmem>>, vector<1x32xf32>
    %148 = vector.broadcast %147 : vector<1x32xf32> to vector<16x32xf32>
    %149 = arith.addf %146, %148 : vector<16x32xf32>
    %150 = vector.shape_cast %149 : vector<16x32xf32> to vector<2x8x32xf32>
    %c0_43 = arith.constant 0 : index
    %c0_44 = arith.constant 0 : index
    %c0_45 = arith.constant 0 : index
    %151 = vector.load %arg8[%c0_43, %c0_44, %c0_45] : memref<2x8x32xf32, #tpu.memory_space<vmem>>, vector<2x8x32xf32>
    tpu.vector_store %arg8[%c0_43, %c0_44, %c0_45], %150 {strides = array<i32>} : memref<2x8x32xf32, #tpu.memory_space<vmem>>, vector<2x8x32xf32>,
    return
  }
  func.func @transform_0(%arg0: i32) -> (i32, i32, i32) {
    %c0_i32 = arith.constant 0 : i32
    %c0_i32_0 = arith.constant 0 : i32
    %c0_i32_1 = arith.constant 0 : i32
    return %arg0, %c0_i32, %c0_i32_0 : i32, i32, i32
  }
  func.func @transform_1(%arg0: i32) -> (i32, i32) {
    %c0_i32 = arith.constant 0 : i32
    %c0_i32_0 = arith.constant 0 : i32
    %c0_i32_1 = arith.constant 0 : i32
    return %c0_i32, %c0_i32_0 : i32, i32
  }
  func.func @transform_2(%arg0: i32) -> (i32, i32) {
    %c0_i32 = arith.constant 0 : i32
    %c0_i32_0 = arith.constant 0 : i32
    %c0_i32_1 = arith.constant 0 : i32
    return %c0_i32, %c0_i32_0 : i32, i32
  }
  func.func @transform_3(%arg0: i32) -> (i32, i32) {
    %c0_i32 = arith.constant 0 : i32
    %c0_i32_0 = arith.constant 0 : i32
    %c0_i32_1 = arith.constant 0 : i32
    return %c0_i32, %c0_i32_0 : i32, i32
  }
  func.func @transform_4(%arg0: i32) -> (i32, i32) {
    %c0_i32 = arith.constant 0 : i32
    %c0_i32_0 = arith.constant 0 : i32
    %c0_i32_1 = arith.constant 0 : i32
    return %c0_i32, %c0_i32_0 : i32, i32
  }
  func.func @transform_5(%arg0: i32) -> (i32, i32) {
    %c0_i32 = arith.constant 0 : i32
    %c0_i32_0 = arith.constant 0 : i32
    %c0_i32_1 = arith.constant 0 : i32
    return %c0_i32, %c0_i32_0 : i32, i32
  }
  func.func @transform_6(%arg0: i32) -> (i32, i32) {
    %c0_i32 = arith.constant 0 : i32
    %c0_i32_0 = arith.constant 0 : i32
    %c0_i32_1 = arith.constant 0 : i32
    return %c0_i32, %c0_i32_0 : i32, i32
  }
  func.func @transform_7(%arg0: i32) -> (i32, i32, i32) {
    %c0_i32 = arith.constant 0 : i32
    %c0_i32_0 = arith.constant 0 : i32
    %c0_i32_1 = arith.constant 0 : i32
    return %arg0, %c0_i32, %c0_i32_0 : i32, i32, i32
  }
}

</mosaic_0001>

<bundles_post_ra>
// kernel: tpu_custom_call.1
= control target key start
LH: loop header
LB: loop body
LE: loop exit
PB: predicated region body
PF: predicated region fallthrough
CT: control target
= control target key end

     0   :  { %12 = vsyncpa [#allocation3], 0  ;;  %s2570_s0 = inlined_call_operand.hbm [shape: bf16[2,8,32], index: 0, kind: input, shape index: {}]   ;;  %s2571_s1 = inlined_call_operand.hbm [shape: bf16[32,96], index: 1, kind: input, shape index: {}]   ;;  %s2572_s2 = inlined_call_operand.vmem [shape: f32[1,96], index: 2, kind: input, shape index: {}]   ;;  %s2573_s3 = inlined_call_operand.hbm [shape: bf16[32,32], index: 3, kind: input, shape index: {}]   ;;  %s2574_s4 = inlined_call_operand.vmem [shape: f32[1,32], index: 4, kind: input, shape index: {}]   ;;  %s2575_s5 = inlined_call_operand.vmem [shape: f32[1,32], index: 5, kind: input, shape index: {}]   ;;  %s2576_s6 = inlined_call_operand.vmem [shape: f32[1,32], index: 6, kind: input, shape index: {}]   ;;  %s2577_s7 = inlined_call_operand.hbm [shape: f32[2,8,32], index: 7, kind: output, shape index: {}]  }
   0x1   :  { %13 = vsyncpa [#allocation6], 0 }
   0x2   :  { %14 = vsyncpa [#allocation4], 0  ;;  %s32_s26 = sshll.u32 %s2571_s1, 4  ;;  %s1911_s27 = smov [#allocation5]   ;;  %s33_s26 = int_to_ptr.hbm [resolvable:$true] %s32_s26 }
   0x3   :  { %s34_s28 = sshll.u32 %s1911_s27, 4  ;;  %s19_s8 = sshll.u32 %s2570_s0, 4  ;;  %s35_s28 = int_to_ptr.vmem [resolvable:$true] %s34_s28  ;;  %s20_s8 = int_to_ptr.hbm [resolvable:$true] %s19_s8 }
   0x4   :  { %s1912_s9 = smov 64   ;;  %s1913_s10 = smov 4  }
   0x5   :  { %40 = dma.hbm_to_vmem [thread:$0]  %s33_s26, 256, %s35_s28, [#allocation6], %s1912_s9, %s1912_s9, %s1913_s10  }
   0x6   :  { %s1914_s11 = smov [#allocation2]   ;;  %s47_s1 = sshll.u32 %s2573_s3, 4  ;;  %s48_s1 = int_to_ptr.hbm [resolvable:$true] %s47_s1 }
   0x7   :  { %s21_s12 = sshll.u32 %s1914_s11, 4  ;;  %s1915_s15 = smov [#allocation7]   ;;  %s22_s12 = int_to_ptr.vmem [resolvable:$true] %s21_s12 }
   0x8   :  { %27 = dma.hbm_to_vmem [thread:$0]  %s20_s8, 128, %s22_s12, [#allocation3], %s1912_s9, %s1912_s9, %s1913_s10  }
   0x9   :  { %s49_s16 = sshll.u32 %s1915_s15, 4  ;;  %s50_s16 = int_to_ptr.vmem [resolvable:$true] %s49_s16 }
   0xa   :  { %55 = dma.hbm_to_vmem [thread:$0]  %s48_s1, 256, %s50_s16, [#allocation6], %s1912_s9, %s1912_s9, %s1913_s10  }
   0xb   :  { %1905 = dma.done.wait [#allocation3], 128  }
   0xc   :  { %1906 = vsyncadd [#allocation3], 4294967168 }
   0xd   :  { %1907 = dma.done.wait [#allocation6], 512  }
   0xe   :  { %1908 = vsyncadd [#allocation6], 4294966784  ;;  %v1706_v0 = vld [vmem:[#allocation5 + $0x8] sm:$0xff]  ;;  %v1705_v1 = vld [vmem:[#allocation5] sm:$0xff]  ;;  %vm102_vm0 = vcmask 261120   ;;  %s1916_s17 = smov 104  }
   0xf   :  { %112 = vmatpush.bf16.msra.mxu0 %v1706_v0  ;;  %v1704_v2 = vld [vmem:[#allocation2] sm:$0xff]  ;;  %s1917_s18 = smov 96   ;;  %s1918_s19 = smov 88   ;;  %v1923_v15 = vmov 1983009808   ;;  %vm189_vm1 = vcmask 1047556  }
  0x10   :  { %v1767_v3 = vld [vmem:[%s2572_s2] ss:$0 sm:$0xff]  ;;  %s1919_s20 = smov 80   ;;  %s1920_s21 = smov 72   ;;  %v194_v16 = vunpack.c.l.s4 %v1923_v15  ;;  %v1924_v24 = vmov 1934713408  }
  0x11   :  { %s1921_s22 = smov 120   ;;  %s1922_s2 = smov 112   ;;  %v242_v25 = vunpack.c.l.s4 %v1924_v24  ;;  %vm889_vm2 = vcmask 64512   ;;  %vm1141_vm3 = vcmask 1043456   ;;  %vm1537_vm4 = vcmask 130048  }
  0x12   :  { %v2018_v19 = vunpack.c.0.s8 %v194_v16  ;;  %s1925_s23 = smov 56   ;;  %s1926_s24 = smov 40   ;;  %vm1540_vm5 = vcmask 195584  }
  0x13   :  { %113 = vmatpush.bf16.msra.mxu0 %v1705_v1  ;;  %v2028_v39 = vunpack.c.0.s8 %v242_v25  ;;  %s1927_s25 = smov 48   ;;  %s1928_s26 = smov 16  }
  0x14   :  { %s1929_s27 = smov 24   ;;  %s1930_s28 = smov 8  }
  0x15   :  { %s1652_s12 = sshll.u32 %s2577_s7, 4  ;;  %s1932_s13 = smov [#allocation8]   ;;  %s1653_s12 = int_to_ptr.hbm [resolvable:$true] %s1652_s12 }
  0x16   :  { %1678 = vmatmul.msk.bf16.vlgmr.msra.gmra.mxu0 %vm102_vm0, %v1704_v2  ;;  %s1650_s14 = sshll.u32 %s1932_s13, 4  ;;  %s1651_s14 = int_to_ptr.vmem [resolvable:$true] %s1650_s14 }
  0x93   :  { %v115_v4 = vpop.f32.mrf.mxu0 }
  0x94   :  { %v1993_v5 = vadd.f32 %v1767_v3, %v115_v4 }
  0x96   :  { %134 = vrot.lane.b32.xlu2 %v1993_v5, %s1916_s17  ;;  %140 = vrot.lane.b32.xlu1 %v1993_v5, %s1917_s18  ;;  %v191_v50 = vrot.slane %v1993_v5, 4 }
  0x97   :  { %146 = vrot.lane.b32.xlu0 %v1993_v5, %s1918_s19 }
  0x9b   :  { %v117_v6 = vpop.f32.mrf.mxu0 }
  0x9c   :  { %v2001_v7 = vadd.f32 %v1767_v3, %v117_v6 }
  0x9e   :  { %152 = vrot.lane.b32.xlu2 %v1993_v5, %s1919_s20  ;;  %158 = vrot.lane.b32.xlu1 %v1993_v5, %s1920_s21  ;;  %v2013_v8 = vpack.i.bf16 %v2001_v7, %v1993_v5  ;;  %v359_v62 = vrot.slane %v2001_v7, 4 }
  0x9f   :  { %122 = vrot.lane.b32.xlu0 %v1993_v5, %s1921_s22 }
  0xa6   :  { %124 = vrot.lane.b32.xlu2 %v2001_v7, %s1921_s22  ;;  %148 = vrot.lane.b32.xlu1 %v2001_v7, %s1918_s19 }
  0xa7   :  { %128 = vrot.lane.b32.xlu0 %v1993_v5, %s1922_s2 }
  0xae   :  { %136 = vrot.lane.b32.xlu2 %v2001_v7, %s1916_s17  ;;  %160 = vrot.lane.b32.xlu1 %v2001_v7, %s1920_s21 }
  0xaf   :  { %142 = vrot.lane.b32.xlu0 %v2001_v7, %s1917_s18 }
  0xb6   :  { %130 = vrot.lane.b32.xlu1 %v2001_v7, %s1922_s2 }
  0xb7   :  { %154 = vrot.lane.b32.xlu0 %v2001_v7, %s1919_s20 }
  0xbf   :  { %1733 = vrot.lane.b32.xlu0 %v2013_v8, %s1912_s9 }
  0xf0   :  { %v135_v9 = vpop.permute.xlu2 %134 }
  0xf1   :  { %v201_v31 = vrot.slane %v135_v9, 4 }
  0xf8   :  { %v153_v10 = vpop.permute.xlu2 %152 }
  0xf9   :  { %v213_v18 = vrot.slane %v153_v10, 4 }
 0x100   :  { %v125_v14 = vpop.permute.xlu2 %124 }
 0x101   :  { %v371_v43 = vrot.slane %v125_v14, 4 }
 0x108   :  { %v141_v11 = vpop.permute.xlu1 %140  ;;  %v137_v34 = vpop.permute.xlu2 %136 }
 0x109   :  { %v215_v12 = vrot.slane %v141_v11, 4  ;;  %v147_v13 = vpop.permute.xlu0 %146  ;;  %v214_v21 = vsel %vm189_vm1, %v213_v18, %v141_v11  ;;  %v369_v44 = vrot.slane %v137_v34, 4  ;;  %v372_v51 = vsel %vm189_vm1, %v137_v34, %v371_v43 }
 0x10a   :  { %v227_v20 = vrot.slane %v147_v13, 4  ;;  %v220_v32 = vperm.slane %v214_v21, %v2018_v19  ;;  %v2046_v63 = vperm.slane %v372_v51, %v2018_v19 }
 0x10b   :  { %v216_v17 = vsel %vm189_vm1, %v153_v10, %v215_v12  ;;  %v370_v59 = vsel %vm189_vm1, %v369_v44, %v125_v14 }
 0x10c   :  { %v224_v22 = vperm.slane %v216_v17, %v2018_v19  ;;  %v263_v47 = vrot.slane %v220_v32, 4  ;;  %v2055_v10 = vperm.slane %v370_v59, %v2018_v19 }
 0x10e   :  { %v275_v35 = vrot.slane %v224_v22, 4 }
 0x110   :  { %v159_v23 = vpop.permute.xlu1 %158 }
 0x111   :  { %v225_v26 = vrot.slane %v159_v23, 4  ;;  %v228_v27 = vsel %vm189_vm1, %v159_v23, %v227_v20  ;;  %v123_v28 = vpop.permute.xlu0 %122 }
 0x112   :  { %v236_v29 = vperm.slane %v228_v27, %v2018_v19  ;;  %v203_v30 = vrot.slane %v123_v28, 4  ;;  %v202_v40 = vsel %vm189_vm1, %v201_v31, %v123_v28 }
 0x113   :  { %v226_v33 = vsel %vm189_vm1, %v225_v26, %v147_v13  ;;  %v208_v48 = vperm.slane %v202_v40, %v2018_v19 }
 0x114   :  { %v232_v36 = vperm.slane %v226_v33, %v2018_v19  ;;  %v273_v37 = vrot.slane %v236_v29, 4  ;;  %v204_v38 = vsel %vm189_vm1, %v135_v9, %v203_v30  ;;  %v276_v42 = vsel %vm189_vm1, %v236_v29, %v275_v35 }
 0x115   :  { %v212_v46 = vperm.slane %v204_v38, %v2018_v19  ;;  %v284_v53 = vperm.slane %v276_v42, %v2028_v39  ;;  %v237_v1 = vrot.slane %v208_v48, 4  ;;  %v417_v42 = vrot.slane %v2046_v63, 4 }
 0x116   :  { %v261_v41 = vrot.slane %v232_v36, 4  ;;  %v274_v45 = vsel %vm189_vm1, %v273_v37, %v224_v22  ;;  %v264_v55 = vsel %vm189_vm1, %v232_v36, %v263_v47 }
 0x117   :  { %v280_v56 = vperm.slane %v274_v45, %v2028_v39  ;;  %v249_v60 = vrot.slane %v212_v46, 4  ;;  %v272_v3 = vperm.slane %v264_v55, %v2028_v39  ;;  %v297_v12 = vrot.slane %v284_v53, 4 }
 0x118   :  { %v149_v49 = vpop.permute.xlu1 %148  ;;  %v262_v52 = vsel %vm189_vm1, %v261_v41, %v220_v32  ;;  %v405_v41 = vrot.slane %v2055_v10, 4 }
 0x119   :  { %v129_v54 = vpop.permute.xlu0 %128  ;;  %v268_v0 = vperm.slane %v262_v52, %v2028_v39  ;;  %v293_v11 = vrot.slane %v280_v56, 4  ;;  %v395_v14 = vrot.slane %v149_v49, 4  ;;  %v289_v23 = vrot.slane %v272_v3, 4 }
 0x11a   :  { %v188_v57 = vrot.slane %v129_v54, 4  ;;  %v192_v58 = vsel %vm189_vm1, %v129_v54, %v191_v50 }
 0x11b   :  { %v200_v61 = vperm.slane %v192_v58, %v2018_v19  ;;  %v285_v17 = vrot.slane %v268_v0, 4 }
 0x11c   :  { %v190_v2 = vsel %vm189_vm1, %v188_v57, %v1993_v5 }
 0x11d   :  { %v196_v4 = vperm.slane %v190_v2, %v2018_v19  ;;  %v250_v6 = vsel %vm189_vm1, %v249_v60, %v200_v61  ;;  %v251_v9 = vrot.slane %v200_v61, 4 }
 0x11e   :  { %v256_v13 = vperm.slane %v250_v6, %v2028_v39 }
 0x11f   :  { %v238_v15 = vsel %vm189_vm1, %v237_v1, %v196_v4  ;;  %v239_v16 = vrot.slane %v196_v4, 4  ;;  %v252_v5 = vsel %vm189_vm1, %v212_v46, %v251_v9 }
 0x120   :  { %v244_v18 = vperm.slane %v238_v15, %v2028_v39  ;;  %v260_v20 = vperm.slane %v252_v5, %v2028_v39  ;;  %v295_v21 = vrot.slane %v256_v13, 4  ;;  %v161_v22 = vpop.permute.xlu1 %160  ;;  %v294_v31 = vsel %vm189_vm1, %v293_v11, %v256_v13 }
 0x121   :  { %v240_v24 = vsel %vm189_vm1, %v208_v48, %v239_v16  ;;  %v393_v25 = vrot.slane %v161_v22, 4  ;;  %v396_v26 = vsel %vm189_vm1, %v161_v22, %v395_v14  ;;  %v143_v27 = vpop.permute.xlu0 %142  ;;  %v551_v46 = vrot.slane %v294_v31, 4 }
 0x122   :  { %v248_v28 = vperm.slane %v240_v24, %v2028_v39  ;;  %v2066_v29 = vsel %vm189_vm1, %v285_v17, %v244_v18  ;;  %v287_v30 = vrot.slane %v244_v18, 4  ;;  %v2070_v32 = vsel %vm189_vm1, %v280_v56, %v295_v21 }
 0x123   :  { %v298_v33 = vsel %vm189_vm1, %v297_v12, %v260_v20  ;;  %v299_v34 = vrot.slane %v260_v20, 4  ;;  %v527_v35 = vrot.slane %v2066_v29, 4  ;;  %v394_v38 = vsel %vm189_vm1, %v393_v25, %v149_v49 }
 0x124   :  { %v291_v36 = vrot.slane %v248_v28, 4  ;;  %v549_v37 = vrot.slane %v298_v33, 4  ;;  %v404_v40 = vperm.slane %v396_v26, %v2018_v19  ;;  %v400_v44 = vperm.slane %v394_v38, %v2018_v19 }
 0x125   :  { %v2079_v43 = vsel %vm189_vm1, %v284_v53, %v299_v34  ;;  %v2085_v48 = vsel %vm189_vm1, %v289_v23, %v248_v28  ;;  %v563_v49 = vrot.slane %v2070_v32, 4  ;;  %v383_v51 = vrot.slane %v143_v27, 4 }
 0x126   :  { %v550_v45 = vsel %vm189_vm1, %v549_v37, %v294_v31  ;;  %v561_v47 = vrot.slane %v2079_v43, 4  ;;  %v441_v50 = vrot.slane %v404_v40, 4  ;;  %v2089_v52 = vsel %vm189_vm1, %v268_v0, %v287_v30 }
 0x127   :  { %v2092_v53 = vperm.slane %v550_v45, %v2018_v19  ;;  %v429_v54 = vrot.slane %v400_v44, 4  ;;  %v2095_v56 = vsel %vm189_vm1, %v272_v3, %v291_v36  ;;  %v528_v57 = vsel %vm189_vm1, %v2085_v48, %v527_v35 }
 0x128   :  { %v131_v55 = vpop.permute.xlu1 %130  ;;  %v2101_v58 = vsel %vm189_vm1, %v561_v47, %v2070_v32  ;;  %v525_v0 = vrot.slane %v2085_v48, 4  ;;  %v539_v3 = vrot.slane %v2089_v52, 4  ;;  %v2112_v11 = vperm.slane %v528_v57, %v2018_v19 }
 0x129   :  { %v357_v59 = vrot.slane %v131_v55, 4  ;;  %v360_v60 = vsel %vm189_vm1, %v131_v55, %v359_v62  ;;  %v155_v61 = vpop.permute.xlu0 %154  ;;  %v552_v62 = vsel %vm189_vm1, %v298_v33, %v551_v46 }
 0x12a   :  { %v368_v1 = vperm.slane %v360_v60, %v2018_v19  ;;  %v381_v2 = vrot.slane %v155_v61, 4  ;;  %v384_v4 = vsel %vm189_vm1, %v155_v61, %v383_v51  ;;  %v540_v31 = vsel %vm189_vm1, %v2095_v56, %v539_v3 }
 0x12b   :  { %v358_v6 = vsel %vm189_vm1, %v357_v59, %v2001_v7  ;;  %v392_v9 = vperm.slane %v384_v4, %v2018_v19  ;;  %v560_v45 = vperm.slane %v552_v62, %v2018_v19  ;;  %v587_v4 = vrot.slane %v2112_v11, 4 }
 0x12c   :  { %v364_v12 = vperm.slane %v358_v6, %v2018_v19  ;;  %v418_v13 = vsel %vm189_vm1, %v417_v42, %v368_v1  ;;  %v419_v14 = vrot.slane %v368_v1, 4  ;;  %v382_v15 = vsel %vm189_vm1, %v381_v2, %v143_v27 }
 0x12d   :  { %v424_v16 = vperm.slane %v418_v13, %v2028_v39  ;;  %v388_v5 = vperm.slane %v382_v15, %v2018_v19  ;;  %v442_v7 = vsel %vm189_vm1, %v441_v50, %v392_v9  ;;  %v443_v17 = vrot.slane %v392_v9, 4 }
 0x12e   :  { %v406_v18 = vsel %vm189_vm1, %v405_v41, %v364_v12  ;;  %v407_v20 = vrot.slane %v364_v12, 4  ;;  %v420_v21 = vsel %vm189_vm1, %v2046_v63, %v419_v14  ;;  %v448_v22 = vperm.slane %v442_v7, %v2028_v39 }
 0x12f   :  { %v2126_v23 = vperm.slane %v406_v18, %v2028_v39  ;;  %v428_v24 = vperm.slane %v420_v21, %v2028_v39  ;;  %v463_v25 = vrot.slane %v424_v16, 4  ;;  %v430_v26 = vsel %vm189_vm1, %v429_v54, %v388_v5 }
 0x130   :  { %v408_v27 = vsel %vm189_vm1, %v2055_v10, %v407_v20  ;;  %v431_v28 = vrot.slane %v388_v5, 4  ;;  %v444_v30 = vsel %vm189_vm1, %v404_v40, %v443_v17  ;;  %v2137_v34 = vperm.slane %v430_v26, %v2028_v39 }
 0x131   :  { %v455_v63 = vrot.slane %v2126_v23, 4  ;;  %v467_v33 = vrot.slane %v428_v24, 4  ;;  %v452_v35 = vperm.slane %v444_v30, %v2028_v39  ;;  %v2141_v36 = vperm.slane %v408_v27, %v2028_v39 }
 0x132   :  { %v432_v37 = vsel %vm189_vm1, %v400_v44, %v431_v28  ;;  %v461_v10 = vrot.slane %v448_v22, 4  ;;  %v464_v38 = vsel %vm189_vm1, %v448_v22, %v463_v25  ;;  %v537_v50 = vrot.slane %v2095_v56, 4 }
 0x133   :  { %v2146_v40 = vperm.slane %v432_v37, %v2028_v39  ;;  %v2150_v41 = vsel %vm189_vm1, %v2137_v34, %v455_v63  ;;  %v465_v42 = vrot.slane %v452_v35, 4  ;;  %v468_v46 = vsel %vm189_vm1, %v452_v35, %v467_v33 }
 0x134   :  { %v729_v47 = vrot.slane %v464_v38, 4  ;;  %v548_v44 = vperm.slane %v540_v31, %v2018_v19  ;;  %v453_v51 = vrot.slane %v2137_v34, 4  ;;  %v2158_v54 = vsel %vm189_vm1, %v461_v10, %v424_v16 }
 0x135   :  { %v2161_v55 = vsel %vm189_vm1, %v465_v42, %v428_v24  ;;  %v727_v57 = vrot.slane %v468_v46, 4  ;;  %v459_v59 = vrot.slane %v2141_v36, 4  ;;  %v457_v60 = vrot.slane %v2146_v40, 4 }
 0x136   :  { %v705_v61 = vrot.slane %v2150_v41, 4  ;;  %v715_v1 = vrot.slane %v2161_v55, 4  ;;  %v564_v2 = vsel %vm189_vm1, %v2079_v43, %v563_v49  ;;  %v611_v3 = vrot.slane %v560_v45, 4 }
 0x137   :  { %v728_v56 = vsel %vm189_vm1, %v727_v57, %v464_v38  ;;  %v717_v9 = vrot.slane %v2158_v54, 4  ;;  %v2177_v62 = vsel %vm189_vm1, %v468_v46, %v729_v47  ;;  %v572_v32 = vperm.slane %v564_v2, %v2018_v19 }
 0x138   :  { %v716_v6 = vsel %vm189_vm1, %v715_v1, %v2158_v54  ;;  %v2180_v12 = vperm.slane %v728_v56, %v2018_v19  ;;  %v588_v43 = vsel %vm189_vm1, %v548_v44, %v587_v4  ;;  %v585_v15 = vrot.slane %v548_v44, 4 }
 0x139   :  { %v2183_v13 = vperm.slane %v716_v6, %v2018_v19  ;;  %v596_v14 = vperm.slane %v588_v43, %v2028_v39  ;;  %v526_v16 = vsel %vm189_vm1, %v525_v0, %v2066_v29  ;;  %v612_v7 = vsel %vm189_vm1, %v572_v32, %v611_v3 }
 0x13a   :  { %v763_v49 = vrot.slane %v2180_v12, 4  ;;  %v609_v17 = vrot.slane %v572_v32, 4  ;;  %v532_v18 = vperm.slane %v526_v16, %v2018_v19  ;;  %v620_v20 = vperm.slane %v612_v7, %v2028_v39 }
 0x13b   :  { %v765_v5 = vrot.slane %v2183_v13, 4  ;;  %v586_v21 = vsel %vm189_vm1, %v585_v15, %v2112_v11  ;;  %v635_v22 = vrot.slane %v596_v14, 4  ;;  %v538_v24 = vsel %vm189_vm1, %v537_v50, %v2089_v52 }
 0x13c   :  { %v592_v48 = vperm.slane %v586_v21, %v2028_v39  ;;  %v610_v29 = vsel %vm189_vm1, %v609_v17, %v560_v45  ;;  %v544_v0 = vperm.slane %v538_v24, %v2018_v19  ;;  %v568_v25 = vperm.slane %v2101_v58, %v2018_v19 }
 0x13d   :  { %v633_v26 = vrot.slane %v620_v20, 4  ;;  %v616_v27 = vperm.slane %v610_v29, %v2028_v39  ;;  %v636_v28 = vsel %vm189_vm1, %v620_v20, %v635_v22  ;;  %v575_v30 = vrot.slane %v532_v18, 4 }
 0x13e   :  { %v876_v11 = vpack.c.bf16 %v636_v28, %v636_v28  ;;  %v631_v31 = vrot.slane %v592_v48, 4  ;;  %v599_v63 = vrot.slane %v2092_v53, 4  ;;  %v573_v52 = vrot.slane %v544_v0, 4 }
 0x13f   :  { %v634_v33 = vsel %vm189_vm1, %v633_v26, %v596_v14  ;;  %v629_v35 = vrot.slane %v616_v27, 4  ;;  %v576_v37 = vsel %vm189_vm1, %v544_v0, %v575_v30  ;;  %v597_v10 = vrot.slane %v568_v25, 4 }
 0x140   :  { %v875_v38 = vpack.c.bf16 %v634_v33, %v634_v33  ;;  %v951_v58 = vsel %vm889_vm2, %v876_v11, 0  ;;  %v632_v42 = vsel %vm189_vm1, %v616_v27, %v631_v31  ;;  %v584_v45 = vperm.slane %v576_v37, %v2028_v39 }
 0x141   :  { %v630_v46 = vsel %vm189_vm1, %v629_v35, %v592_v48  ;;  %960 = vmatpush.bf16.xpose.msrb.mxu0 %v951_v58  ;;  %v874_v47 = vpack.c.bf16 %v632_v42, %v632_v42  ;;  %v600_v50 = vsel %vm189_vm1, %v568_v25, %v599_v63  ;;  %v574_v44 = vsel %vm189_vm1, %v573_v52, %v532_v18 }
 0x142   :  { %v932_v57 = vsel %vm889_vm2, %v875_v38, 0  ;;  %v873_v1 = vpack.c.bf16 %v630_v46, %v630_v46  ;;  %v608_v56 = vperm.slane %v600_v50, %v2028_v39  ;;  %v627_v2 = vrot.slane %v584_v45, 4 }
 0x143   :  { %941 = vmatpush.bf16.xpose.msra.mxu3 %v932_v57  ;;  %v913_v4 = vsel %vm889_vm2, %v874_v47, 0  ;;  %v580_v3 = vperm.slane %v574_v44, %v2028_v39  ;;  %v598_v6 = vsel %vm189_vm1, %v597_v10, %v2092_v53  ;;  %v454_v32 = vsel %vm189_vm1, %v453_v51, %v2126_v23 }
 0x144   :  { %v894_v43 = vsel %vm889_vm2, %v873_v1, 0  ;;  %922 = vmatpush.bf16.xpose.msra.mxu2 %v913_v4  ;;  %v625_v14 = vrot.slane %v608_v56, 4  ;;  %v604_v15 = vperm.slane %v598_v6, %v2028_v39  ;;  %v628_v16 = vsel %vm189_vm1, %v608_v56, %v627_v2 }
 0x145   :  { %903 = vmatpush.bf16.xpose.msra.mxu1 %v894_v43  ;;  %v860_v7 = vmul.f32 0.35355338, %v628_v16  ;;  %v623_v17 = vrot.slane %v580_v3, 4  ;;  %v458_v53 = vsel %vm189_vm1, %v457_v60, %v2141_v36  ;;  %v460_v23 = vsel %vm189_vm1, %v2146_v40, %v459_v59 }
 0x146   :  { %v626_v34 = vsel %vm189_vm1, %v625_v14, %v584_v45  ;;  %v621_v51 = vrot.slane %v604_v15, 4  ;;  %v691_v18 = vrot.slane %v458_v53, 4  ;;  %v693_v20 = vrot.slane %v454_v32, 4 }
 0x147   :  { %v859_v21 = vmul.f32 0.35355338, %v626_v34  ;;  %v868_v22 = vpack.c.bf16 %v860_v7, %v860_v7  ;;  %v624_v24 = vsel %vm189_vm1, %v604_v15, %v623_v17  ;;  %v703_v48 = vrot.slane %v460_v23, 4 }
 0x148   :  { %v622_v29 = vsel %vm189_vm1, %v621_v51, %v580_v3  ;;  %v858_v0 = vmul.f32 0.35355338, %v624_v24  ;;  %v694_v60 = vsel %vm189_vm1, %v458_v53, %v693_v20  ;;  %v706_v36 = vsel %vm189_vm1, %v460_v23, %v705_v61 }
 0x149   :  { %v867_v40 = vpack.c.bf16 %v859_v21, %v859_v21  ;;  %v857_v59 = vmul.f32 0.35355338, %v622_v29  ;;  %1682 = vmatmul.msk.bf16.vlgmr.msrb.gmra.mxu0 %vm889_vm2, %v868_v22  ;;  %v702_v25 = vperm.slane %v694_v60, %v2018_v19  ;;  %v714_v26 = vperm.slane %v706_v36, %v2018_v19 }
 0x14a   :  { %v866_v27 = vpack.c.bf16 %v858_v0, %v858_v0  ;;  %v718_v28 = vsel %vm189_vm1, %v2161_v55, %v717_v9  ;;  %v738_v30 = vperm.slane %v2177_v62, %v2018_v19  ;;  %v692_v11 = vsel %vm189_vm1, %v691_v18, %v454_v32 }
 0x14b   :  { %1681 = vmatmul.msk.bf16.vlgmr.msra.gmra.mxu3 %vm889_vm2, %v867_v40  ;;  %v865_v61 = vpack.c.bf16 %v857_v59, %v857_v59  ;;  %v726_v31 = vperm.slane %v718_v28, %v2018_v19  ;;  %v751_v63 = vrot.slane %v714_v26, 4  ;;  %v753_v52 = vrot.slane %v702_v25, 4 }
 0x14c   :  { %1680 = vmatmul.msk.bf16.vlgmr.msra.gmra.mxu2 %vm889_vm2, %v866_v27  ;;  %v775_v33 = vrot.slane %v738_v30, 4  ;;  %v698_v54 = vperm.slane %v692_v11, %v2018_v19  ;;  %v704_v55 = vsel %vm189_vm1, %v703_v48, %v2150_v41  ;;  %v764_v9 = vsel %vm189_vm1, %v763_v49, %v2183_v13 }
 0x14d   :  { %1679 = vmatmul.msk.bf16.vlgmr.msra.gmra.mxu1 %vm889_vm2, %v865_v61  ;;  %v752_v62 = vsel %vm189_vm1, %v751_v63, %v702_v25  ;;  %v754_v35 = vsel %vm189_vm1, %v714_v26, %v753_v52  ;;  %v777_v37 = vrot.slane %v726_v31, 4  ;;  %v710_v10 = vperm.slane %v704_v55, %v2018_v19 }
 0x14e   :  { %v758_v38 = vperm.slane %v752_v62, %v2028_v39  ;;  %v776_v58 = vsel %vm189_vm1, %v775_v33, %v726_v31  ;;  %v762_v41 = vperm.slane %v754_v35, %v2028_v39  ;;  %v770_v42 = vperm.slane %v764_v9, %v2028_v39 }
 0x14f   :  { %v782_v45 = vperm.slane %v776_v58, %v2028_v39  ;;  %v778_v49 = vsel %vm189_vm1, %v738_v30, %v777_v37  ;;  %v739_v46 = vrot.slane %v710_v10, 4  ;;  %v741_v47 = vrot.slane %v698_v54, 4 }
 0x150   :  { %v786_v50 = vperm.slane %v778_v49, %v2028_v39  ;;  %v801_v44 = vrot.slane %v762_v41, 4  ;;  %v797_v57 = vrot.slane %v758_v38, 4  ;;  %v787_v1 = vrot.slane %v770_v42, 4 }
 0x151   :  { %v795_v56 = vrot.slane %v782_v45, 4  ;;  %v740_v2 = vsel %vm189_vm1, %v739_v46, %v698_v54  ;;  %v742_v4 = vsel %vm189_vm1, %v710_v10, %v741_v47  ;;  %v766_v3 = vsel %vm189_vm1, %v2180_v12, %v765_v5 }
 0x152   :  { %v799_v6 = vrot.slane %v786_v50, 4  ;;  %v798_v32 = vsel %vm189_vm1, %v782_v45, %v797_v57  ;;  %v802_v43 = vsel %vm189_vm1, %v786_v50, %v801_v44  ;;  %v746_v14 = vperm.slane %v740_v2, %v2028_v39 }
 0x153   :  { %v796_v15 = vsel %vm189_vm1, %v795_v56, %v758_v38  ;;  %v878_v16 = vpack.c.bf16 %v798_v32, %v798_v32  ;;  %v880_v7 = vpack.c.bf16 %v802_v43, %v802_v43  ;;  %v750_v17 = vperm.slane %v742_v4, %v2028_v39 }
 0x154   :  { %v877_v53 = vpack.c.bf16 %v796_v15, %v796_v15  ;;  %v800_v23 = vsel %vm189_vm1, %v799_v6, %v762_v41  ;;  %v774_v13 = vperm.slane %v766_v3, %v2028_v39  ;;  %v788_v51 = vsel %vm189_vm1, %v787_v1, %v746_v14  ;;  %v2315_v1 = vpop.permute.xlu0 %1733 }
 0x155   :  { %v879_v34 = vpack.c.bf16 %v800_v23, %v800_v23  ;;  %v989_v12 = vsel %vm889_vm2, %v878_v16, 0  ;;  %v1027_v5 = vsel %vm889_vm2, %v880_v7, 0  ;;  %v793_v21 = vrot.slane %v750_v17, 4 }
 0x156   :  { %v970_v18 = vsel %vm889_vm2, %v877_v53, 0  ;;  %998 = vmatpush.bf16.xpose.msrb.mxu2 %v989_v12  ;;  %1036 = vmatpush.bf16.xpose.msra.mxu0 %v1027_v5  ;;  %v791_v20 = vrot.slane %v774_v13, 4  ;;  %v789_v22 = vrot.slane %v746_v14, 4  ;;  %v861_v48 = vmul.f32 0.35355338, %v788_v51 }
 0x157   :  { %979 = vmatpush.bf16.xpose.msrb.mxu1 %v970_v18  ;;  %v1008_v24 = vsel %vm889_vm2, %v879_v34, 0  ;;  %v794_v60 = vsel %vm189_vm1, %v774_v13, %v793_v21 }
 0x158   :  { %1017 = vmatpush.bf16.xpose.msrb.mxu3 %v1008_v24  ;;  %v792_v29 = vsel %vm189_vm1, %v791_v20, %v750_v17  ;;  %v790_v0 = vsel %vm189_vm1, %v770_v42, %v789_v22  ;;  %v864_v59 = vmul.f32 0.35355338, %v794_v60  ;;  %v869_v27 = vpack.c.bf16 %v861_v48, %v861_v48 }
 0x159   :  { %v863_v36 = vmul.f32 0.35355338, %v792_v29  ;;  %v862_v40 = vmul.f32 0.35355338, %v790_v0 }
 0x15a   :  { %v872_v26 = vpack.c.bf16 %v864_v59, %v864_v59 }
 0x15b   :  { %v870_v25 = vpack.c.bf16 %v862_v40, %v862_v40  ;;  %v871_v28 = vpack.c.bf16 %v863_v36, %v863_v36 }
 0x15d   :  { %1684 = vmatmul.msk.bf16.vlgmr.msrb.gmra.mxu2 %vm889_vm2, %v870_v25  ;;  %1686 = vmatmul.msk.bf16.vlgmr.msra.gmra.mxu0 %vm889_vm2, %v872_v26  ;;  %v1735_v25 = vunpack.i.l.bf16 %v2315_v1 }
 0x15e   :  { %1683 = vmatmul.msk.bf16.vlgmr.msrb.gmra.mxu1 %vm889_vm2, %v869_v27 }
 0x15f   :  { %1685 = vmatmul.msk.bf16.vlgmr.msrb.gmra.mxu3 %vm889_vm2, %v871_v28 }
 0x1c6   :  { %v962_v30 = vpop.f32.mrf.mxu0 }
 0x1c7   :  { %v1051_v11 = vsel %vm889_vm2, %v962_v30, -inf }
 0x1c8   :  { %1052 = vmax.xlane.f32.xlu2 %v1051_v11 }
 0x1ca   :  { %v905_v61 = vpop.f32.mrf.mxu1 }
 0x1cb   :  { %v1042_v31 = vsel %vm889_vm2, %v905_v61, -inf }
 0x1cc   :  { %1043 = vmax.xlane.f32.xlu1 %v1042_v31 }
 0x1ce   :  { %v943_v63 = vpop.f32.mrf.mxu3  ;;  %v964_v52 = vpop.f32.mrf.mxu0 }
 0x1cf   :  { %v924_v33 = vpop.f32.mrf.mxu2  ;;  %v1048_v54 = vsel %vm889_vm2, %v943_v63, -inf }
 0x1d0   :  { %1049 = vmax.xlane.f32.xlu2 %v1048_v54  ;;  %v1045_v55 = vsel %vm889_vm2, %v924_v33, -inf }
 0x1d1   :  { %1046 = vmax.xlane.f32.xlu0 %v1045_v55 }
 0x1d2   :  { %v907_v9 = vpop.f32.mrf.mxu1 }
 0x1d6   :  { %v945_v62 = vpop.f32.mrf.mxu3 }
 0x1d7   :  { %v926_v35 = vpop.f32.mrf.mxu2 }
 0x1da   :  { %v2305_v37 = vpop.f32.mrf.mxu0 }
 0x1db   :  { %v981_v10 = vpop.f32.mrf.mxu1  ;;  %v1063_v38 = vsel %vm889_vm2, %v2305_v37, -inf }
 0x1dc   :  { %v1054_v58 = vsel %vm889_vm2, %v981_v10, -inf  ;;  %1064 = vmax.xlane.f32.xlu2 %v1063_v38 }
 0x1dd   :  { %1055 = vmax.xlane.f32.xlu1 %v1054_v58 }
 0x1e0   :  { %v1000_v41 = vpop.f32.mrf.mxu2 }
 0x1e1   :  { %v1057_v42 = vsel %vm889_vm2, %v1000_v41, -inf }
 0x1e2   :  { %v1019_v45 = vpop.f32.mrf.mxu3  ;;  %v1040_v49 = vpop.f32.mrf.mxu0  ;;  %1058 = vmax.xlane.f32.xlu0 %v1057_v42 }
 0x1e3   :  { %v983_v46 = vpop.f32.mrf.mxu1  ;;  %v1060_v47 = vsel %vm889_vm2, %v1019_v45, -inf }
 0x1e4   :  { %1061 = vmax.xlane.f32.xlu2 %v1060_v47 }
 0x1e8   :  { %v1002_v50 = vpop.f32.mrf.mxu2 }
 0x1ea   :  { %v1021_v44 = vpop.f32.mrf.mxu3 }
 0x1f6   :  { %1738 = vrot.lane.b32.xlu1 %v2013_v8, %s1925_s23  ;;  %1748 = vrot.lane.b32.xlu0 %v2013_v8, %s1926_s24 }
 0x1fc   :  { %1743 = vrot.lane.b32.xlu2 %v2013_v8, %s1927_s25 }
 0x23b   :  { %v1053_v57 = vpop.xlane.xlu2 %1052 }
 0x23c   :  { %v1069_v14 = vsub.f32 %v962_v30, %v1053_v57 }
 0x23e   :  { %v1080_v17 = vmul.f32 1.442695, %v1069_v14 }
 0x23f   :  { %v1044_v56 = vpop.xlane.xlu1 %1043 }
 0x240   :  { %v1066_v2 = vsub.f32 %v905_v61, %v1044_v56  ;;  %v1736_v61 = vunpack.i.h.bf16 %v2315_v1 }
 0x242   :  { %v1074_v4 = vmul.f32 1.442695, %v1066_v2  ;;  %v471_v9 = vrot.slane %v1736_v61, 4 }
 0x243   :  { %v1050_v3 = vpop.xlane.xlu2 %1049 }
 0x244   :  { %1771 = vpow2.f32 %v1074_v4  ;;  %v1068_v6 = vsub.f32 %v943_v63, %v1050_v3  ;;  %v1047_v32 = vpop.xlane.xlu0 %1046 }
 0x245   :  { %v1067_v43 = vsub.f32 %v924_v33, %v1047_v32  ;;  %v303_v33 = vrot.slane %v1735_v25, 4 }
 0x246   :  { %v1078_v15 = vmul.f32 1.442695, %v1068_v6 }
 0x247   :  { %v1076_v16 = vmul.f32 1.442695, %v1067_v43 }
 0x248   :  { %1773 = vpow2.f32 %v1078_v15 }
 0x249   :  { %1775 = vpow2.f32 %v1076_v16 }
 0x24a   :  { %v2317_v7 = vpop.eup %1771  ;;  %1777 = vpow2.f32 %v1080_v17 }
 0x24b   :  { %v1090_v8 = vsel %vm889_vm2, %v2317_v7, 0.0 }
 0x24c   :  { %1091 = vadd.xlane.f32.xlu2 %v1090_v8 }
 0x24e   :  { %v2321_v53 = vpop.eup %1773 }
 0x24f   :  { %v2323_v23 = vpop.eup %1775  ;;  %v1065_v13 = vpop.xlane.xlu2 %1064  ;;  %v1096_v34 = vsel %vm889_vm2, %v2321_v53, 0.0 }
 0x250   :  { %v1056_v12 = vpop.xlane.xlu1 %1055  ;;  %v1093_v5 = vsel %vm889_vm2, %v2323_v23, 0.0  ;;  %1097 = vadd.xlane.f32.xlu1 %v1096_v34  ;;  %v2329_v20 = vpop.eup %1777  ;;  %v1073_v60 = vsub.f32 %v2305_v37, %v1065_v13 }
 0x251   :  { %v1070_v51 = vsub.f32 %v981_v10, %v1056_v12  ;;  %1094 = vadd.xlane.f32.xlu0 %v1093_v5  ;;  %v1099_v48 = vsel %vm889_vm2, %v2329_v20, 0.0 }
 0x252   :  { %v1088_v59 = vmul.f32 1.442695, %v1073_v60 }
 0x253   :  { %v1082_v18 = vmul.f32 1.442695, %v1070_v51 }
 0x255   :  { %v1059_v21 = vpop.xlane.xlu0 %1058  ;;  %1779 = vpow2.f32 %v1082_v18 }
 0x256   :  { %v1071_v22 = vsub.f32 %v1000_v41, %v1059_v21 }
 0x257   :  { %v1062_v24 = vpop.xlane.xlu2 %1061 }
 0x258   :  { %v1084_v29 = vmul.f32 1.442695, %v1071_v22  ;;  %v1072_v0 = vsub.f32 %v1019_v45, %v1062_v24  ;;  %1100 = vadd.xlane.f32.xlu1 %v1099_v48 }
 0x25a   :  { %1781 = vpow2.f32 %v1084_v29  ;;  %v1086_v36 = vmul.f32 1.442695, %v1072_v0 }
 0x25b   :  { %v2334_v40 = vpop.eup %1779 }
 0x25c   :  { %1783 = vpow2.f32 %v1086_v36  ;;  %v1102_v27 = vsel %vm889_vm2, %v2334_v40, 0.0 }
 0x25d   :  { %1785 = vpow2.f32 %v1088_v59 }
 0x25f   :  { %v1744_v26 = vpop.permute.xlu2 %1743 }
 0x260   :  { %v2339_v28 = vpop.eup %1781  ;;  %v1746_v30 = vunpack.i.h.bf16 %v1744_v26  ;;  %v1745_v11 = vunpack.i.l.bf16 %v1744_v26  ;;  %1103 = vadd.xlane.f32.xlu1 %v1102_v27 }
 0x261   :  { %v1105_v31 = vsel %vm889_vm2, %v2339_v28, 0.0 }
 0x262   :  { %v2344_v63 = vpop.eup %1783  ;;  %v301_v52 = vrot.slane %v1745_v11, 4  ;;  %1106 = vadd.xlane.f32.xlu2 %v1105_v31  ;;  %v469_v54 = vrot.slane %v1746_v30, 4  ;;  %v304_v35 = vsel %vm189_vm1, %v1745_v11, %v303_v33  ;;  %v472_v38 = vsel %vm189_vm1, %v1746_v30, %v471_v9 }
 0x263   :  { %v1108_v55 = vsel %vm889_vm2, %v2344_v63, 0.0  ;;  %v2350_v37 = vpop.eup %1785  ;;  %v312_v41 = vperm.slane %v304_v35, %v2018_v19  ;;  %v480_v57 = vperm.slane %v472_v38, %v2018_v19 }
 0x264   :  { %1109 = vadd.xlane.f32.xlu0 %v1108_v55  ;;  %v302_v62 = vsel %vm189_vm1, %v301_v52, %v1735_v25  ;;  %v470_v10 = vsel %vm189_vm1, %v469_v54, %v1736_v61  ;;  %v1111_v1 = vsel %vm889_vm2, %v2350_v37, 0.0 }
 0x265   :  { %v308_v58 = vperm.slane %v302_v62, %v2018_v19  ;;  %v476_v44 = vperm.slane %v470_v10, %v2018_v19  ;;  %v339_v32 = vrot.slane %v312_v41, 4  ;;  %v507_v5 = vrot.slane %v480_v57, 4 }
 0x267   :  { %v327_v6 = vrot.slane %v308_v58, 4  ;;  %v495_v12 = vrot.slane %v476_v44, 4 }
 0x268   :  { %v1739_v42 = vpop.permute.xlu1 %1738  ;;  %v1749_v45 = vpop.permute.xlu0 %1748 }
 0x269   :  { %v1741_v49 = vunpack.i.h.bf16 %v1739_v42  ;;  %v1740_v46 = vunpack.i.l.bf16 %v1739_v42  ;;  %v1751_v47 = vunpack.i.h.bf16 %v1749_v45  ;;  %v1750_v50 = vunpack.i.l.bf16 %v1749_v45 }
 0x26b   :  { %v483_v56 = vrot.slane %v1741_v49, 4  ;;  %v315_v2 = vrot.slane %v1740_v46, 4  ;;  %v481_v4 = vrot.slane %v1751_v47, 4  ;;  %v313_v3 = vrot.slane %v1750_v50, 4 }
 0x26c   :  { %1112 = vadd.xlane.f32.xlu0 %v1111_v1 }
 0x26d   :  { %v314_v43 = vsel %vm189_vm1, %v313_v3, %v1740_v46  ;;  %v316_v14 = vsel %vm189_vm1, %v1750_v50, %v315_v2  ;;  %v482_v15 = vsel %vm189_vm1, %v481_v4, %v1741_v49  ;;  %v484_v16 = vsel %vm189_vm1, %v1751_v47, %v483_v56 }
 0x26e   :  { %v320_v17 = vperm.slane %v314_v43, %v2018_v19  ;;  %v324_v8 = vperm.slane %v316_v14, %v2018_v19  ;;  %v488_v13 = vperm.slane %v482_v15, %v2018_v19  ;;  %v492_v34 = vperm.slane %v484_v16, %v2018_v19 }
 0x270   :  { %v325_v51 = vrot.slane %v320_v17, 4  ;;  %v328_v18 = vsel %vm189_vm1, %v320_v17, %v327_v6  ;;  %v337_v21 = vrot.slane %v324_v8, 4  ;;  %v340_v22 = vsel %vm189_vm1, %v324_v8, %v339_v32 }
 0x271   :  { %v336_v24 = vperm.slane %v328_v18, %v2028_v39  ;;  %v348_v48 = vperm.slane %v340_v22, %v2028_v39  ;;  %v493_v29 = vrot.slane %v488_v13, 4  ;;  %v496_v0 = vsel %vm189_vm1, %v488_v13, %v495_v12 }
 0x272   :  { %v326_v60 = vsel %vm189_vm1, %v325_v51, %v308_v58  ;;  %v338_v36 = vsel %vm189_vm1, %v337_v21, %v312_v41  ;;  %v504_v59 = vperm.slane %v496_v0, %v2028_v39  ;;  %v505_v25 = vrot.slane %v492_v34, 4 }
 0x273   :  { %v332_v26 = vperm.slane %v326_v60, %v2028_v39  ;;  %v344_v27 = vperm.slane %v338_v36, %v2028_v39  ;;  %v351_v30 = vrot.slane %v336_v24, 4  ;;  %v355_v11 = vrot.slane %v348_v48, 4 }
 0x274   :  { %v494_v61 = vsel %vm189_vm1, %v493_v29, %v476_v44  ;;  %v506_v31 = vsel %vm189_vm1, %v505_v25, %v480_v57  ;;  %v508_v52 = vsel %vm189_vm1, %v492_v34, %v507_v5  ;;  %v519_v33 = vrot.slane %v504_v59, 4 }
 0x275   :  { %v349_v54 = vrot.slane %v332_v26, 4  ;;  %v352_v55 = vsel %vm189_vm1, 0.0, %v351_v30  ;;  %v353_v9 = vrot.slane %v344_v27, 4  ;;  %v356_v62 = vsel %vm189_vm1, 0.0, %v355_v11 }
 0x276   :  { %v500_v35 = vperm.slane %v494_v61, %v2028_v39  ;;  %v512_v10 = vperm.slane %v506_v31, %v2028_v39  ;;  %v516_v38 = vperm.slane %v508_v52, %v2028_v39  ;;  %v520_v58 = vsel %vm189_vm1, 0.0, %v519_v33 }
 0x277   :  { %v354_v41 = vsel %vm189_vm1, 0.0, %v353_v9  ;;  %v642_v42 = vrot.slane %v352_v55, 4  ;;  %v648_v45 = vsel %vm189_vm1, %v355_v11, %v344_v27  ;;  %v653_v49 = vrot.slane %v356_v62, 4 }
 0x278   :  { %v517_v46 = vrot.slane %v500_v35, 4  ;;  %v521_v47 = vrot.slane %v512_v10, 4  ;;  %v523_v50 = vrot.slane %v516_v38, 4  ;;  %v652_v44 = vperm.slane %v648_v45, %v2018_v19 }
 0x279   :  { %v808_v57 = vrot.slane %v520_v58, 4  ;;  %v350_v1 = vsel %vm189_vm1, 0.0, %v349_v54  ;;  %v637_v56 = vsel %vm189_vm1, %v351_v30, %v332_v26  ;;  %v654_v2 = vsel %vm189_vm1, %v653_v49, %v354_v41 }
 0x27a   :  { %v522_v4 = vsel %vm189_vm1, 0.0, %v521_v47  ;;  %v524_v3 = vsel %vm189_vm1, 0.0, %v523_v50  ;;  %v814_v6 = vsel %vm189_vm1, %v523_v50, %v512_v10  ;;  %v641_v32 = vperm.slane %v637_v56, %v2018_v19 }
 0x27b   :  { %v818_v43 = vperm.slane %v814_v6, %v2018_v19  ;;  %v819_v14 = vrot.slane %v524_v3, 4  ;;  %v643_v15 = vsel %vm189_vm1, %v642_v42, %v350_v1  ;;  %v658_v16 = vperm.slane %v654_v2, %v2018_v19 }
 0x27c   :  { %v647_v17 = vperm.slane %v643_v15, %v2018_v19  ;;  %v661_v8 = vrot.slane %v641_v32, 4  ;;  %v673_v13 = vrot.slane %v652_v44, 4  ;;  %v518_v34 = vsel %vm189_vm1, 0.0, %v517_v46 }
 0x27d   :  { %v803_v12 = vsel %vm189_vm1, %v519_v33, %v500_v35  ;;  %v809_v5 = vsel %vm189_vm1, %v808_v57, %v518_v34  ;;  %v820_v51 = vsel %vm189_vm1, %v819_v14, %v522_v4  ;;  %v839_v18 = vrot.slane %v818_v43, 4 }
 0x27e   :  { %v662_v21 = vsel %vm189_vm1, %v647_v17, %v661_v8  ;;  %v674_v22 = vsel %vm189_vm1, %v658_v16, %v673_v13  ;;  %v807_v24 = vperm.slane %v803_v12, %v2018_v19  ;;  %v813_v48 = vperm.slane %v809_v5, %v2018_v19 }
 0x27f   :  { %v670_v29 = vperm.slane %v662_v21, %v2028_v39  ;;  %v682_v0 = vperm.slane %v674_v22, %v2028_v39  ;;  %v824_v60 = vperm.slane %v820_v51, %v2018_v19  ;;  %v659_v36 = vrot.slane %v647_v17, 4 }
 0x280   :  { %v827_v59 = vrot.slane %v807_v24, 4  ;;  %v671_v25 = vrot.slane %v658_v16, 4  ;;  %v825_v26 = vrot.slane %v813_v48, 4 }
 0x281   :  { %v687_v27 = vrot.slane %v682_v0, 4  ;;  %v840_v30 = vsel %vm189_vm1, %v824_v60, %v839_v18  ;;  %v660_v11 = vsel %vm189_vm1, %v659_v36, %v641_v32  ;;  %v689_v61 = vrot.slane %v670_v29, 4 }
 0x282   :  { %v828_v31 = vsel %vm189_vm1, %v813_v48, %v827_v59  ;;  %v848_v52 = vperm.slane %v840_v30, %v2028_v39  ;;  %v666_v33 = vperm.slane %v660_v11, %v2028_v39  ;;  %v672_v54 = vsel %vm189_vm1, %v671_v25, %v652_v44 }
 0x283   :  { %v688_v55 = vsel %vm189_vm1, %v687_v27, %v670_v29  ;;  %v836_v9 = vperm.slane %v828_v31, %v2028_v39  ;;  %v678_v62 = vperm.slane %v672_v54, %v2028_v39  ;;  %v690_v35 = vsel %vm189_vm1, %v682_v0, %v689_v61 }
 0x284   :  { %v883_v10 = vpack.c.bf16 %v688_v55, %v688_v55  ;;  %v853_v38 = vrot.slane %v848_v52, 4  ;;  %v884_v58 = vpack.c.bf16 %v690_v35, %v690_v35  ;;  %v826_v41 = vsel %vm189_vm1, %v825_v26, %v807_v24 }
 0x285   :  { %v683_v42 = vrot.slane %v678_v62, 4  ;;  %v832_v45 = vperm.slane %v826_v41, %v2028_v39  ;;  %v837_v49 = vrot.slane %v824_v60, 4  ;;  %v855_v46 = vrot.slane %v836_v9, 4 }
 0x286   :  { %v1181_v47 = vsel %vm1141_vm3, %v883_v10, 0  ;;  %v854_v50 = vsel %vm189_vm1, %v853_v38, %v836_v9  ;;  %v1200_v44 = vsel %vm1141_vm3, %v884_v58, 0  ;;  %v685_v57 = vrot.slane %v666_v33, 4 }
 0x287   :  { %1190 = vmatpush.bf16.msra.mxu3 %v1181_v47  ;;  %v887_v1 = vpack.c.bf16 %v854_v50, %v854_v50  ;;  %v684_v56 = vsel %vm189_vm1, %v683_v42, %v666_v33  ;;  %1209 = vmatpush.bf16.msrb.mxu0 %v1200_v44  ;;  %v838_v2 = vsel %vm189_vm1, %v837_v49, %v818_v43  ;;  %v851_v4 = vrot.slane %v832_v45, 4 }
 0x288   :  { %v881_v3 = vpack.c.bf16 %v684_v56, %v684_v56  ;;  %v844_v6 = vperm.slane %v838_v2, %v2028_v39  ;;  %v856_v32 = vsel %vm189_vm1, %v848_v52, %v855_v46  ;;  %v686_v14 = vsel %vm189_vm1, %v678_v62, %v685_v57 }
 0x289   :  { %v1257_v15 = vsel %vm1141_vm3, %v887_v1, 0  ;;  %v888_v16 = vpack.c.bf16 %v856_v32, %v856_v32  ;;  %v882_v17 = vpack.c.bf16 %v686_v14, %v686_v14 }
 0x28a   :  { %v1143_v8 = vsel %vm1141_vm3, %v881_v3, 0  ;;  %v849_v13 = vrot.slane %v844_v6, 4  ;;  %v852_v34 = vsel %vm189_vm1, %v844_v6, %v851_v4 }
 0x28b   :  { %1266 = vmatpush.bf16.msrb.mxu3 %v1257_v15  ;;  %1152 = vmatpush.bf16.msra.mxu1 %v1143_v8  ;;  %v1276_v43 = vsel %vm1141_vm3, %v888_v16, 0  ;;  %v1162_v12 = vsel %vm1141_vm3, %v882_v17, 0  ;;  %v886_v5 = vpack.c.bf16 %v852_v34, %v852_v34 }
 0x28c   :  { %v850_v51 = vsel %vm189_vm1, %v849_v13, %v832_v45  ;;  %1285 = vmatpush.bf16.msra.mxu0 %v1276_v43  ;;  %1171 = vmatpush.bf16.msra.mxu2 %v1162_v12 }
 0x28d   :  { %v885_v18 = vpack.c.bf16 %v850_v51, %v850_v51  ;;  %v1238_v21 = vsel %vm1141_vm3, %v886_v5, 0 }
 0x28f   :  { %v1219_v22 = vsel %vm1141_vm3, %v885_v18, 0 }
 0x290   :  { %1247 = vmatpush.bf16.msrb.mxu2 %v1238_v21  ;;  %1228 = vmatpush.bf16.msrb.mxu1 %v1219_v22 }
 0x2bf   :  { %v1092_v24 = vpop.xlane.xlu2 %1091 }
 0x2c0   :  { %1787 = vrcp.f32 %v1092_v24 }
 0x2c3   :  { %v1098_v48 = vpop.xlane.xlu1 %1097 }
 0x2c4   :  { %v1095_v29 = vpop.xlane.xlu0 %1094  ;;  %1789 = vrcp.f32 %v1098_v48 }
 0x2c5   :  { %1791 = vrcp.f32 %v1095_v29 }
 0x2c6   :  { %v1788_v0 = vpop.eup %1787 }
 0x2c7   :  { %v1122_v60 = vmul.f32 %v1788_v0, %v2317_v7 }
 0x2c9   :  { %v1130_v36 = vpack.c.bf16 %v1122_v60, %v1122_v60 }
 0x2ca   :  { %v1790_v59 = vpop.eup %1789 }
 0x2cb   :  { %v1792_v25 = vpop.eup %1791  ;;  %v1124_v26 = vmul.f32 %v1790_v59, %v2321_v53  ;;  %1687 = vmatmul.msk.bf16.vlgmr.msra.gmra.mxu1 %vm889_vm2, %v1130_v36  ;;  %v1101_v27 = vpop.xlane.xlu1 %1100 }
 0x2cc   :  { %v1123_v30 = vmul.f32 %v1792_v25, %v2323_v23  ;;  %1793 = vrcp.f32 %v1101_v27 }
 0x2cd   :  { %v1132_v11 = vpack.c.bf16 %v1124_v26, %v1124_v26 }
 0x2ce   :  { %v1131_v61 = vpack.c.bf16 %v1123_v30, %v1123_v30 }
 0x2cf   :  { %1689 = vmatmul.msk.bf16.vlgmr.msra.gmra.mxu3 %vm889_vm2, %v1132_v11 }
 0x2d0   :  { %1688 = vmatmul.msk.bf16.vlgmr.msra.gmra.mxu2 %vm889_vm2, %v1131_v61 }
 0x2d2   :  { %v1794_v31 = vpop.eup %1793 }
 0x2d3   :  { %v1125_v7 = vmul.f32 %v1794_v31, %v2329_v20  ;;  %v1104_v52 = vpop.xlane.xlu1 %1103 }
 0x2d4   :  { %1795 = vrcp.f32 %v1104_v52 }
 0x2d5   :  { %v1133_v33 = vpack.c.bf16 %v1125_v7, %v1125_v7  ;;  %v1107_v54 = vpop.xlane.xlu2 %1106 }
 0x2d6   :  { %1797 = vrcp.f32 %v1107_v54 }
 0x2d7   :  { %v1110_v53 = vpop.xlane.xlu0 %1109  ;;  %1690 = vmatmul.msk.bf16.vlgmr.msrb.gmra.mxu0 %vm889_vm2, %v1133_v33 }
 0x2d8   :  { %1799 = vrcp.f32 %v1110_v53 }
 0x2da   :  { %v1796_v23 = vpop.eup %1795 }
 0x2db   :  { %v1126_v55 = vmul.f32 %v1796_v23, %v2334_v40 }
 0x2dc   :  { %v1798_v9 = vpop.eup %1797 }
 0x2dd   :  { %v1127_v62 = vmul.f32 %v1798_v9, %v2339_v28  ;;  %v1134_v35 = vpack.c.bf16 %v1126_v55, %v1126_v55 }
 0x2de   :  { %v1800_v10 = vpop.eup %1799 }
 0x2df   :  { %v1135_v38 = vpack.c.bf16 %v1127_v62, %v1127_v62  ;;  %v1128_v20 = vmul.f32 %v1800_v10, %v2344_v63  ;;  %v1113_v58 = vpop.xlane.xlu0 %1112  ;;  %1691 = vmatmul.msk.bf16.vlgmr.msrb.gmra.mxu1 %vm889_vm2, %v1134_v35 }
 0x2e0   :  { %1801 = vrcp.f32 %v1113_v58 }
 0x2e1   :  { %v1136_v41 = vpack.c.bf16 %v1128_v20, %v1128_v20  ;;  %1692 = vmatmul.msk.bf16.vlgmr.msrb.gmra.mxu2 %vm889_vm2, %v1135_v38 }
 0x2e3   :  { %1693 = vmatmul.msk.bf16.vlgmr.msrb.gmra.mxu3 %vm889_vm2, %v1136_v41 }
 0x2e6   :  { %v1802_v42 = vpop.eup %1801 }
 0x2e7   :  { %v1129_v40 = vmul.f32 %v1802_v42, %v2350_v37 }
 0x2e9   :  { %v1137_v45 = vpack.c.bf16 %v1129_v40, %v1129_v40 }
 0x2eb   :  { %1694 = vmatmul.msk.bf16.vlgmr.msra.gmra.mxu0 %vm889_vm2, %v1137_v45 }
 0x348   :  { %v1154_v28 = vpop.f32.mrf.mxu1 }
 0x349   :  { %v1293_v46 = vrot.slane %v1154_v28, 4 }
 0x350   :  { %v1156_v49 = vpop.f32.mrf.mxu1 }
 0x352   :  { %v1192_v47 = vpop.f32.mrf.mxu3 }
 0x353   :  { %v1173_v63 = vpop.f32.mrf.mxu2  ;;  %v1291_v50 = vrot.slane %v1192_v47, 4  ;;  %v1294_v44 = vsel %vm189_vm1, %v1192_v47, %v1293_v46 }
 0x354   :  { %v1305_v57 = vrot.slane %v1173_v63, 4  ;;  %v1302_v1 = vperm.slane %v1294_v44, %v2018_v19  ;;  %v1211_v56 = vpop.f32.mrf.mxu0 }
 0x355   :  { %v1292_v2 = vsel %vm189_vm1, %v1291_v50, %v1154_v28  ;;  %v1303_v4 = vrot.slane %v1211_v56, 4 }
 0x356   :  { %v1298_v37 = vperm.slane %v1292_v2, %v2018_v19  ;;  %v1329_v3 = vrot.slane %v1302_v1, 4  ;;  %v1306_v6 = vsel %vm189_vm1, %v1211_v56, %v1305_v57 }
 0x357   :  { %v1304_v32 = vsel %vm189_vm1, %v1303_v4, %v1173_v63  ;;  %v1314_v14 = vperm.slane %v1306_v6, %v2018_v19 }
 0x358   :  { %v1317_v15 = vrot.slane %v1298_v37, 4  ;;  %v1310_v16 = vperm.slane %v1304_v32, %v2018_v19 }
 0x359   :  { %v1327_v17 = vrot.slane %v1314_v14, 4  ;;  %v1330_v8 = vsel %vm189_vm1, %v1314_v14, %v1329_v3 }
 0x35a   :  { %v1315_v13 = vrot.slane %v1310_v16, 4  ;;  %v1318_v34 = vsel %vm189_vm1, %v1310_v16, %v1317_v15  ;;  %v1338_v43 = vperm.slane %v1330_v8, %v2028_v39  ;;  %v1194_v12 = vpop.f32.mrf.mxu3 }
 0x35b   :  { %v1326_v5 = vperm.slane %v1318_v34, %v2028_v39  ;;  %v1328_v51 = vsel %vm189_vm1, %v1327_v17, %v1302_v1  ;;  %v1175_v18 = vpop.f32.mrf.mxu2 }
 0x35c   :  { %v1316_v21 = vsel %vm189_vm1, %v1315_v13, %v1298_v37  ;;  %v1334_v22 = vperm.slane %v1328_v51, %v2028_v39  ;;  %v1345_v24 = vrot.slane %v1338_v43, 4  ;;  %v1213_v48 = vpop.f32.mrf.mxu0  ;;  %v1230_v29 = vpop.f32.mrf.mxu1 }
 0x35d   :  { %v1322_v0 = vperm.slane %v1316_v21, %v2028_v39  ;;  %v1341_v60 = vrot.slane %v1326_v5, 4  ;;  %v1349_v62 = vrot.slane %v1230_v29, 4 }
 0x35e   :  { %v1343_v36 = vrot.slane %v1334_v22, 4  ;;  %v1346_v59 = vsel %vm189_vm1, 0.0, %v1345_v24  ;;  %v1414_v33 = vsel %vm189_vm1, %v1345_v24, %v1334_v22 }
 0x35f   :  { %v1339_v25 = vrot.slane %v1322_v0, 4  ;;  %v1342_v26 = vsel %vm189_vm1, 0.0, %v1341_v60  ;;  %v1419_v11 = vrot.slane %v1346_v59, 4  ;;  %v1403_v61 = vsel %vm189_vm1, %v1341_v60, %v1322_v0 }
 0x360   :  { %v1344_v27 = vsel %vm189_vm1, 0.0, %v1343_v36  ;;  %v1408_v30 = vrot.slane %v1342_v26, 4  ;;  %v1407_v9 = vperm.slane %v1403_v61, %v2018_v19  ;;  %v1418_v10 = vperm.slane %v1414_v33, %v2018_v19 }
 0x361   :  { %v1340_v31 = vsel %vm189_vm1, 0.0, %v1339_v25  ;;  %v1420_v7 = vsel %vm189_vm1, %v1419_v11, %v1344_v27 }
 0x362   :  { %v1409_v52 = vsel %vm189_vm1, %v1408_v30, %v1340_v31  ;;  %v1424_v54 = vperm.slane %v1420_v7, %v2018_v19  ;;  %v1427_v28 = vrot.slane %v1407_v9, 4  ;;  %v1439_v44 = vrot.slane %v1418_v10, 4 }
 0x363   :  { %v1413_v53 = vperm.slane %v1409_v52, %v2018_v19 }
 0x364   :  { %v1249_v23 = vpop.f32.mrf.mxu2  ;;  %v1232_v55 = vpop.f32.mrf.mxu1  ;;  %v1437_v20 = vrot.slane %v1424_v54, 4  ;;  %v1440_v5 = vsel %vm189_vm1, %v1424_v54, %v1439_v44 }
 0x365   :  { %v1425_v35 = vrot.slane %v1413_v53, 4  ;;  %v1361_v58 = vrot.slane %v1249_v23, 4  ;;  %v1428_v17 = vsel %vm189_vm1, %v1413_v53, %v1427_v28  ;;  %v1448_v27 = vperm.slane %v1440_v5, %v2028_v39 }
 0x366   :  { %v1268_v38 = vpop.f32.mrf.mxu3  ;;  %v1438_v50 = vsel %vm189_vm1, %v1437_v20, %v1418_v10  ;;  %v1436_v26 = vperm.slane %v1428_v17, %v2028_v39  ;;  %v1707_v17 = vld [vmem:[#allocation7] sm:$0xff] }
 0x367   :  { %v1347_v41 = vrot.slane %v1268_v38, 4  ;;  %v1350_v42 = vsel %vm189_vm1, %v1268_v38, %v1349_v62  ;;  %v1426_v49 = vsel %vm189_vm1, %v1425_v35, %v1407_v9  ;;  %v2497_v37 = vperm.slane %v1438_v50, %v2028_v39 }
 0x368   :  { %v1358_v40 = vperm.slane %v1350_v42, %v2018_v19  ;;  %v1287_v45 = vpop.f32.mrf.mxu0  ;;  %v2494_v4 = vperm.slane %v1426_v49, %v2028_v39  ;;  %v1453_v38 = vrot.slane %v1448_v27, 4 }
 0x369   :  { %v1348_v46 = vsel %vm189_vm1, %v1347_v41, %v1230_v29  ;;  %v1359_v47 = vrot.slane %v1287_v45, 4  ;;  %v1362_v63 = vsel %vm189_vm1, %v1287_v45, %v1361_v58  ;;  %v1449_v8 = vrot.slane %v2497_v37, 4 }
 0x36a   :  { %v1354_v57 = vperm.slane %v1348_v46, %v2018_v19  ;;  %v1385_v1 = vrot.slane %v1358_v40, 4  ;;  %v1370_v56 = vperm.slane %v1362_v63, %v2018_v19  ;;  %v1455_v58 = vrot.slane %v1436_v26, 4 }
 0x36b   :  { %v1360_v2 = vsel %vm189_vm1, %v1359_v47, %v1249_v23  ;;  %v2511_v22 = vsel %vm189_vm1, %v1449_v8, %v2494_v4  ;;  %v1451_v63 = vrot.slane %v2494_v4, 4 }
 0x36c   :  { %v1373_v3 = vrot.slane %v1354_v57, 4  ;;  %v1366_v6 = vperm.slane %v1360_v2, %v2018_v19  ;;  %v1383_v32 = vrot.slane %v1370_v56, 4  ;;  %v1386_v14 = vsel %vm189_vm1, %v1370_v56, %v1385_v1  ;;  %v1251_v15 = vpop.f32.mrf.mxu2 }
 0x36d   :  { %v1394_v16 = vperm.slane %v1386_v14, %v2028_v39  ;;  %v1456_v56 = vsel %vm189_vm1, %v1448_v27, %v1455_v58  ;;  %v1452_v4 = vsel %vm189_vm1, %v2497_v37, %v1451_v63 }
 0x36e   :  { %v1371_v13 = vrot.slane %v1366_v6, 4  ;;  %v1374_v34 = vsel %vm189_vm1, %v1366_v6, %v1373_v3  ;;  %v1384_v43 = vsel %vm189_vm1, %v1383_v32, %v1358_v40  ;;  %v1270_v12 = vpop.f32.mrf.mxu3 }
 0x36f   :  { %v1382_v51 = vperm.slane %v1374_v34, %v2028_v39  ;;  %v1390_v18 = vperm.slane %v1384_v43, %v2028_v39  ;;  %v1401_v21 = vrot.slane %v1394_v16, 4  ;;  %v1708_v16 = vld [vmem:[#allocation7 + $0x8] sm:$0xff] }
 0x370   :  { %v1372_v24 = vsel %vm189_vm1, %v1371_v13, %v1354_v57  ;;  %v1289_v48 = vpop.f32.mrf.mxu0  ;;  %v1454_v57 = vsel %vm189_vm1, %v1453_v38, %v1436_v26  ;;  %1573 = vmatpush.bf16.msra.mxu1 %v1708_v16 }
 0x371   :  { %v1378_v29 = vperm.slane %v1372_v24, %v2028_v39  ;;  %v1397_v0 = vrot.slane %v1382_v51, 4  ;;  %v1399_v60 = vrot.slane %v1390_v18, 4  ;;  %v1402_v36 = vsel %vm189_vm1, 0.0, %v1401_v21 }
 0x372   :  { %v1468_v59 = vsel %vm189_vm1, %v1401_v21, %v1390_v18  ;;  %v1473_v25 = vrot.slane %v1402_v36, 4 }
 0x373   :  { %v1395_v30 = vrot.slane %v1378_v29, 4  ;;  %v1398_v11 = vsel %vm189_vm1, 0.0, %v1397_v0  ;;  %v1400_v61 = vsel %vm189_vm1, 0.0, %v1399_v60  ;;  %v1457_v31 = vsel %vm189_vm1, %v1397_v0, %v1378_v29 }
 0x374   :  { %v1462_v7 = vrot.slane %v1398_v11, 4  ;;  %v1472_v52 = vperm.slane %v1468_v59, %v2018_v19  ;;  %v1474_v33 = vsel %vm189_vm1, %v1473_v25, %v1400_v61  ;;  %v1461_v54 = vperm.slane %v1457_v31, %v2018_v19  ;;  %1574 = vmatpush.bf16.msra.mxu1 %v1707_v17  ;;  %v1768_v59 = vld [vmem:[%s2574_s4] ss:$0 sm:$0xff] }
 0x375   :  { %v1478_v53 = vperm.slane %v1474_v33, %v2018_v19  ;;  %v1396_v23 = vsel %vm189_vm1, 0.0, %v1395_v30  ;;  %v1931_v61 = vmov 32.0  }
 0x376   :  { %v1493_v55 = vrot.slane %v1472_v52, 4  ;;  %v1463_v9 = vsel %vm189_vm1, %v1462_v7, %v1396_v23  ;;  %v1481_v62 = vrot.slane %v1461_v54, 4  ;;  %1803 = vrcp.f32 %v1931_v61 }
 0x377   :  { %v1467_v35 = vperm.slane %v1463_v9, %v2018_v19  ;;  %v1491_v10 = vrot.slane %v1478_v53, 4 }
 0x378   :  { %v1494_v20 = vsel %vm189_vm1, %v1478_v53, %v1493_v55 }
 0x379   :  { %v1482_v41 = vsel %vm189_vm1, %v1467_v35, %v1481_v62  ;;  %v1502_v42 = vperm.slane %v1494_v20, %v2028_v39  ;;  %v1479_v40 = vrot.slane %v1467_v35, 4  ;;  %v1492_v45 = vsel %vm189_vm1, %v1491_v10, %v1472_v52 }
 0x37a   :  { %v1490_v28 = vperm.slane %v1482_v41, %v2028_v39  ;;  %v1498_v49 = vperm.slane %v1492_v45, %v2028_v39 }
 0x37b   :  { %v1507_v46 = vrot.slane %v1502_v42, 4  ;;  %v1480_v47 = vsel %vm189_vm1, %v1479_v40, %v1461_v54 }
 0x37c   :  { %v1509_v19 = vrot.slane %v1490_v28, 4  ;;  %v1486_v50 = vperm.slane %v1480_v47, %v2028_v39  ;;  %v1503_v44 = vrot.slane %v1498_v49, 4  ;;  %v1804_v31 = vpop.eup %1803 }
 0x37d   :  { %v1508_v1 = vsel %vm189_vm1, %v1507_v46, %v1490_v28  ;;  %v1588_v7 = vmul.f32 32.0, %v1804_v31  ;;  %vm1592_vm6 = vweird.f32 %v1804_v31 }
 0x37e   :  { %v1757_v2 = vpack.i.bf16 %v1508_v1, %v1454_v57  ;;  %v1510_v3 = vsel %vm189_vm1, %v1502_v42, %v1509_v19  ;;  %v1505_v6 = vrot.slane %v1486_v50, 4  ;;  %v1504_v32 = vsel %vm189_vm1, %v1503_v44, %v1486_v50 }
 0x37f   :  { %v1762_v14 = vpack.i.bf16 %v1510_v3, %v1456_v56  ;;  %v1589_v52 = vsub.f32 1.0, %v1588_v7 }
 0x380   :  { %1758 = vrot.lane.b32.xlu1 %v1757_v2, %s1928_s26  ;;  %v1506_v39 = vsel %vm189_vm1, %v1498_v49, %v1505_v6  ;;  %v1769_v2 = vld [vmem:[%s2575_s5] ss:$0 sm:$0xff] }
 0x381   :  { %1763 = vrot.lane.b32.xlu0 %v1762_v14, %s1929_s27  ;;  %v1752_v15 = vpack.i.bf16 %v1506_v39, %v1452_v4  ;;  %v1590_v33 = vmul.f32 %v1804_v31, %v1589_v52 }
 0x383   :  { %1753 = vrot.lane.b32.xlu2 %v1752_v15, %s1930_s28  ;;  %v1591_v54 = vadd.f32 %v1804_v31, %v1590_v33 }
 0x385   :  { %v1593_v53 = vsel %vm1592_vm6, %v1804_v31, %v1591_v54 }
 0x3dd   :  { %v1754_v8 = vpop.permute.xlu2 %1753 }
 0x3de   :  { %v1756_v13 = vunpack.i.h.bf16 %v1754_v8  ;;  %v1755_v34 = vunpack.i.l.bf16 %v1754_v8 }
 0x3e0   :  { %v1535_v51 = vsel %vm889_vm2, %v2511_v22, %v1755_v34  ;;  %v1536_v18 = vsel %vm889_vm2, %v1504_v32, %v1756_v13  ;;  %v1770_v32 = vld [vmem:[%s2576_s6] ss:$0 sm:$0xff]  ;;  %s1933_s6 = smov 128  }
 0x3f2   :  { %v1759_v43 = vpop.permute.xlu1 %1758 }
 0x3f3   :  { %v1761_v12 = vunpack.i.h.bf16 %v1759_v43  ;;  %v1760_v5 = vunpack.i.l.bf16 %v1759_v43  ;;  %v1764_v37 = vpop.permute.xlu0 %1763 }
 0x3f4   :  { %v1766_v21 = vunpack.i.h.bf16 %v1764_v37  ;;  %v1765_v24 = vunpack.i.l.bf16 %v1764_v37 }
 0x3f5   :  { %v1538_v48 = vsel %vm1537_vm4, %v1535_v51, %v1760_v5  ;;  %v1539_v29 = vsel %vm1537_vm4, %v1536_v18, %v1761_v12 }
 0x3f6   :  { %v1541_v0 = vsel %vm1540_vm5, %v1538_v48, %v1765_v24  ;;  %v1542_v60 = vsel %vm1540_vm5, %v1539_v29, %v1766_v21 }
 0x3f7   :  { %v1543_v36 = vpack.c.bf16 %v1542_v60, %v1541_v0 }
 0x3f9   :  { %1703 = vmatmul.msk.bf16.vlgmr.msra.gmra.mxu1 %vm102_vm0, %v1543_v36 }
 0x476   :  { %v1576_v25 = vpop.f32.mrf.mxu1 }
 0x477   :  { %v1577_v26 = vadd.f32 %v1768_v59, %v1576_v25 }
 0x479   :  { %v1581_v27 = vsel %vm102_vm0, %v1577_v26, 0.0 }
 0x47a   :  { %1582 = vadd.xlane.f32.xlu2 %v1581_v27 }
 0x47e   :  { %v1578_v22 = vpop.f32.mrf.mxu1 }
 0x47f   :  { %v1579_v30 = vadd.f32 %v1768_v59, %v1578_v22 }
 0x481   :  { %v1584_v11 = vsel %vm102_vm0, %v1579_v30, 0.0 }
 0x482   :  { %1585 = vadd.xlane.f32.xlu0 %v1584_v11 }
 0x4ed   :  { %v1583_v23 = vpop.xlane.xlu2 %1582 }
 0x4ee   :  { %v1594_v55 = vmul.f32 %v1593_v53, %v1583_v23 }
 0x4f0   :  { %v1596_v9 = vsub.f32 %v1577_v26, %v1594_v55 }
 0x4f2   :  { %v1598_v62 = vmul.f32 %v1596_v9, %v1596_v9 }
 0x4f4   :  { %v1600_v35 = vsel %vm102_vm0, %v1598_v62, 0.0 }
 0x4f5   :  { %v1586_v10 = vpop.xlane.xlu0 %1585  ;;  %1601 = vadd.xlane.f32.xlu1 %v1600_v35 }
 0x4f6   :  { %v1595_v38 = vmul.f32 %v1593_v53, %v1586_v10 }
 0x4f8   :  { %v1597_v20 = vsub.f32 %v1579_v30, %v1595_v38 }
 0x4fa   :  { %v1599_v58 = vmul.f32 %v1597_v20, %v1597_v20 }
 0x4fc   :  { %v1603_v41 = vsel %vm102_vm0, %v1599_v58, 0.0 }
 0x4fd   :  { %1604 = vadd.xlane.f32.xlu2 %v1603_v41 }
 0x568   :  { %v1602_v42 = vpop.xlane.xlu1 %1601 }
 0x569   :  { %v1606_v40 = vmul.f32 %v1602_v42, %v1593_v53 }
 0x56b   :  { %v1608_v45 = vadd.f32 1e-05, %v1606_v40 }
 0x56d   :  { %1805 = vrsqrt.f32 %v1608_v45  ;;  %vm1616_vm8 = vweird.f32 %v1608_v45 }
 0x570   :  { %v1605_v28 = vpop.xlane.xlu2 %1604 }
 0x571   :  { %v1607_v49 = vmul.f32 %v1605_v28, %v1593_v53 }
 0x573   :  { %v1806_v46 = vpop.eup %1805  ;;  %v1609_v47 = vadd.f32 1e-05, %v1607_v49 }
 0x574   :  { %v1611_v19 = vmul.f32 %v1806_v46, %v1608_v45  ;;  %vm1617_vm7 = vweird.f32 %v1806_v46 }
 0x575   :  { %1807 = vrsqrt.f32 %v1609_v47  ;;  %vm1618_vm9 = vmor %vm1616_vm8, %vm1617_vm7  ;;  %vm1626_vm11 = vweird.f32 %v1609_v47 }
 0x576   :  { %v1612_v63 = vmul.f32 %v1806_v46, %v1611_v19 }
 0x578   :  { %v1613_v50 = vmul.f32 0.5, %v1612_v63 }
 0x57a   :  { %v1614_v44 = vsub.f32 1.5, %v1613_v50 }
 0x57b   :  { %v1808_v57 = vpop.eup %1807 }
 0x57c   :  { %v1615_v1 = vmul.f32 %v1806_v46, %v1614_v44  ;;  %v1621_v56 = vmul.f32 %v1808_v57, %v1609_v47  ;;  %vm1627_vm10 = vweird.f32 %v1808_v57 }
 0x57d   :  { %vm1628_vm12 = vmor %vm1626_vm11, %vm1627_vm10 }
 0x57e   :  { %v1619_v3 = vsel %vm1618_vm9, %v1806_v46, %v1615_v1  ;;  %v1622_v6 = vmul.f32 %v1808_v57, %v1621_v56 }
 0x57f   :  { %v1630_v14 = vmul.f32 %v1619_v3, %v1596_v9 }
 0x580   :  { %v1623_v4 = vmul.f32 0.5, %v1622_v6 }
 0x581   :  { %v1636_v39 = vmul.f32 %v1769_v2, %v1630_v14 }
 0x582   :  { %v1624_v15 = vsub.f32 1.5, %v1623_v4 }
 0x583   :  { %v1642_v16 = vadd.f32 %v1770_v32, %v1636_v39 }
 0x584   :  { %v1625_v17 = vmul.f32 %v1808_v57, %v1624_v15 }
 0x585   :  { %1644 = vst.msk [vmem:[#allocation8] sm:$0xff] %vm102_vm0, %v1642_v16 }
 0x586   :  { %v1629_v8 = vsel %vm1628_vm12, %v1808_v57, %v1625_v17 }
 0x587   :  { %v1631_v13 = vmul.f32 %v1629_v8, %v1597_v20 }
 0x589   :  { %v1637_v34 = vmul.f32 %v1769_v2, %v1631_v13 }
 0x58b   :  { %v1643_v43 = vadd.f32 %v1770_v32, %v1637_v34 }
 0x58d   :  { %1645 = vst.msk [vmem:[#allocation8 + $0x8] sm:$0xff] %vm102_vm0, %v1643_v43 }
 0x58e   :  { %1658 = dma.vmem_to_hbm [thread:$0]  %s1651_s14, 256, %s1653_s12, [#allocation4], %s1933_s6, %s1933_s6, %s1930_s28  }
 0x58f   :  { %1909 = dma.done.wait [#allocation4], 256  }
 0x590   :  { %1910 = vsyncadd [#allocation4], 4294967040 }
 0x591   :  { %1663 = vsyncpa [#allocation3], 1 }
 0x592   :  { %1664 = vsyncpa [#allocation6], 1 }
 0x593   :  { %1665 = vsyncpa [#allocation4], 1 }

// kernel: tpu_custom_call.1
= control target key start
LH: loop header
LB: loop body
LE: loop exit
PB: predicated region body
PF: predicated region fallthrough
CT: control target
= control target key end

     0   :  { %12 = vsyncpa [#allocation3], 0  ;;  %s2570_s0 = inlined_call_operand.hbm [shape: bf16[2,8,32], index: 0, kind: input, shape index: {}]   ;;  %s2571_s1 = inlined_call_operand.hbm [shape: bf16[32,96], index: 1, kind: input, shape index: {}]   ;;  %s2572_s2 = inlined_call_operand.vmem [shape: f32[1,96], index: 2, kind: input, shape index: {}]   ;;  %s2573_s3 = inlined_call_operand.hbm [shape: bf16[32,32], index: 3, kind: input, shape index: {}]   ;;  %s2574_s4 = inlined_call_operand.vmem [shape: f32[1,32], index: 4, kind: input, shape index: {}]   ;;  %s2575_s5 = inlined_call_operand.vmem [shape: f32[1,32], index: 5, kind: input, shape index: {}]   ;;  %s2576_s6 = inlined_call_operand.vmem [shape: f32[1,32], index: 6, kind: input, shape index: {}]   ;;  %s2577_s7 = inlined_call_operand.hbm [shape: f32[2,8,32], index: 7, kind: output, shape index: {}]  }
   0x1   :  { %13 = vsyncpa [#allocation6], 0 }
   0x2   :  { %14 = vsyncpa [#allocation4], 0  ;;  %s32_s26 = sshll.u32 %s2571_s1, 4  ;;  %s1911_s27 = smov [#allocation5]   ;;  %s33_s26 = int_to_ptr.hbm [resolvable:$true] %s32_s26 }
   0x3   :  { %s34_s28 = sshll.u32 %s1911_s27, 4  ;;  %s19_s8 = sshll.u32 %s2570_s0, 4  ;;  %s35_s28 = int_to_ptr.vmem [resolvable:$true] %s34_s28  ;;  %s20_s8 = int_to_ptr.hbm [resolvable:$true] %s19_s8 }
   0x4   :  { %s1912_s9 = smov 64   ;;  %s1913_s10 = smov 4  }
   0x5   :  { %40 = dma.hbm_to_vmem [thread:$0]  %s33_s26, 256, %s35_s28, [#allocation6], %s1912_s9, %s1912_s9, %s1913_s10  }
   0x6   :  { %s1914_s11 = smov [#allocation2]   ;;  %s47_s1 = sshll.u32 %s2573_s3, 4  ;;  %s48_s1 = int_to_ptr.hbm [resolvable:$true] %s47_s1 }
   0x7   :  { %s21_s12 = sshll.u32 %s1914_s11, 4  ;;  %s1915_s15 = smov [#allocation7]   ;;  %s22_s12 = int_to_ptr.vmem [resolvable:$true] %s21_s12 }
   0x8   :  { %27 = dma.hbm_to_vmem [thread:$0]  %s20_s8, 128, %s22_s12, [#allocation3], %s1912_s9, %s1912_s9, %s1913_s10  }
   0x9   :  { %s49_s16 = sshll.u32 %s1915_s15, 4  ;;  %s50_s16 = int_to_ptr.vmem [resolvable:$true] %s49_s16 }
   0xa   :  { %55 = dma.hbm_to_vmem [thread:$0]  %s48_s1, 256, %s50_s16, [#allocation6], %s1912_s9, %s1912_s9, %s1913_s10  }
   0xb   :  { %1905 = dma.done.wait [#allocation3], 128  }
   0xc   :  { %1906 = vsyncadd [#allocation3], 4294967168 }
   0xd   :  { %1907 = dma.done.wait [#allocation6], 512  }
   0xe   :  { %1908 = vsyncadd [#allocation6], 4294966784  ;;  %v1706_v0 = vld [vmem:[#allocation5 + $0x8] sm:$0xff]  ;;  %v1705_v1 = vld [vmem:[#allocation5] sm:$0xff]  ;;  %vm102_vm0 = vcmask 261120   ;;  %s1916_s17 = smov 104  }
   0xf   :  { %112 = vmatpush.bf16.msra.mxu0 %v1706_v0  ;;  %v1704_v2 = vld [vmem:[#allocation2] sm:$0xff]  ;;  %s1917_s18 = smov 96   ;;  %s1918_s19 = smov 88   ;;  %v1923_v15 = vmov 1983009808   ;;  %vm189_vm1 = vcmask 1047556  }
  0x10   :  { %v1767_v3 = vld [vmem:[%s2572_s2] ss:$0 sm:$0xff]  ;;  %s1919_s20 = smov 80   ;;  %s1920_s21 = smov 72   ;;  %v194_v16 = vunpack.c.l.s4 %v1923_v15  ;;  %v1924_v24 = vmov 1934713408  }
  0x11   :  { %s1921_s22 = smov 120   ;;  %s1922_s2 = smov 112   ;;  %v242_v25 = vunpack.c.l.s4 %v1924_v24  ;;  %vm889_vm2 = vcmask 64512   ;;  %vm1141_vm3 = vcmask 1043456   ;;  %vm1537_vm4 = vcmask 130048  }
  0x12   :  { %v2018_v19 = vunpack.c.0.s8 %v194_v16  ;;  %s1925_s23 = smov 56   ;;  %s1926_s24 = smov 40   ;;  %vm1540_vm5 = vcmask 195584  }
  0x13   :  { %113 = vmatpush.bf16.msra.mxu0 %v1705_v1  ;;  %v2028_v39 = vunpack.c.0.s8 %v242_v25  ;;  %s1927_s25 = smov 48   ;;  %s1928_s26 = smov 16  }
  0x14   :  { %s1929_s27 = smov 24   ;;  %s1930_s28 = smov 8  }
  0x15   :  { %s1652_s12 = sshll.u32 %s2577_s7, 4  ;;  %s1932_s13 = smov [#allocation8]   ;;  %s1653_s12 = int_to_ptr.hbm [resolvable:$true] %s1652_s12 }
  0x16   :  { %1678 = vmatmul.msk.bf16.vlgmr.msra.gmra.mxu0 %vm102_vm0, %v1704_v2  ;;  %s1650_s14 = sshll.u32 %s1932_s13, 4  ;;  %s1651_s14 = int_to_ptr.vmem [resolvable:$true] %s1650_s14 }
  0x93   :  { %v115_v4 = vpop.f32.mrf.mxu0 }
  0x94   :  { %v1993_v5 = vadd.f32 %v1767_v3, %v115_v4 }
  0x96   :  { %134 = vrot.lane.b32.xlu2 %v1993_v5, %s1916_s17  ;;  %140 = vrot.lane.b32.xlu1 %v1993_v5, %s1917_s18  ;;  %v191_v50 = vrot.slane %v1993_v5, 4 }
  0x97   :  { %146 = vrot.lane.b32.xlu0 %v1993_v5, %s1918_s19 }
  0x9b   :  { %v117_v6 = vpop.f32.mrf.mxu0 }
  0x9c   :  { %v2001_v7 = vadd.f32 %v1767_v3, %v117_v6 }
  0x9e   :  { %152 = vrot.lane.b32.xlu2 %v1993_v5, %s1919_s20  ;;  %158 = vrot.lane.b32.xlu1 %v1993_v5, %s1920_s21  ;;  %v2013_v8 = vpack.i.bf16 %v2001_v7, %v1993_v5  ;;  %v359_v62 = vrot.slane %v2001_v7, 4 }
  0x9f   :  { %122 = vrot.lane.b32.xlu0 %v1993_v5, %s1921_s22 }
  0xa6   :  { %124 = vrot.lane.b32.xlu2 %v2001_v7, %s1921_s22  ;;  %148 = vrot.lane.b32.xlu1 %v2001_v7, %s1918_s19 }
  0xa7   :  { %128 = vrot.lane.b32.xlu0 %v1993_v5, %s1922_s2 }
  0xae   :  { %136 = vrot.lane.b32.xlu2 %v2001_v7, %s1916_s17  ;;  %160 = vrot.lane.b32.xlu1 %v2001_v7, %s1920_s21 }
  0xaf   :  { %142 = vrot.lane.b32.xlu0 %v2001_v7, %s1917_s18 }
  0xb6   :  { %130 = vrot.lane.b32.xlu1 %v2001_v7, %s1922_s2 }
  0xb7   :  { %154 = vrot.lane.b32.xlu0 %v2001_v7, %s1919_s20 }
  0xbf   :  { %1733 = vrot.lane.b32.xlu0 %v2013_v8, %s1912_s9 }
  0xf0   :  { %v135_v9 = vpop.permute.xlu2 %134 }
  0xf1   :  { %v201_v31 = vrot.slane %v135_v9, 4 }
  0xf8   :  { %v153_v10 = vpop.permute.xlu2 %152 }
  0xf9   :  { %v213_v18 = vrot.slane %v153_v10, 4 }
 0x100   :  { %v125_v14 = vpop.permute.xlu2 %124 }
 0x101   :  { %v371_v43 = vrot.slane %v125_v14, 4 }
 0x108   :  { %v141_v11 = vpop.permute.xlu1 %140  ;;  %v137_v34 = vpop.permute.xlu2 %136 }
 0x109   :  { %v215_v12 = vrot.slane %v141_v11, 4  ;;  %v147_v13 = vpop.permute.xlu0 %146  ;;  %v214_v21 = vsel %vm189_vm1, %v213_v18, %v141_v11  ;;  %v369_v44 = vrot.slane %v137_v34, 4  ;;  %v372_v51 = vsel %vm189_vm1, %v137_v34, %v371_v43 }
 0x10a   :  { %v227_v20 = vrot.slane %v147_v13, 4  ;;  %v220_v32 = vperm.slane %v214_v21, %v2018_v19  ;;  %v2046_v63 = vperm.slane %v372_v51, %v2018_v19 }
 0x10b   :  { %v216_v17 = vsel %vm189_vm1, %v153_v10, %v215_v12  ;;  %v370_v59 = vsel %vm189_vm1, %v369_v44, %v125_v14 }
 0x10c   :  { %v224_v22 = vperm.slane %v216_v17, %v2018_v19  ;;  %v263_v47 = vrot.slane %v220_v32, 4  ;;  %v2055_v10 = vperm.slane %v370_v59, %v2018_v19 }
 0x10e   :  { %v275_v35 = vrot.slane %v224_v22, 4 }
 0x110   :  { %v159_v23 = vpop.permute.xlu1 %158 }
 0x111   :  { %v225_v26 = vrot.slane %v159_v23, 4  ;;  %v228_v27 = vsel %vm189_vm1, %v159_v23, %v227_v20  ;;  %v123_v28 = vpop.permute.xlu0 %122 }
 0x112   :  { %v236_v29 = vperm.slane %v228_v27, %v2018_v19  ;;  %v203_v30 = vrot.slane %v123_v28, 4  ;;  %v202_v40 = vsel %vm189_vm1, %v201_v31, %v123_v28 }
 0x113   :  { %v226_v33 = vsel %vm189_vm1, %v225_v26, %v147_v13  ;;  %v208_v48 = vperm.slane %v202_v40, %v2018_v19 }
 0x114   :  { %v232_v36 = vperm.slane %v226_v33, %v2018_v19  ;;  %v273_v37 = vrot.slane %v236_v29, 4  ;;  %v204_v38 = vsel %vm189_vm1, %v135_v9, %v203_v30  ;;  %v276_v42 = vsel %vm189_vm1, %v236_v29, %v275_v35 }
 0x115   :  { %v212_v46 = vperm.slane %v204_v38, %v2018_v19  ;;  %v284_v53 = vperm.slane %v276_v42, %v2028_v39  ;;  %v237_v1 = vrot.slane %v208_v48, 4  ;;  %v417_v42 = vrot.slane %v2046_v63, 4 }
 0x116   :  { %v261_v41 = vrot.slane %v232_v36, 4  ;;  %v274_v45 = vsel %vm189_vm1, %v273_v37, %v224_v22  ;;  %v264_v55 = vsel %vm189_vm1, %v232_v36, %v263_v47 }
 0x117   :  { %v280_v56 = vperm.slane %v274_v45, %v2028_v39  ;;  %v249_v60 = vrot.slane %v212_v46, 4  ;;  %v272_v3 = vperm.slane %v264_v55, %v2028_v39  ;;  %v297_v12 = vrot.slane %v284_v53, 4 }
 0x118   :  { %v149_v49 = vpop.permute.xlu1 %148  ;;  %v262_v52 = vsel %vm189_vm1, %v261_v41, %v220_v32  ;;  %v405_v41 = vrot.slane %v2055_v10, 4 }
 0x119   :  { %v129_v54 = vpop.permute.xlu0 %128  ;;  %v268_v0 = vperm.slane %v262_v52, %v2028_v39  ;;  %v293_v11 = vrot.slane %v280_v56, 4  ;;  %v395_v14 = vrot.slane %v149_v49, 4  ;;  %v289_v23 = vrot.slane %v272_v3, 4 }
 0x11a   :  { %v188_v57 = vrot.slane %v129_v54, 4  ;;  %v192_v58 = vsel %vm189_vm1, %v129_v54, %v191_v50 }
 0x11b   :  { %v200_v61 = vperm.slane %v192_v58, %v2018_v19  ;;  %v285_v17 = vrot.slane %v268_v0, 4 }
 0x11c   :  { %v190_v2 = vsel %vm189_vm1, %v188_v57, %v1993_v5 }
 0x11d   :  { %v196_v4 = vperm.slane %v190_v2, %v2018_v19  ;;  %v250_v6 = vsel %vm189_vm1, %v249_v60, %v200_v61  ;;  %v251_v9 = vrot.slane %v200_v61, 4 }
 0x11e   :  { %v256_v13 = vperm.slane %v250_v6, %v2028_v39 }
 0x11f   :  { %v238_v15 = vsel %vm189_vm1, %v237_v1, %v196_v4  ;;  %v239_v16 = vrot.slane %v196_v4, 4  ;;  %v252_v5 = vsel %vm189_vm1, %v212_v46, %v251_v9 }
 0x120   :  { %v244_v18 = vperm.slane %v238_v15, %v2028_v39  ;;  %v260_v20 = vperm.slane %v252_v5, %v2028_v39  ;;  %v295_v21 = vrot.slane %v256_v13, 4  ;;  %v161_v22 = vpop.permute.xlu1 %160  ;;  %v294_v31 = vsel %vm189_vm1, %v293_v11, %v256_v13 }
 0x121   :  { %v240_v24 = vsel %vm189_vm1, %v208_v48, %v239_v16  ;;  %v393_v25 = vrot.slane %v161_v22, 4  ;;  %v396_v26 = vsel %vm189_vm1, %v161_v22, %v395_v14  ;;  %v143_v27 = vpop.permute.xlu0 %142  ;;  %v551_v46 = vrot.slane %v294_v31, 4 }
 0x122   :  { %v248_v28 = vperm.slane %v240_v24, %v2028_v39  ;;  %v2066_v29 = vsel %vm189_vm1, %v285_v17, %v244_v18  ;;  %v287_v30 = vrot.slane %v244_v18, 4  ;;  %v2070_v32 = vsel %vm189_vm1, %v280_v56, %v295_v21 }
 0x123   :  { %v298_v33 = vsel %vm189_vm1, %v297_v12, %v260_v20  ;;  %v299_v34 = vrot.slane %v260_v20, 4  ;;  %v527_v35 = vrot.slane %v2066_v29, 4  ;;  %v394_v38 = vsel %vm189_vm1, %v393_v25, %v149_v49 }
 0x124   :  { %v291_v36 = vrot.slane %v248_v28, 4  ;;  %v549_v37 = vrot.slane %v298_v33, 4  ;;  %v404_v40 = vperm.slane %v396_v26, %v2018_v19  ;;  %v400_v44 = vperm.slane %v394_v38, %v2018_v19 }
 0x125   :  { %v2079_v43 = vsel %vm189_vm1, %v284_v53, %v299_v34  ;;  %v2085_v48 = vsel %vm189_vm1, %v289_v23, %v248_v28  ;;  %v563_v49 = vrot.slane %v2070_v32, 4  ;;  %v383_v51 = vrot.slane %v143_v27, 4 }
 0x126   :  { %v550_v45 = vsel %vm189_vm1, %v549_v37, %v294_v31  ;;  %v561_v47 = vrot.slane %v2079_v43, 4  ;;  %v441_v50 = vrot.slane %v404_v40, 4  ;;  %v2089_v52 = vsel %vm189_vm1, %v268_v0, %v287_v30 }
 0x127   :  { %v2092_v53 = vperm.slane %v550_v45, %v2018_v19  ;;  %v429_v54 = vrot.slane %v400_v44, 4  ;;  %v2095_v56 = vsel %vm189_vm1, %v272_v3, %v291_v36  ;;  %v528_v57 = vsel %vm189_vm1, %v2085_v48, %v527_v35 }
 0x128   :  { %v131_v55 = vpop.permute.xlu1 %130  ;;  %v2101_v58 = vsel %vm189_vm1, %v561_v47, %v2070_v32  ;;  %v525_v0 = vrot.slane %v2085_v48, 4  ;;  %v539_v3 = vrot.slane %v2089_v52, 4  ;;  %v2112_v11 = vperm.slane %v528_v57, %v2018_v19 }
 0x129   :  { %v357_v59 = vrot.slane %v131_v55, 4  ;;  %v360_v60 = vsel %vm189_vm1, %v131_v55, %v359_v62  ;;  %v155_v61 = vpop.permute.xlu0 %154  ;;  %v552_v62 = vsel %vm189_vm1, %v298_v33, %v551_v46 }
 0x12a   :  { %v368_v1 = vperm.slane %v360_v60, %v2018_v19  ;;  %v381_v2 = vrot.slane %v155_v61, 4  ;;  %v384_v4 = vsel %vm189_vm1, %v155_v61, %v383_v51  ;;  %v540_v31 = vsel %vm189_vm1, %v2095_v56, %v539_v3 }
 0x12b   :  { %v358_v6 = vsel %vm189_vm1, %v357_v59, %v2001_v7  ;;  %v392_v9 = vperm.slane %v384_v4, %v2018_v19  ;;  %v560_v45 = vperm.slane %v552_v62, %v2018_v19  ;;  %v587_v4 = vrot.slane %v2112_v11, 4 }
 0x12c   :  { %v364_v12 = vperm.slane %v358_v6, %v2018_v19  ;;  %v418_v13 = vsel %vm189_vm1, %v417_v42, %v368_v1  ;;  %v419_v14 = vrot.slane %v368_v1, 4  ;;  %v382_v15 = vsel %vm189_vm1, %v381_v2, %v143_v27 }
 0x12d   :  { %v424_v16 = vperm.slane %v418_v13, %v2028_v39  ;;  %v388_v5 = vperm.slane %v382_v15, %v2018_v19  ;;  %v442_v7 = vsel %vm189_vm1, %v441_v50, %v392_v9  ;;  %v443_v17 = vrot.slane %v392_v9, 4 }
 0x12e   :  { %v406_v18 = vsel %vm189_vm1, %v405_v41, %v364_v12  ;;  %v407_v20 = vrot.slane %v364_v12, 4  ;;  %v420_v21 = vsel %vm189_vm1, %v2046_v63, %v419_v14  ;;  %v448_v22 = vperm.slane %v442_v7, %v2028_v39 }
 0x12f   :  { %v2126_v23 = vperm.slane %v406_v18, %v2028_v39  ;;  %v428_v24 = vperm.slane %v420_v21, %v2028_v39  ;;  %v463_v25 = vrot.slane %v424_v16, 4  ;;  %v430_v26 = vsel %vm189_vm1, %v429_v54, %v388_v5 }
 0x130   :  { %v408_v27 = vsel %vm189_vm1, %v2055_v10, %v407_v20  ;;  %v431_v28 = vrot.slane %v388_v5, 4  ;;  %v444_v30 = vsel %vm189_vm1, %v404_v40, %v443_v17  ;;  %v2137_v34 = vperm.slane %v430_v26, %v2028_v39 }
 0x131   :  { %v455_v63 = vrot.slane %v2126_v23, 4  ;;  %v467_v33 = vrot.slane %v428_v24, 4  ;;  %v452_v35 = vperm.slane %v444_v30, %v2028_v39  ;;  %v2141_v36 = vperm.slane %v408_v27, %v2028_v39 }
 0x132   :  { %v432_v37 = vsel %vm189_vm1, %v400_v44, %v431_v28  ;;  %v461_v10 = vrot.slane %v448_v22, 4  ;;  %v464_v38 = vsel %vm189_vm1, %v448_v22, %v463_v25  ;;  %v537_v50 = vrot.slane %v2095_v56, 4 }
 0x133   :  { %v2146_v40 = vperm.slane %v432_v37, %v2028_v39  ;;  %v2150_v41 = vsel %vm189_vm1, %v2137_v34, %v455_v63  ;;  %v465_v42 = vrot.slane %v452_v35, 4  ;;  %v468_v46 = vsel %vm189_vm1, %v452_v35, %v467_v33 }
 0x134   :  { %v729_v47 = vrot.slane %v464_v38, 4  ;;  %v548_v44 = vperm.slane %v540_v31, %v2018_v19  ;;  %v453_v51 = vrot.slane %v2137_v34, 4  ;;  %v2158_v54 = vsel %vm189_vm1, %v461_v10, %v424_v16 }
 0x135   :  { %v2161_v55 = vsel %vm189_vm1, %v465_v42, %v428_v24  ;;  %v727_v57 = vrot.slane %v468_v46, 4  ;;  %v459_v59 = vrot.slane %v2141_v36, 4  ;;  %v457_v60 = vrot.slane %v2146_v40, 4 }
 0x136   :  { %v705_v61 = vrot.slane %v2150_v41, 4  ;;  %v715_v1 = vrot.slane %v2161_v55, 4  ;;  %v564_v2 = vsel %vm189_vm1, %v2079_v43, %v563_v49  ;;  %v611_v3 = vrot.slane %v560_v45, 4 }
 0x137   :  { %v728_v56 = vsel %vm189_vm1, %v727_v57, %v464_v38  ;;  %v717_v9 = vrot.slane %v2158_v54, 4  ;;  %v2177_v62 = vsel %vm189_vm1, %v468_v46, %v729_v47  ;;  %v572_v32 = vperm.slane %v564_v2, %v2018_v19 }
 0x138   :  { %v716_v6 = vsel %vm189_vm1, %v715_v1, %v2158_v54  ;;  %v2180_v12 = vperm.slane %v728_v56, %v2018_v19  ;;  %v588_v43 = vsel %vm189_vm1, %v548_v44, %v587_v4  ;;  %v585_v15 = vrot.slane %v548_v44, 4 }
 0x139   :  { %v2183_v13 = vperm.slane %v716_v6, %v2018_v19  ;;  %v596_v14 = vperm.slane %v588_v43, %v2028_v39  ;;  %v526_v16 = vsel %vm189_vm1, %v525_v0, %v2066_v29  ;;  %v612_v7 = vsel %vm189_vm1, %v572_v32, %v611_v3 }
 0x13a   :  { %v763_v49 = vrot.slane %v2180_v12, 4  ;;  %v609_v17 = vrot.slane %v572_v32, 4  ;;  %v532_v18 = vperm.slane %v526_v16, %v2018_v19  ;;  %v620_v20 = vperm.slane %v612_v7, %v2028_v39 }
 0x13b   :  { %v765_v5 = vrot.slane %v2183_v13, 4  ;;  %v586_v21 = vsel %vm189_vm1, %v585_v15, %v2112_v11  ;;  %v635_v22 = vrot.slane %v596_v14, 4  ;;  %v538_v24 = vsel %vm189_vm1, %v537_v50, %v2089_v52 }
 0x13c   :  { %v592_v48 = vperm.slane %v586_v21, %v2028_v39  ;;  %v610_v29 = vsel %vm189_vm1, %v609_v17, %v560_v45  ;;  %v544_v0 = vperm.slane %v538_v24, %v2018_v19  ;;  %v568_v25 = vperm.slane %v2101_v58, %v2018_v19 }
 0x13d   :  { %v633_v26 = vrot.slane %v620_v20, 4  ;;  %v616_v27 = vperm.slane %v610_v29, %v2028_v39  ;;  %v636_v28 = vsel %vm189_vm1, %v620_v20, %v635_v22  ;;  %v575_v30 = vrot.slane %v532_v18, 4 }
 0x13e   :  { %v876_v11 = vpack.c.bf16 %v636_v28, %v636_v28  ;;  %v631_v31 = vrot.slane %v592_v48, 4  ;;  %v599_v63 = vrot.slane %v2092_v53, 4  ;;  %v573_v52 = vrot.slane %v544_v0, 4 }
 0x13f   :  { %v634_v33 = vsel %vm189_vm1, %v633_v26, %v596_v14  ;;  %v629_v35 = vrot.slane %v616_v27, 4  ;;  %v576_v37 = vsel %vm189_vm1, %v544_v0, %v575_v30  ;;  %v597_v10 = vrot.slane %v568_v25, 4 }
 0x140   :  { %v875_v38 = vpack.c.bf16 %v634_v33, %v634_v33  ;;  %v951_v58 = vsel %vm889_vm2, %v876_v11, 0  ;;  %v632_v42 = vsel %vm189_vm1, %v616_v27, %v631_v31  ;;  %v584_v45 = vperm.slane %v576_v37, %v2028_v39 }
 0x141   :  { %v630_v46 = vsel %vm189_vm1, %v629_v35, %v592_v48  ;;  %960 = vmatpush.bf16.xpose.msrb.mxu0 %v951_v58  ;;  %v874_v47 = vpack.c.bf16 %v632_v42, %v632_v42  ;;  %v600_v50 = vsel %vm189_vm1, %v568_v25, %v599_v63  ;;  %v574_v44 = vsel %vm189_vm1, %v573_v52, %v532_v18 }
 0x142   :  { %v932_v57 = vsel %vm889_vm2, %v875_v38, 0  ;;  %v873_v1 = vpack.c.bf16 %v630_v46, %v630_v46  ;;  %v608_v56 = vperm.slane %v600_v50, %v2028_v39  ;;  %v627_v2 = vrot.slane %v584_v45, 4 }
 0x143   :  { %941 = vmatpush.bf16.xpose.msra.mxu3 %v932_v57  ;;  %v913_v4 = vsel %vm889_vm2, %v874_v47, 0  ;;  %v580_v3 = vperm.slane %v574_v44, %v2028_v39  ;;  %v598_v6 = vsel %vm189_vm1, %v597_v10, %v2092_v53  ;;  %v454_v32 = vsel %vm189_vm1, %v453_v51, %v2126_v23 }
 0x144   :  { %v894_v43 = vsel %vm889_vm2, %v873_v1, 0  ;;  %922 = vmatpush.bf16.xpose.msra.mxu2 %v913_v4  ;;  %v625_v14 = vrot.slane %v608_v56, 4  ;;  %v604_v15 = vperm.slane %v598_v6, %v2028_v39  ;;  %v628_v16 = vsel %vm189_vm1, %v608_v56, %v627_v2 }
 0x145   :  { %903 = vmatpush.bf16.xpose.msra.mxu1 %v894_v43  ;;  %v860_v7 = vmul.f32 0.35355338, %v628_v16  ;;  %v623_v17 = vrot.slane %v580_v3, 4  ;;  %v458_v53 = vsel %vm189_vm1, %v457_v60, %v2141_v36  ;;  %v460_v23 = vsel %vm189_vm1, %v2146_v40, %v459_v59 }
 0x146   :  { %v626_v34 = vsel %vm189_vm1, %v625_v14, %v584_v45  ;;  %v621_v51 = vrot.slane %v604_v15, 4  ;;  %v691_v18 = vrot.slane %v458_v53, 4  ;;  %v693_v20 = vrot.slane %v454_v32, 4 }
 0x147   :  { %v859_v21 = vmul.f32 0.35355338, %v626_v34  ;;  %v868_v22 = vpack.c.bf16 %v860_v7, %v860_v7  ;;  %v624_v24 = vsel %vm189_vm1, %v604_v15, %v623_v17  ;;  %v703_v48 = vrot.slane %v460_v23, 4 }
 0x148   :  { %v622_v29 = vsel %vm189_vm1, %v621_v51, %v580_v3  ;;  %v858_v0 = vmul.f32 0.35355338, %v624_v24  ;;  %v694_v60 = vsel %vm189_vm1, %v458_v53, %v693_v20  ;;  %v706_v36 = vsel %vm189_vm1, %v460_v23, %v705_v61 }
 0x149   :  { %v867_v40 = vpack.c.bf16 %v859_v21, %v859_v21  ;;  %v857_v59 = vmul.f32 0.35355338, %v622_v29  ;;  %1682 = vmatmul.msk.bf16.vlgmr.msrb.gmra.mxu0 %vm889_vm2, %v868_v22  ;;  %v702_v25 = vperm.slane %v694_v60, %v2018_v19  ;;  %v714_v26 = vperm.slane %v706_v36, %v2018_v19 }
 0x14a   :  { %v866_v27 = vpack.c.bf16 %v858_v0, %v858_v0  ;;  %v718_v28 = vsel %vm189_vm1, %v2161_v55, %v717_v9  ;;  %v738_v30 = vperm.slane %v2177_v62, %v2018_v19  ;;  %v692_v11 = vsel %vm189_vm1, %v691_v18, %v454_v32 }
 0x14b   :  { %1681 = vmatmul.msk.bf16.vlgmr.msra.gmra.mxu3 %vm889_vm2, %v867_v40  ;;  %v865_v61 = vpack.c.bf16 %v857_v59, %v857_v59  ;;  %v726_v31 = vperm.slane %v718_v28, %v2018_v19  ;;  %v751_v63 = vrot.slane %v714_v26, 4  ;;  %v753_v52 = vrot.slane %v702_v25, 4 }
 0x14c   :  { %1680 = vmatmul.msk.bf16.vlgmr.msra.gmra.mxu2 %vm889_vm2, %v866_v27  ;;  %v775_v33 = vrot.slane %v738_v30, 4  ;;  %v698_v54 = vperm.slane %v692_v11, %v2018_v19  ;;  %v704_v55 = vsel %vm189_vm1, %v703_v48, %v2150_v41  ;;  %v764_v9 = vsel %vm189_vm1, %v763_v49, %v2183_v13 }
 0x14d   :  { %1679 = vmatmul.msk.bf16.vlgmr.msra.gmra.mxu1 %vm889_vm2, %v865_v61  ;;  %v752_v62 = vsel %vm189_vm1, %v751_v63, %v702_v25  ;;  %v754_v35 = vsel %vm189_vm1, %v714_v26, %v753_v52  ;;  %v777_v37 = vrot.slane %v726_v31, 4  ;;  %v710_v10 = vperm.slane %v704_v55, %v2018_v19 }
 0x14e   :  { %v758_v38 = vperm.slane %v752_v62, %v2028_v39  ;;  %v776_v58 = vsel %vm189_vm1, %v775_v33, %v726_v31  ;;  %v762_v41 = vperm.slane %v754_v35, %v2028_v39  ;;  %v770_v42 = vperm.slane %v764_v9, %v2028_v39 }
 0x14f   :  { %v782_v45 = vperm.slane %v776_v58, %v2028_v39  ;;  %v778_v49 = vsel %vm189_vm1, %v738_v30, %v777_v37  ;;  %v739_v46 = vrot.slane %v710_v10, 4  ;;  %v741_v47 = vrot.slane %v698_v54, 4 }
 0x150   :  { %v786_v50 = vperm.slane %v778_v49, %v2028_v39  ;;  %v801_v44 = vrot.slane %v762_v41, 4  ;;  %v797_v57 = vrot.slane %v758_v38, 4  ;;  %v787_v1 = vrot.slane %v770_v42, 4 }
 0x151   :  { %v795_v56 = vrot.slane %v782_v45, 4  ;;  %v740_v2 = vsel %vm189_vm1, %v739_v46, %v698_v54  ;;  %v742_v4 = vsel %vm189_vm1, %v710_v10, %v741_v47  ;;  %v766_v3 = vsel %vm189_vm1, %v2180_v12, %v765_v5 }
 0x152   :  { %v799_v6 = vrot.slane %v786_v50, 4  ;;  %v798_v32 = vsel %vm189_vm1, %v782_v45, %v797_v57  ;;  %v802_v43 = vsel %vm189_vm1, %v786_v50, %v801_v44  ;;  %v746_v14 = vperm.slane %v740_v2, %v2028_v39 }
 0x153   :  { %v796_v15 = vsel %vm189_vm1, %v795_v56, %v758_v38  ;;  %v878_v16 = vpack.c.bf16 %v798_v32, %v798_v32  ;;  %v880_v7 = vpack.c.bf16 %v802_v43, %v802_v43  ;;  %v750_v17 = vperm.slane %v742_v4, %v2028_v39 }
 0x154   :  { %v877_v53 = vpack.c.bf16 %v796_v15, %v796_v15  ;;  %v800_v23 = vsel %vm189_vm1, %v799_v6, %v762_v41  ;;  %v774_v13 = vperm.slane %v766_v3, %v2028_v39  ;;  %v788_v51 = vsel %vm189_vm1, %v787_v1, %v746_v14  ;;  %v2315_v1 = vpop.permute.xlu0 %1733 }
 0x155   :  { %v879_v34 = vpack.c.bf16 %v800_v23, %v800_v23  ;;  %v989_v12 = vsel %vm889_vm2, %v878_v16, 0  ;;  %v1027_v5 = vsel %vm889_vm2, %v880_v7, 0  ;;  %v793_v21 = vrot.slane %v750_v17, 4 }
 0x156   :  { %v970_v18 = vsel %vm889_vm2, %v877_v53, 0  ;;  %998 = vmatpush.bf16.xpose.msrb.mxu2 %v989_v12  ;;  %1036 = vmatpush.bf16.xpose.msra.mxu0 %v1027_v5  ;;  %v791_v20 = vrot.slane %v774_v13, 4  ;;  %v789_v22 = vrot.slane %v746_v14, 4  ;;  %v861_v48 = vmul.f32 0.35355338, %v788_v51 }
 0x157   :  { %979 = vmatpush.bf16.xpose.msrb.mxu1 %v970_v18  ;;  %v1008_v24 = vsel %vm889_vm2, %v879_v34, 0  ;;  %v794_v60 = vsel %vm189_vm1, %v774_v13, %v793_v21 }
 0x158   :  { %1017 = vmatpush.bf16.xpose.msrb.mxu3 %v1008_v24  ;;  %v792_v29 = vsel %vm189_vm1, %v791_v20, %v750_v17  ;;  %v790_v0 = vsel %vm189_vm1, %v770_v42, %v789_v22  ;;  %v864_v59 = vmul.f32 0.35355338, %v794_v60  ;;  %v869_v27 = vpack.c.bf16 %v861_v48, %v861_v48 }
 0x159   :  { %v863_v36 = vmul.f32 0.35355338, %v792_v29  ;;  %v862_v40 = vmul.f32 0.35355338, %v790_v0 }
 0x15a   :  { %v872_v26 = vpack.c.bf16 %v864_v59, %v864_v59 }
 0x15b   :  { %v870_v25 = vpack.c.bf16 %v862_v40, %v862_v40  ;;  %v871_v28 = vpack.c.bf16 %v863_v36, %v863_v36 }
 0x15d   :  { %1684 = vmatmul.msk.bf16.vlgmr.msrb.gmra.mxu2 %vm889_vm2, %v870_v25  ;;  %1686 = vmatmul.msk.bf16.vlgmr.msra.gmra.mxu0 %vm889_vm2, %v872_v26  ;;  %v1735_v25 = vunpack.i.l.bf16 %v2315_v1 }
 0x15e   :  { %1683 = vmatmul.msk.bf16.vlgmr.msrb.gmra.mxu1 %vm889_vm2, %v869_v27 }
 0x15f   :  { %1685 = vmatmul.msk.bf16.vlgmr.msrb.gmra.mxu3 %vm889_vm2, %v871_v28 }
 0x1c6   :  { %v962_v30 = vpop.f32.mrf.mxu0 }
 0x1c7   :  { %v1051_v11 = vsel %vm889_vm2, %v962_v30, -inf }
 0x1c8   :  { %1052 = vmax.xlane.f32.xlu2 %v1051_v11 }
 0x1ca   :  { %v905_v61 = vpop.f32.mrf.mxu1 }
 0x1cb   :  { %v1042_v31 = vsel %vm889_vm2, %v905_v61, -inf }
 0x1cc   :  { %1043 = vmax.xlane.f32.xlu1 %v1042_v31 }
 0x1ce   :  { %v943_v63 = vpop.f32.mrf.mxu3  ;;  %v964_v52 = vpop.f32.mrf.mxu0 }
 0x1cf   :  { %v924_v33 = vpop.f32.mrf.mxu2  ;;  %v1048_v54 = vsel %vm889_vm2, %v943_v63, -inf }
 0x1d0   :  { %1049 = vmax.xlane.f32.xlu2 %v1048_v54  ;;  %v1045_v55 = vsel %vm889_vm2, %v924_v33, -inf }
 0x1d1   :  { %1046 = vmax.xlane.f32.xlu0 %v1045_v55 }
 0x1d2   :  { %v907_v9 = vpop.f32.mrf.mxu1 }
 0x1d6   :  { %v945_v62 = vpop.f32.mrf.mxu3 }
 0x1d7   :  { %v926_v35 = vpop.f32.mrf.mxu2 }
 0x1da   :  { %v2305_v37 = vpop.f32.mrf.mxu0 }
 0x1db   :  { %v981_v10 = vpop.f32.mrf.mxu1  ;;  %v1063_v38 = vsel %vm889_vm2, %v2305_v37, -inf }
 0x1dc   :  { %v1054_v58 = vsel %vm889_vm2, %v981_v10, -inf  ;;  %1064 = vmax.xlane.f32.xlu2 %v1063_v38 }
 0x1dd   :  { %1055 = vmax.xlane.f32.xlu1 %v1054_v58 }
 0x1e0   :  { %v1000_v41 = vpop.f32.mrf.mxu2 }
 0x1e1   :  { %v1057_v42 = vsel %vm889_vm2, %v1000_v41, -inf }
 0x1e2   :  { %v1019_v45 = vpop.f32.mrf.mxu3  ;;  %v1040_v49 = vpop.f32.mrf.mxu0  ;;  %1058 = vmax.xlane.f32.xlu0 %v1057_v42 }
 0x1e3   :  { %v983_v46 = vpop.f32.mrf.mxu1  ;;  %v1060_v47 = vsel %vm889_vm2, %v1019_v45, -inf }
 0x1e4   :  { %1061 = vmax.xlane.f32.xlu2 %v1060_v47 }
 0x1e8   :  { %v1002_v50 = vpop.f32.mrf.mxu2 }
 0x1ea   :  { %v1021_v44 = vpop.f32.mrf.mxu3 }
 0x1f6   :  { %1738 = vrot.lane.b32.xlu1 %v2013_v8, %s1925_s23  ;;  %1748 = vrot.lane.b32.xlu0 %v2013_v8, %s1926_s24 }
 0x1fc   :  { %1743 = vrot.lane.b32.xlu2 %v2013_v8, %s1927_s25 }
 0x23b   :  { %v1053_v57 = vpop.xlane.xlu2 %1052 }
 0x23c   :  { %v1069_v14 = vsub.f32 %v962_v30, %v1053_v57 }
 0x23e   :  { %v1080_v17 = vmul.f32 1.442695, %v1069_v14 }
 0x23f   :  { %v1044_v56 = vpop.xlane.xlu1 %1043 }
 0x240   :  { %v1066_v2 = vsub.f32 %v905_v61, %v1044_v56  ;;  %v1736_v61 = vunpack.i.h.bf16 %v2315_v1 }
 0x242   :  { %v1074_v4 = vmul.f32 1.442695, %v1066_v2  ;;  %v471_v9 = vrot.slane %v1736_v61, 4 }
 0x243   :  { %v1050_v3 = vpop.xlane.xlu2 %1049 }
 0x244   :  { %1771 = vpow2.f32 %v1074_v4  ;;  %v1068_v6 = vsub.f32 %v943_v63, %v1050_v3  ;;  %v1047_v32 = vpop.xlane.xlu0 %1046 }
 0x245   :  { %v1067_v43 = vsub.f32 %v924_v33, %v1047_v32  ;;  %v303_v33 = vrot.slane %v1735_v25, 4 }
 0x246   :  { %v1078_v15 = vmul.f32 1.442695, %v1068_v6 }
 0x247   :  { %v1076_v16 = vmul.f32 1.442695, %v1067_v43 }
 0x248   :  { %1773 = vpow2.f32 %v1078_v15 }
 0x249   :  { %1775 = vpow2.f32 %v1076_v16 }
 0x24a   :  { %v2317_v7 = vpop.eup %1771  ;;  %1777 = vpow2.f32 %v1080_v17 }
 0x24b   :  { %v1090_v8 = vsel %vm889_vm2, %v2317_v7, 0.0 }
 0x24c   :  { %1091 = vadd.xlane.f32.xlu2 %v1090_v8 }
 0x24e   :  { %v2321_v53 = vpop.eup %1773 }
 0x24f   :  { %v2323_v23 = vpop.eup %1775  ;;  %v1065_v13 = vpop.xlane.xlu2 %1064  ;;  %v1096_v34 = vsel %vm889_vm2, %v2321_v53, 0.0 }
 0x250   :  { %v1056_v12 = vpop.xlane.xlu1 %1055  ;;  %v1093_v5 = vsel %vm889_vm2, %v2323_v23, 0.0  ;;  %1097 = vadd.xlane.f32.xlu1 %v1096_v34  ;;  %v2329_v20 = vpop.eup %1777  ;;  %v1073_v60 = vsub.f32 %v2305_v37, %v1065_v13 }
 0x251   :  { %v1070_v51 = vsub.f32 %v981_v10, %v1056_v12  ;;  %1094 = vadd.xlane.f32.xlu0 %v1093_v5  ;;  %v1099_v48 = vsel %vm889_vm2, %v2329_v20, 0.0 }
 0x252   :  { %v1088_v59 = vmul.f32 1.442695, %v1073_v60 }
 0x253   :  { %v1082_v18 = vmul.f32 1.442695, %v1070_v51 }
 0x255   :  { %v1059_v21 = vpop.xlane.xlu0 %1058  ;;  %1779 = vpow2.f32 %v1082_v18 }
 0x256   :  { %v1071_v22 = vsub.f32 %v1000_v41, %v1059_v21 }
 0x257   :  { %v1062_v24 = vpop.xlane.xlu2 %1061 }
 0x258   :  { %v1084_v29 = vmul.f32 1.442695, %v1071_v22  ;;  %v1072_v0 = vsub.f32 %v1019_v45, %v1062_v24  ;;  %1100 = vadd.xlane.f32.xlu1 %v1099_v48 }
 0x25a   :  { %1781 = vpow2.f32 %v1084_v29  ;;  %v1086_v36 = vmul.f32 1.442695, %v1072_v0 }
 0x25b   :  { %v2334_v40 = vpop.eup %1779 }
 0x25c   :  { %1783 = vpow2.f32 %v1086_v36  ;;  %v1102_v27 = vsel %vm889_vm2, %v2334_v40, 0.0 }
 0x25d   :  { %1785 = vpow2.f32 %v1088_v59 }
 0x25f   :  { %v1744_v26 = vpop.permute.xlu2 %1743 }
 0x260   :  { %v2339_v28 = vpop.eup %1781  ;;  %v1746_v30 = vunpack.i.h.bf16 %v1744_v26  ;;  %v1745_v11 = vunpack.i.l.bf16 %v1744_v26  ;;  %1103 = vadd.xlane.f32.xlu1 %v1102_v27 }
 0x261   :  { %v1105_v31 = vsel %vm889_vm2, %v2339_v28, 0.0 }
 0x262   :  { %v2344_v63 = vpop.eup %1783  ;;  %v301_v52 = vrot.slane %v1745_v11, 4  ;;  %1106 = vadd.xlane.f32.xlu2 %v1105_v31  ;;  %v469_v54 = vrot.slane %v1746_v30, 4  ;;  %v304_v35 = vsel %vm189_vm1, %v1745_v11, %v303_v33  ;;  %v472_v38 = vsel %vm189_vm1, %v1746_v30, %v471_v9 }
 0x263   :  { %v1108_v55 = vsel %vm889_vm2, %v2344_v63, 0.0  ;;  %v2350_v37 = vpop.eup %1785  ;;  %v312_v41 = vperm.slane %v304_v35, %v2018_v19  ;;  %v480_v57 = vperm.slane %v472_v38, %v2018_v19 }
 0x264   :  { %1109 = vadd.xlane.f32.xlu0 %v1108_v55  ;;  %v302_v62 = vsel %vm189_vm1, %v301_v52, %v1735_v25  ;;  %v470_v10 = vsel %vm189_vm1, %v469_v54, %v1736_v61  ;;  %v1111_v1 = vsel %vm889_vm2, %v2350_v37, 0.0 }
 0x265   :  { %v308_v58 = vperm.slane %v302_v62, %v2018_v19  ;;  %v476_v44 = vperm.slane %v470_v10, %v2018_v19  ;;  %v339_v32 = vrot.slane %v312_v41, 4  ;;  %v507_v5 = vrot.slane %v480_v57, 4 }
 0x267   :  { %v327_v6 = vrot.slane %v308_v58, 4  ;;  %v495_v12 = vrot.slane %v476_v44, 4 }
 0x268   :  { %v1739_v42 = vpop.permute.xlu1 %1738  ;;  %v1749_v45 = vpop.permute.xlu0 %1748 }
 0x269   :  { %v1741_v49 = vunpack.i.h.bf16 %v1739_v42  ;;  %v1740_v46 = vunpack.i.l.bf16 %v1739_v42  ;;  %v1751_v47 = vunpack.i.h.bf16 %v1749_v45  ;;  %v1750_v50 = vunpack.i.l.bf16 %v1749_v45 }
 0x26b   :  { %v483_v56 = vrot.slane %v1741_v49, 4  ;;  %v315_v2 = vrot.slane %v1740_v46, 4  ;;  %v481_v4 = vrot.slane %v1751_v47, 4  ;;  %v313_v3 = vrot.slane %v1750_v50, 4 }
 0x26c   :  { %1112 = vadd.xlane.f32.xlu0 %v1111_v1 }
 0x26d   :  { %v314_v43 = vsel %vm189_vm1, %v313_v3, %v1740_v46  ;;  %v316_v14 = vsel %vm189_vm1, %v1750_v50, %v315_v2  ;;  %v482_v15 = vsel %vm189_vm1, %v481_v4, %v1741_v49  ;;  %v484_v16 = vsel %vm189_vm1, %v1751_v47, %v483_v56 }
 0x26e   :  { %v320_v17 = vperm.slane %v314_v43, %v2018_v19  ;;  %v324_v8 = vperm.slane %v316_v14, %v2018_v19  ;;  %v488_v13 = vperm.slane %v482_v15, %v2018_v19  ;;  %v492_v34 = vperm.slane %v484_v16, %v2018_v19 }
 0x270   :  { %v325_v51 = vrot.slane %v320_v17, 4  ;;  %v328_v18 = vsel %vm189_vm1, %v320_v17, %v327_v6  ;;  %v337_v21 = vrot.slane %v324_v8, 4  ;;  %v340_v22 = vsel %vm189_vm1, %v324_v8, %v339_v32 }
 0x271   :  { %v336_v24 = vperm.slane %v328_v18, %v2028_v39  ;;  %v348_v48 = vperm.slane %v340_v22, %v2028_v39  ;;  %v493_v29 = vrot.slane %v488_v13, 4  ;;  %v496_v0 = vsel %vm189_vm1, %v488_v13, %v495_v12 }
 0x272   :  { %v326_v60 = vsel %vm189_vm1, %v325_v51, %v308_v58  ;;  %v338_v36 = vsel %vm189_vm1, %v337_v21, %v312_v41  ;;  %v504_v59 = vperm.slane %v496_v0, %v2028_v39  ;;  %v505_v25 = vrot.slane %v492_v34, 4 }
 0x273   :  { %v332_v26 = vperm.slane %v326_v60, %v2028_v39  ;;  %v344_v27 = vperm.slane %v338_v36, %v2028_v39  ;;  %v351_v30 = vrot.slane %v336_v24, 4  ;;  %v355_v11 = vrot.slane %v348_v48, 4 }
 0x274   :  { %v494_v61 = vsel %vm189_vm1, %v493_v29, %v476_v44  ;;  %v506_v31 = vsel %vm189_vm1, %v505_v25, %v480_v57  ;;  %v508_v52 = vsel %vm189_vm1, %v492_v34, %v507_v5  ;;  %v519_v33 = vrot.slane %v504_v59, 4 }
 0x275   :  { %v349_v54 = vrot.slane %v332_v26, 4  ;;  %v352_v55 = vsel %vm189_vm1, 0.0, %v351_v30  ;;  %v353_v9 = vrot.slane %v344_v27, 4  ;;  %v356_v62 = vsel %vm189_vm1, 0.0, %v355_v11 }
 0x276   :  { %v500_v35 = vperm.slane %v494_v61, %v2028_v39  ;;  %v512_v10 = vperm.slane %v506_v31, %v2028_v39  ;;  %v516_v38 = vperm.slane %v508_v52, %v2028_v39  ;;  %v520_v58 = vsel %vm189_vm1, 0.0, %v519_v33 }
 0x277   :  { %v354_v41 = vsel %vm189_vm1, 0.0, %v353_v9  ;;  %v642_v42 = vrot.slane %v352_v55, 4  ;;  %v648_v45 = vsel %vm189_vm1, %v355_v11, %v344_v27  ;;  %v653_v49 = vrot.slane %v356_v62, 4 }
 0x278   :  { %v517_v46 = vrot.slane %v500_v35, 4  ;;  %v521_v47 = vrot.slane %v512_v10, 4  ;;  %v523_v50 = vrot.slane %v516_v38, 4  ;;  %v652_v44 = vperm.slane %v648_v45, %v2018_v19 }
 0x279   :  { %v808_v57 = vrot.slane %v520_v58, 4  ;;  %v350_v1 = vsel %vm189_vm1, 0.0, %v349_v54  ;;  %v637_v56 = vsel %vm189_vm1, %v351_v30, %v332_v26  ;;  %v654_v2 = vsel %vm189_vm1, %v653_v49, %v354_v41 }
 0x27a   :  { %v522_v4 = vsel %vm189_vm1, 0.0, %v521_v47  ;;  %v524_v3 = vsel %vm189_vm1, 0.0, %v523_v50  ;;  %v814_v6 = vsel %vm189_vm1, %v523_v50, %v512_v10  ;;  %v641_v32 = vperm.slane %v637_v56, %v2018_v19 }
 0x27b   :  { %v818_v43 = vperm.slane %v814_v6, %v2018_v19  ;;  %v819_v14 = vrot.slane %v524_v3, 4  ;;  %v643_v15 = vsel %vm189_vm1, %v642_v42, %v350_v1  ;;  %v658_v16 = vperm.slane %v654_v2, %v2018_v19 }
 0x27c   :  { %v647_v17 = vperm.slane %v643_v15, %v2018_v19  ;;  %v661_v8 = vrot.slane %v641_v32, 4  ;;  %v673_v13 = vrot.slane %v652_v44, 4  ;;  %v518_v34 = vsel %vm189_vm1, 0.0, %v517_v46 }
 0x27d   :  { %v803_v12 = vsel %vm189_vm1, %v519_v33, %v500_v35  ;;  %v809_v5 = vsel %vm189_vm1, %v808_v57, %v518_v34  ;;  %v820_v51 = vsel %vm189_vm1, %v819_v14, %v522_v4  ;;  %v839_v18 = vrot.slane %v818_v43, 4 }
 0x27e   :  { %v662_v21 = vsel %vm189_vm1, %v647_v17, %v661_v8  ;;  %v674_v22 = vsel %vm189_vm1, %v658_v16, %v673_v13  ;;  %v807_v24 = vperm.slane %v803_v12, %v2018_v19  ;;  %v813_v48 = vperm.slane %v809_v5, %v2018_v19 }
 0x27f   :  { %v670_v29 = vperm.slane %v662_v21, %v2028_v39  ;;  %v682_v0 = vperm.slane %v674_v22, %v2028_v39  ;;  %v824_v60 = vperm.slane %v820_v51, %v2018_v19  ;;  %v659_v36 = vrot.slane %v647_v17, 4 }
 0x280   :  { %v827_v59 = vrot.slane %v807_v24, 4  ;;  %v671_v25 = vrot.slane %v658_v16, 4  ;;  %v825_v26 = vrot.slane %v813_v48, 4 }
 0x281   :  { %v687_v27 = vrot.slane %v682_v0, 4  ;;  %v840_v30 = vsel %vm189_vm1, %v824_v60, %v839_v18  ;;  %v660_v11 = vsel %vm189_vm1, %v659_v36, %v641_v32  ;;  %v689_v61 = vrot.slane %v670_v29, 4 }
 0x282   :  { %v828_v31 = vsel %vm189_vm1, %v813_v48, %v827_v59  ;;  %v848_v52 = vperm.slane %v840_v30, %v2028_v39  ;;  %v666_v33 = vperm.slane %v660_v11, %v2028_v39  ;;  %v672_v54 = vsel %vm189_vm1, %v671_v25, %v652_v44 }
 0x283   :  { %v688_v55 = vsel %vm189_vm1, %v687_v27, %v670_v29  ;;  %v836_v9 = vperm.slane %v828_v31, %v2028_v39  ;;  %v678_v62 = vperm.slane %v672_v54, %v2028_v39  ;;  %v690_v35 = vsel %vm189_vm1, %v682_v0, %v689_v61 }
 0x284   :  { %v883_v10 = vpack.c.bf16 %v688_v55, %v688_v55  ;;  %v853_v38 = vrot.slane %v848_v52, 4  ;;  %v884_v58 = vpack.c.bf16 %v690_v35, %v690_v35  ;;  %v826_v41 = vsel %vm189_vm1, %v825_v26, %v807_v24 }
 0x285   :  { %v683_v42 = vrot.slane %v678_v62, 4  ;;  %v832_v45 = vperm.slane %v826_v41, %v2028_v39  ;;  %v837_v49 = vrot.slane %v824_v60, 4  ;;  %v855_v46 = vrot.slane %v836_v9, 4 }
 0x286   :  { %v1181_v47 = vsel %vm1141_vm3, %v883_v10, 0  ;;  %v854_v50 = vsel %vm189_vm1, %v853_v38, %v836_v9  ;;  %v1200_v44 = vsel %vm1141_vm3, %v884_v58, 0  ;;  %v685_v57 = vrot.slane %v666_v33, 4 }
 0x287   :  { %1190 = vmatpush.bf16.msra.mxu3 %v1181_v47  ;;  %v887_v1 = vpack.c.bf16 %v854_v50, %v854_v50  ;;  %v684_v56 = vsel %vm189_vm1, %v683_v42, %v666_v33  ;;  %1209 = vmatpush.bf16.msrb.mxu0 %v1200_v44  ;;  %v838_v2 = vsel %vm189_vm1, %v837_v49, %v818_v43  ;;  %v851_v4 = vrot.slane %v832_v45, 4 }
 0x288   :  { %v881_v3 = vpack.c.bf16 %v684_v56, %v684_v56  ;;  %v844_v6 = vperm.slane %v838_v2, %v2028_v39  ;;  %v856_v32 = vsel %vm189_vm1, %v848_v52, %v855_v46  ;;  %v686_v14 = vsel %vm189_vm1, %v678_v62, %v685_v57 }
 0x289   :  { %v1257_v15 = vsel %vm1141_vm3, %v887_v1, 0  ;;  %v888_v16 = vpack.c.bf16 %v856_v32, %v856_v32  ;;  %v882_v17 = vpack.c.bf16 %v686_v14, %v686_v14 }
 0x28a   :  { %v1143_v8 = vsel %vm1141_vm3, %v881_v3, 0  ;;  %v849_v13 = vrot.slane %v844_v6, 4  ;;  %v852_v34 = vsel %vm189_vm1, %v844_v6, %v851_v4 }
 0x28b   :  { %1266 = vmatpush.bf16.msrb.mxu3 %v1257_v15  ;;  %1152 = vmatpush.bf16.msra.mxu1 %v1143_v8  ;;  %v1276_v43 = vsel %vm1141_vm3, %v888_v16, 0  ;;  %v1162_v12 = vsel %vm1141_vm3, %v882_v17, 0  ;;  %v886_v5 = vpack.c.bf16 %v852_v34, %v852_v34 }
 0x28c   :  { %v850_v51 = vsel %vm189_vm1, %v849_v13, %v832_v45  ;;  %1285 = vmatpush.bf16.msra.mxu0 %v1276_v43  ;;  %1171 = vmatpush.bf16.msra.mxu2 %v1162_v12 }
 0x28d   :  { %v885_v18 = vpack.c.bf16 %v850_v51, %v850_v51  ;;  %v1238_v21 = vsel %vm1141_vm3, %v886_v5, 0 }
 0x28f   :  { %v1219_v22 = vsel %vm1141_vm3, %v885_v18, 0 }
 0x290   :  { %1247 = vmatpush.bf16.msrb.mxu2 %v1238_v21  ;;  %1228 = vmatpush.bf16.msrb.mxu1 %v1219_v22 }
 0x2bf   :  { %v1092_v24 = vpop.xlane.xlu2 %1091 }
 0x2c0   :  { %1787 = vrcp.f32 %v1092_v24 }
 0x2c3   :  { %v1098_v48 = vpop.xlane.xlu1 %1097 }
 0x2c4   :  { %v1095_v29 = vpop.xlane.xlu0 %1094  ;;  %1789 = vrcp.f32 %v1098_v48 }
 0x2c5   :  { %1791 = vrcp.f32 %v1095_v29 }
 0x2c6   :  { %v1788_v0 = vpop.eup %1787 }
 0x2c7   :  { %v1122_v60 = vmul.f32 %v1788_v0, %v2317_v7 }
 0x2c9   :  { %v1130_v36 = vpack.c.bf16 %v1122_v60, %v1122_v60 }
 0x2ca   :  { %v1790_v59 = vpop.eup %1789 }
 0x2cb   :  { %v1792_v25 = vpop.eup %1791  ;;  %v1124_v26 = vmul.f32 %v1790_v59, %v2321_v53  ;;  %1687 = vmatmul.msk.bf16.vlgmr.msra.gmra.mxu1 %vm889_vm2, %v1130_v36  ;;  %v1101_v27 = vpop.xlane.xlu1 %1100 }
 0x2cc   :  { %v1123_v30 = vmul.f32 %v1792_v25, %v2323_v23  ;;  %1793 = vrcp.f32 %v1101_v27 }
 0x2cd   :  { %v1132_v11 = vpack.c.bf16 %v1124_v26, %v1124_v26 }
 0x2ce   :  { %v1131_v61 = vpack.c.bf16 %v1123_v30, %v1123_v30 }
 0x2cf   :  { %1689 = vmatmul.msk.bf16.vlgmr.msra.gmra.mxu3 %vm889_vm2, %v1132_v11 }
 0x2d0   :  { %1688 = vmatmul.msk.bf16.vlgmr.msra.gmra.mxu2 %vm889_vm2, %v1131_v61 }
 0x2d2   :  { %v1794_v31 = vpop.eup %1793 }
 0x2d3   :  { %v1125_v7 = vmul.f32 %v1794_v31, %v2329_v20  ;;  %v1104_v52 = vpop.xlane.xlu1 %1103 }
 0x2d4   :  { %1795 = vrcp.f32 %v1104_v52 }
 0x2d5   :  { %v1133_v33 = vpack.c.bf16 %v1125_v7, %v1125_v7  ;;  %v1107_v54 = vpop.xlane.xlu2 %1106 }
 0x2d6   :  { %1797 = vrcp.f32 %v1107_v54 }
 0x2d7   :  { %v1110_v53 = vpop.xlane.xlu0 %1109  ;;  %1690 = vmatmul.msk.bf16.vlgmr.msrb.gmra.mxu0 %vm889_vm2, %v1133_v33 }
 0x2d8   :  { %1799 = vrcp.f32 %v1110_v53 }
 0x2da   :  { %v1796_v23 = vpop.eup %1795 }
 0x2db   :  { %v1126_v55 = vmul.f32 %v1796_v23, %v2334_v40 }
 0x2dc   :  { %v1798_v9 = vpop.eup %1797 }
 0x2dd   :  { %v1127_v62 = vmul.f32 %v1798_v9, %v2339_v28  ;;  %v1134_v35 = vpack.c.bf16 %v1126_v55, %v1126_v55 }
 0x2de   :  { %v1800_v10 = vpop.eup %1799 }
 0x2df   :  { %v1135_v38 = vpack.c.bf16 %v1127_v62, %v1127_v62  ;;  %v1128_v20 = vmul.f32 %v1800_v10, %v2344_v63  ;;  %v1113_v58 = vpop.xlane.xlu0 %1112  ;;  %1691 = vmatmul.msk.bf16.vlgmr.msrb.gmra.mxu1 %vm889_vm2, %v1134_v35 }
 0x2e0   :  { %1801 = vrcp.f32 %v1113_v58 }
 0x2e1   :  { %v1136_v41 = vpack.c.bf16 %v1128_v20, %v1128_v20  ;;  %1692 = vmatmul.msk.bf16.vlgmr.msrb.gmra.mxu2 %vm889_vm2, %v1135_v38 }
 0x2e3   :  { %1693 = vmatmul.msk.bf16.vlgmr.msrb.gmra.mxu3 %vm889_vm2, %v1136_v41 }
 0x2e6   :  { %v1802_v42 = vpop.eup %1801 }
 0x2e7   :  { %v1129_v40 = vmul.f32 %v1802_v42, %v2350_v37 }
 0x2e9   :  { %v1137_v45 = vpack.c.bf16 %v1129_v40, %v1129_v40 }
 0x2eb   :  { %1694 = vmatmul.msk.bf16.vlgmr.msra.gmra.mxu0 %vm889_vm2, %v1137_v45 }
 0x348   :  { %v1154_v28 = vpop.f32.mrf.mxu1 }
 0x349   :  { %v1293_v46 = vrot.slane %v1154_v28, 4 }
 0x350   :  { %v1156_v49 = vpop.f32.mrf.mxu1 }
 0x352   :  { %v1192_v47 = vpop.f32.mrf.mxu3 }
 0x353   :  { %v1173_v63 = vpop.f32.mrf.mxu2  ;;  %v1291_v50 = vrot.slane %v1192_v47, 4  ;;  %v1294_v44 = vsel %vm189_vm1, %v1192_v47, %v1293_v46 }
 0x354   :  { %v1305_v57 = vrot.slane %v1173_v63, 4  ;;  %v1302_v1 = vperm.slane %v1294_v44, %v2018_v19  ;;  %v1211_v56 = vpop.f32.mrf.mxu0 }
 0x355   :  { %v1292_v2 = vsel %vm189_vm1, %v1291_v50, %v1154_v28  ;;  %v1303_v4 = vrot.slane %v1211_v56, 4 }
 0x356   :  { %v1298_v37 = vperm.slane %v1292_v2, %v2018_v19  ;;  %v1329_v3 = vrot.slane %v1302_v1, 4  ;;  %v1306_v6 = vsel %vm189_vm1, %v1211_v56, %v1305_v57 }
 0x357   :  { %v1304_v32 = vsel %vm189_vm1, %v1303_v4, %v1173_v63  ;;  %v1314_v14 = vperm.slane %v1306_v6, %v2018_v19 }
 0x358   :  { %v1317_v15 = vrot.slane %v1298_v37, 4  ;;  %v1310_v16 = vperm.slane %v1304_v32, %v2018_v19 }
 0x359   :  { %v1327_v17 = vrot.slane %v1314_v14, 4  ;;  %v1330_v8 = vsel %vm189_vm1, %v1314_v14, %v1329_v3 }
 0x35a   :  { %v1315_v13 = vrot.slane %v1310_v16, 4  ;;  %v1318_v34 = vsel %vm189_vm1, %v1310_v16, %v1317_v15  ;;  %v1338_v43 = vperm.slane %v1330_v8, %v2028_v39  ;;  %v1194_v12 = vpop.f32.mrf.mxu3 }
 0x35b   :  { %v1326_v5 = vperm.slane %v1318_v34, %v2028_v39  ;;  %v1328_v51 = vsel %vm189_vm1, %v1327_v17, %v1302_v1  ;;  %v1175_v18 = vpop.f32.mrf.mxu2 }
 0x35c   :  { %v1316_v21 = vsel %vm189_vm1, %v1315_v13, %v1298_v37  ;;  %v1334_v22 = vperm.slane %v1328_v51, %v2028_v39  ;;  %v1345_v24 = vrot.slane %v1338_v43, 4  ;;  %v1213_v48 = vpop.f32.mrf.mxu0  ;;  %v1230_v29 = vpop.f32.mrf.mxu1 }
 0x35d   :  { %v1322_v0 = vperm.slane %v1316_v21, %v2028_v39  ;;  %v1341_v60 = vrot.slane %v1326_v5, 4  ;;  %v1349_v62 = vrot.slane %v1230_v29, 4 }
 0x35e   :  { %v1343_v36 = vrot.slane %v1334_v22, 4  ;;  %v1346_v59 = vsel %vm189_vm1, 0.0, %v1345_v24  ;;  %v1414_v33 = vsel %vm189_vm1, %v1345_v24, %v1334_v22 }
 0x35f   :  { %v1339_v25 = vrot.slane %v1322_v0, 4  ;;  %v1342_v26 = vsel %vm189_vm1, 0.0, %v1341_v60  ;;  %v1419_v11 = vrot.slane %v1346_v59, 4  ;;  %v1403_v61 = vsel %vm189_vm1, %v1341_v60, %v1322_v0 }
 0x360   :  { %v1344_v27 = vsel %vm189_vm1, 0.0, %v1343_v36  ;;  %v1408_v30 = vrot.slane %v1342_v26, 4  ;;  %v1407_v9 = vperm.slane %v1403_v61, %v2018_v19  ;;  %v1418_v10 = vperm.slane %v1414_v33, %v2018_v19 }
 0x361   :  { %v1340_v31 = vsel %vm189_vm1, 0.0, %v1339_v25  ;;  %v1420_v7 = vsel %vm189_vm1, %v1419_v11, %v1344_v27 }
 0x362   :  { %v1409_v52 = vsel %vm189_vm1, %v1408_v30, %v1340_v31  ;;  %v1424_v54 = vperm.slane %v1420_v7, %v2018_v19  ;;  %v1427_v28 = vrot.slane %v1407_v9, 4  ;;  %v1439_v44 = vrot.slane %v1418_v10, 4 }
 0x363   :  { %v1413_v53 = vperm.slane %v1409_v52, %v2018_v19 }
 0x364   :  { %v1249_v23 = vpop.f32.mrf.mxu2  ;;  %v1232_v55 = vpop.f32.mrf.mxu1  ;;  %v1437_v20 = vrot.slane %v1424_v54, 4  ;;  %v1440_v5 = vsel %vm189_vm1, %v1424_v54, %v1439_v44 }
 0x365   :  { %v1425_v35 = vrot.slane %v1413_v53, 4  ;;  %v1361_v58 = vrot.slane %v1249_v23, 4  ;;  %v1428_v17 = vsel %vm189_vm1, %v1413_v53, %v1427_v28  ;;  %v1448_v27 = vperm.slane %v1440_v5, %v2028_v39 }
 0x366   :  { %v1268_v38 = vpop.f32.mrf.mxu3  ;;  %v1438_v50 = vsel %vm189_vm1, %v1437_v20, %v1418_v10  ;;  %v1436_v26 = vperm.slane %v1428_v17, %v2028_v39  ;;  %v1707_v17 = vld [vmem:[#allocation7] sm:$0xff] }
 0x367   :  { %v1347_v41 = vrot.slane %v1268_v38, 4  ;;  %v1350_v42 = vsel %vm189_vm1, %v1268_v38, %v1349_v62  ;;  %v1426_v49 = vsel %vm189_vm1, %v1425_v35, %v1407_v9  ;;  %v2497_v37 = vperm.slane %v1438_v50, %v2028_v39 }
 0x368   :  { %v1358_v40 = vperm.slane %v1350_v42, %v2018_v19  ;;  %v1287_v45 = vpop.f32.mrf.mxu0  ;;  %v2494_v4 = vperm.slane %v1426_v49, %v2028_v39  ;;  %v1453_v38 = vrot.slane %v1448_v27, 4 }
 0x369   :  { %v1348_v46 = vsel %vm189_vm1, %v1347_v41, %v1230_v29  ;;  %v1359_v47 = vrot.slane %v1287_v45, 4  ;;  %v1362_v63 = vsel %vm189_vm1, %v1287_v45, %v1361_v58  ;;  %v1449_v8 = vrot.slane %v2497_v37, 4 }
 0x36a   :  { %v1354_v57 = vperm.slane %v1348_v46, %v2018_v19  ;;  %v1385_v1 = vrot.slane %v1358_v40, 4  ;;  %v1370_v56 = vperm.slane %v1362_v63, %v2018_v19  ;;  %v1455_v58 = vrot.slane %v1436_v26, 4 }
 0x36b   :  { %v1360_v2 = vsel %vm189_vm1, %v1359_v47, %v1249_v23  ;;  %v2511_v22 = vsel %vm189_vm1, %v1449_v8, %v2494_v4  ;;  %v1451_v63 = vrot.slane %v2494_v4, 4 }
 0x36c   :  { %v1373_v3 = vrot.slane %v1354_v57, 4  ;;  %v1366_v6 = vperm.slane %v1360_v2, %v2018_v19  ;;  %v1383_v32 = vrot.slane %v1370_v56, 4  ;;  %v1386_v14 = vsel %vm189_vm1, %v1370_v56, %v1385_v1  ;;  %v1251_v15 = vpop.f32.mrf.mxu2 }
 0x36d   :  { %v1394_v16 = vperm.slane %v1386_v14, %v2028_v39  ;;  %v1456_v56 = vsel %vm189_vm1, %v1448_v27, %v1455_v58  ;;  %v1452_v4 = vsel %vm189_vm1, %v2497_v37, %v1451_v63 }
 0x36e   :  { %v1371_v13 = vrot.slane %v1366_v6, 4  ;;  %v1374_v34 = vsel %vm189_vm1, %v1366_v6, %v1373_v3  ;;  %v1384_v43 = vsel %vm189_vm1, %v1383_v32, %v1358_v40  ;;  %v1270_v12 = vpop.f32.mrf.mxu3 }
 0x36f   :  { %v1382_v51 = vperm.slane %v1374_v34, %v2028_v39  ;;  %v1390_v18 = vperm.slane %v1384_v43, %v2028_v39  ;;  %v1401_v21 = vrot.slane %v1394_v16, 4  ;;  %v1708_v16 = vld [vmem:[#allocation7 + $0x8] sm:$0xff] }
 0x370   :  { %v1372_v24 = vsel %vm189_vm1, %v1371_v13, %v1354_v57  ;;  %v1289_v48 = vpop.f32.mrf.mxu0  ;;  %v1454_v57 = vsel %vm189_vm1, %v1453_v38, %v1436_v26  ;;  %1573 = vmatpush.bf16.msra.mxu1 %v1708_v16 }
 0x371   :  { %v1378_v29 = vperm.slane %v1372_v24, %v2028_v39  ;;  %v1397_v0 = vrot.slane %v1382_v51, 4  ;;  %v1399_v60 = vrot.slane %v1390_v18, 4  ;;  %v1402_v36 = vsel %vm189_vm1, 0.0, %v1401_v21 }
 0x372   :  { %v1468_v59 = vsel %vm189_vm1, %v1401_v21, %v1390_v18  ;;  %v1473_v25 = vrot.slane %v1402_v36, 4 }
 0x373   :  { %v1395_v30 = vrot.slane %v1378_v29, 4  ;;  %v1398_v11 = vsel %vm189_vm1, 0.0, %v1397_v0  ;;  %v1400_v61 = vsel %vm189_vm1, 0.0, %v1399_v60  ;;  %v1457_v31 = vsel %vm189_vm1, %v1397_v0, %v1378_v29 }
 0x374   :  { %v1462_v7 = vrot.slane %v1398_v11, 4  ;;  %v1472_v52 = vperm.slane %v1468_v59, %v2018_v19  ;;  %v1474_v33 = vsel %vm189_vm1, %v1473_v25, %v1400_v61  ;;  %v1461_v54 = vperm.slane %v1457_v31, %v2018_v19  ;;  %1574 = vmatpush.bf16.msra.mxu1 %v1707_v17  ;;  %v1768_v59 = vld [vmem:[%s2574_s4] ss:$0 sm:$0xff] }
 0x375   :  { %v1478_v53 = vperm.slane %v1474_v33, %v2018_v19  ;;  %v1396_v23 = vsel %vm189_vm1, 0.0, %v1395_v30  ;;  %v1931_v61 = vmov 32.0  }
 0x376   :  { %v1493_v55 = vrot.slane %v1472_v52, 4  ;;  %v1463_v9 = vsel %vm189_vm1, %v1462_v7, %v1396_v23  ;;  %v1481_v62 = vrot.slane %v1461_v54, 4  ;;  %1803 = vrcp.f32 %v1931_v61 }
 0x377   :  { %v1467_v35 = vperm.slane %v1463_v9, %v2018_v19  ;;  %v1491_v10 = vrot.slane %v1478_v53, 4 }
 0x378   :  { %v1494_v20 = vsel %vm189_vm1, %v1478_v53, %v1493_v55 }
 0x379   :  { %v1482_v41 = vsel %vm189_vm1, %v1467_v35, %v1481_v62  ;;  %v1502_v42 = vperm.slane %v1494_v20, %v2028_v39  ;;  %v1479_v40 = vrot.slane %v1467_v35, 4  ;;  %v1492_v45 = vsel %vm189_vm1, %v1491_v10, %v1472_v52 }
 0x37a   :  { %v1490_v28 = vperm.slane %v1482_v41, %v2028_v39  ;;  %v1498_v49 = vperm.slane %v1492_v45, %v2028_v39 }
 0x37b   :  { %v1507_v46 = vrot.slane %v1502_v42, 4  ;;  %v1480_v47 = vsel %vm189_vm1, %v1479_v40, %v1461_v54 }
 0x37c   :  { %v1509_v19 = vrot.slane %v1490_v28, 4  ;;  %v1486_v50 = vperm.slane %v1480_v47, %v2028_v39  ;;  %v1503_v44 = vrot.slane %v1498_v49, 4  ;;  %v1804_v31 = vpop.eup %1803 }
 0x37d   :  { %v1508_v1 = vsel %vm189_vm1, %v1507_v46, %v1490_v28  ;;  %v1588_v7 = vmul.f32 32.0, %v1804_v31  ;;  %vm1592_vm6 = vweird.f32 %v1804_v31 }
 0x37e   :  { %v1757_v2 = vpack.i.bf16 %v1508_v1, %v1454_v57  ;;  %v1510_v3 = vsel %vm189_vm1, %v1502_v42, %v1509_v19  ;;  %v1505_v6 = vrot.slane %v1486_v50, 4  ;;  %v1504_v32 = vsel %vm189_vm1, %v1503_v44, %v1486_v50 }
 0x37f   :  { %v1762_v14 = vpack.i.bf16 %v1510_v3, %v1456_v56  ;;  %v1589_v52 = vsub.f32 1.0, %v1588_v7 }
 0x380   :  { %1758 = vrot.lane.b32.xlu1 %v1757_v2, %s1928_s26  ;;  %v1506_v39 = vsel %vm189_vm1, %v1498_v49, %v1505_v6  ;;  %v1769_v2 = vld [vmem:[%s2575_s5] ss:$0 sm:$0xff] }
 0x381   :  { %1763 = vrot.lane.b32.xlu0 %v1762_v14, %s1929_s27  ;;  %v1752_v15 = vpack.i.bf16 %v1506_v39, %v1452_v4  ;;  %v1590_v33 = vmul.f32 %v1804_v31, %v1589_v52 }
 0x383   :  { %1753 = vrot.lane.b32.xlu2 %v1752_v15, %s1930_s28  ;;  %v1591_v54 = vadd.f32 %v1804_v31, %v1590_v33 }
 0x385   :  { %v1593_v53 = vsel %vm1592_vm6, %v1804_v31, %v1591_v54 }
 0x3dd   :  { %v1754_v8 = vpop.permute.xlu2 %1753 }
 0x3de   :  { %v1756_v13 = vunpack.i.h.bf16 %v1754_v8  ;;  %v1755_v34 = vunpack.i.l.bf16 %v1754_v8 }
 0x3e0   :  { %v1535_v51 = vsel %vm889_vm2, %v2511_v22, %v1755_v34  ;;  %v1536_v18 = vsel %vm889_vm2, %v1504_v32, %v1756_v13  ;;  %v1770_v32 = vld [vmem:[%s2576_s6] ss:$0 sm:$0xff]  ;;  %s1933_s6 = smov 128  }
 0x3f2   :  { %v1759_v43 = vpop.permute.xlu1 %1758 }
 0x3f3   :  { %v1761_v12 = vunpack.i.h.bf16 %v1759_v43  ;;  %v1760_v5 = vunpack.i.l.bf16 %v1759_v43  ;;  %v1764_v37 = vpop.permute.xlu0 %1763 }
 0x3f4   :  { %v1766_v21 = vunpack.i.h.bf16 %v1764_v37  ;;  %v1765_v24 = vunpack.i.l.bf16 %v1764_v37 }
 0x3f5   :  { %v1538_v48 = vsel %vm1537_vm4, %v1535_v51, %v1760_v5  ;;  %v1539_v29 = vsel %vm1537_vm4, %v1536_v18, %v1761_v12 }
 0x3f6   :  { %v1541_v0 = vsel %vm1540_vm5, %v1538_v48, %v1765_v24  ;;  %v1542_v60 = vsel %vm1540_vm5, %v1539_v29, %v1766_v21 }
 0x3f7   :  { %v1543_v36 = vpack.c.bf16 %v1542_v60, %v1541_v0 }
 0x3f9   :  { %1703 = vmatmul.msk.bf16.vlgmr.msra.gmra.mxu1 %vm102_vm0, %v1543_v36 }
 0x476   :  { %v1576_v25 = vpop.f32.mrf.mxu1 }
 0x477   :  { %v1577_v26 = vadd.f32 %v1768_v59, %v1576_v25 }
 0x479   :  { %v1581_v27 = vsel %vm102_vm0, %v1577_v26, 0.0 }
 0x47a   :  { %1582 = vadd.xlane.f32.xlu2 %v1581_v27 }
 0x47e   :  { %v1578_v22 = vpop.f32.mrf.mxu1 }
 0x47f   :  { %v1579_v30 = vadd.f32 %v1768_v59, %v1578_v22 }
 0x481   :  { %v1584_v11 = vsel %vm102_vm0, %v1579_v30, 0.0 }
 0x482   :  { %1585 = vadd.xlane.f32.xlu0 %v1584_v11 }
 0x4ed   :  { %v1583_v23 = vpop.xlane.xlu2 %1582 }
 0x4ee   :  { %v1594_v55 = vmul.f32 %v1593_v53, %v1583_v23 }
 0x4f0   :  { %v1596_v9 = vsub.f32 %v1577_v26, %v1594_v55 }
 0x4f2   :  { %v1598_v62 = vmul.f32 %v1596_v9, %v1596_v9 }
 0x4f4   :  { %v1600_v35 = vsel %vm102_vm0, %v1598_v62, 0.0 }
 0x4f5   :  { %v1586_v10 = vpop.xlane.xlu0 %1585  ;;  %1601 = vadd.xlane.f32.xlu1 %v1600_v35 }
 0x4f6   :  { %v1595_v38 = vmul.f32 %v1593_v53, %v1586_v10 }
 0x4f8   :  { %v1597_v20 = vsub.f32 %v1579_v30, %v1595_v38 }
 0x4fa   :  { %v1599_v58 = vmul.f32 %v1597_v20, %v1597_v20 }
 0x4fc   :  { %v1603_v41 = vsel %vm102_vm0, %v1599_v58, 0.0 }
 0x4fd   :  { %1604 = vadd.xlane.f32.xlu2 %v1603_v41 }
 0x568   :  { %v1602_v42 = vpop.xlane.xlu1 %1601 }
 0x569   :  { %v1606_v40 = vmul.f32 %v1602_v42, %v1593_v53 }
 0x56b   :  { %v1608_v45 = vadd.f32 1e-05, %v1606_v40 }
 0x56d   :  { %1805 = vrsqrt.f32 %v1608_v45  ;;  %vm1616_vm8 = vweird.f32 %v1608_v45 }
 0x570   :  { %v1605_v28 = vpop.xlane.xlu2 %1604 }
 0x571   :  { %v1607_v49 = vmul.f32 %v1605_v28, %v1593_v53 }
 0x573   :  { %v1806_v46 = vpop.eup %1805  ;;  %v1609_v47 = vadd.f32 1e-05, %v1607_v49 }
 0x574   :  { %v1611_v19 = vmul.f32 %v1806_v46, %v1608_v45  ;;  %vm1617_vm7 = vweird.f32 %v1806_v46 }
 0x575   :  { %1807 = vrsqrt.f32 %v1609_v47  ;;  %vm1618_vm9 = vmor %vm1616_vm8, %vm1617_vm7  ;;  %vm1626_vm11 = vweird.f32 %v1609_v47 }
 0x576   :  { %v1612_v63 = vmul.f32 %v1806_v46, %v1611_v19 }
 0x578   :  { %v1613_v50 = vmul.f32 0.5, %v1612_v63 }
 0x57a   :  { %v1614_v44 = vsub.f32 1.5, %v1613_v50 }
 0x57b   :  { %v1808_v57 = vpop.eup %1807 }
 0x57c   :  { %v1615_v1 = vmul.f32 %v1806_v46, %v1614_v44  ;;  %v1621_v56 = vmul.f32 %v1808_v57, %v1609_v47  ;;  %vm1627_vm10 = vweird.f32 %v1808_v57 }
 0x57d   :  { %vm1628_vm12 = vmor %vm1626_vm11, %vm1627_vm10 }
 0x57e   :  { %v1619_v3 = vsel %vm1618_vm9, %v1806_v46, %v1615_v1  ;;  %v1622_v6 = vmul.f32 %v1808_v57, %v1621_v56 }
 0x57f   :  { %v1630_v14 = vmul.f32 %v1619_v3, %v1596_v9 }
 0x580   :  { %v1623_v4 = vmul.f32 0.5, %v1622_v6 }
 0x581   :  { %v1636_v39 = vmul.f32 %v1769_v2, %v1630_v14 }
 0x582   :  { %v1624_v15 = vsub.f32 1.5, %v1623_v4 }
 0x583   :  { %v1642_v16 = vadd.f32 %v1770_v32, %v1636_v39 }
 0x584   :  { %v1625_v17 = vmul.f32 %v1808_v57, %v1624_v15 }
 0x585   :  { %1644 = vst.msk [vmem:[#allocation8] sm:$0xff] %vm102_vm0, %v1642_v16 }
 0x586   :  { %v1629_v8 = vsel %vm1628_vm12, %v1808_v57, %v1625_v17 }
 0x587   :  { %v1631_v13 = vmul.f32 %v1629_v8, %v1597_v20 }
 0x589   :  { %v1637_v34 = vmul.f32 %v1769_v2, %v1631_v13 }
 0x58b   :  { %v1643_v43 = vadd.f32 %v1770_v32, %v1637_v34 }
 0x58d   :  { %1645 = vst.msk [vmem:[#allocation8 + $0x8] sm:$0xff] %vm102_vm0, %v1643_v43 }
 0x58e   :  { %1658 = dma.vmem_to_hbm [thread:$0]  %s1651_s14, 256, %s1653_s12, [#allocation4], %s1933_s6, %s1933_s6, %s1930_s28  }
 0x58f   :  { %1909 = dma.done.wait [#allocation4], 256  }
 0x590   :  { %1910 = vsyncadd [#allocation4], 4294967040 }
 0x591   :  { %1663 = vsyncpa [#allocation3], 1 }
 0x592   :  { %1664 = vsyncpa [#allocation6], 1 }
 0x593   :  { %1665 = vsyncpa [#allocation4], 1 }

// kernel: tpu_custom_call.1
= control target key start
LH: loop header
LB: loop body
LE: loop exit
PB: predicated region body
PF: predicated region fallthrough
CT: control target
= control target key end

     0   :  { %12 = vsyncpa [#allocation3], 0  ;;  %s1161_s0 = inlined_call_operand.hbm [shape: bf16[2,8,32], index: 0, kind: input, shape index: {}]   ;;  %s1162_s1 = inlined_call_operand.hbm [shape: bf16[32,96], index: 1, kind: input, shape index: {}]   ;;  %s1163_s2 = inlined_call_operand.vmem [shape: f32[1,96], index: 2, kind: input, shape index: {}]   ;;  %s1164_s3 = inlined_call_operand.hbm [shape: bf16[32,32], index: 3, kind: input, shape index: {}]   ;;  %s1165_s4 = inlined_call_operand.vmem [shape: f32[1,32], index: 4, kind: input, shape index: {}]   ;;  %s1166_s5 = inlined_call_operand.vmem [shape: f32[1,32], index: 5, kind: input, shape index: {}]   ;;  %s1167_s6 = inlined_call_operand.vmem [shape: f32[1,32], index: 6, kind: input, shape index: {}]   ;;  %s1168_s7 = inlined_call_operand.hbm [shape: f32[2,8,32], index: 7, kind: output, shape index: {}]  }
   0x1   :  { %13 = vsyncpa [#allocation6], 0 }
   0x2   :  { %14 = vsyncpa [#allocation4], 0  ;;  %s32_s26 = sshll.u32 %s1162_s1, 4  ;;  %s966_s27 = smov [#allocation5]   ;;  %s33_s26 = int_to_ptr.hbm [resolvable:$true] %s32_s26 }
   0x3   :  { %s34_s28 = sshll.u32 %s966_s27, 4  ;;  %s19_s8 = sshll.u32 %s1161_s0, 4  ;;  %s35_s28 = int_to_ptr.vmem [resolvable:$true] %s34_s28  ;;  %s20_s8 = int_to_ptr.hbm [resolvable:$true] %s19_s8 }
   0x4   :  { %s967_s9 = smov 64   ;;  %s968_s10 = smov 4  }
   0x5   :  { %40 = dma.hbm_to_vmem [thread:$0]  %s33_s26, 256, %s35_s28, [#allocation6], %s967_s9, %s967_s9, %s968_s10  }
   0x6   :  { %s969_s11 = smov [#allocation2]   ;;  %s47_s1 = sshll.u32 %s1164_s3, 4  ;;  %s48_s1 = int_to_ptr.hbm [resolvable:$true] %s47_s1 }
   0x7   :  { %s21_s12 = sshll.u32 %s969_s11, 4  ;;  %s970_s15 = smov [#allocation7]   ;;  %s22_s12 = int_to_ptr.vmem [resolvable:$true] %s21_s12 }
   0x8   :  { %27 = dma.hbm_to_vmem [thread:$0]  %s20_s8, 128, %s22_s12, [#allocation3], %s967_s9, %s967_s9, %s968_s10  }
   0x9   :  { %s49_s16 = sshll.u32 %s970_s15, 4  ;;  %s50_s16 = int_to_ptr.vmem [resolvable:$true] %s49_s16 }
   0xa   :  { %55 = dma.hbm_to_vmem [thread:$0]  %s48_s1, 256, %s50_s16, [#allocation6], %s967_s9, %s967_s9, %s968_s10  }
   0xb   :  { %960 = dma.done.wait [#allocation3], 128  }
   0xc   :  { %961 = vsyncadd [#allocation3], 4294967168 }
   0xd   :  { %962 = dma.done.wait [#allocation6], 512  }
   0xe   :  { %963 = vsyncadd [#allocation6], 4294966784  ;;  %v802_v0 = vld [vmem:[#allocation5 + $0x8] sm:$0xff]  ;;  %v801_v1 = vld [vmem:[#allocation5] sm:$0xff]  ;;  %vm102_vm0 = vcmask 261120   ;;  %s971_s17 = smov 96  }
   0xf   :  { %112 = vmatpush.bf16.msra.mxu0 %v802_v0  ;;  %v800_v2 = vld [vmem:[#allocation2] sm:$0xff]  ;;  %s972_s18 = smov 88   ;;  %s974_s19 = smov 56   ;;  %vm135_vm1 = vcmask 64512   ;;  %vm208_vm2 = vcmask 1043456  }
  0x10   :  { %v822_v3 = vld [vmem:[%s1163_s2] ss:$0 sm:$0xff]  ;;  %s973_s2 = smov 120   ;;  %s975_s20 = smov 80  }
  0x11   :  { %s976_s21 = smov 112   ;;  %s977_s22 = smov 48  }
  0x12   :  { %s978_s23 = smov 72   ;;  %s979_s24 = smov 104  }
  0x13   :  { %113 = vmatpush.bf16.msra.mxu0 %v801_v1  ;;  %s980_s25 = smov 40   ;;  %s753_s11 = sshll.u32 %s1168_s7, 4  ;;  %s754_s11 = int_to_ptr.hbm [resolvable:$true] %s753_s11 }
  0x14   :  { %s984_s12 = smov 8  }
  0x16   :  { %779 = vmatmul.msk.bf16.vlgmr.msra.gmra.mxu0 %vm102_vm0, %v800_v2 }
  0x93   :  { %v115_v4 = vpop.f32.mrf.mxu0 }
  0x94   :  { %v116_v5 = vadd.f32 %v822_v3, %v115_v4 }
  0x96   :  { %v128_v6 = vpack.c.bf16 %v116_v5, %v116_v5  ;;  %v124_v7 = vmul.f32 0.35355338, %v116_v5 }
  0x98   :  { %v131_v8 = vunpack.c.l.b16 %v128_v6  ;;  %v126_v10 = vpack.c.bf16 %v124_v7, %v124_v7 }
  0x9a   :  { %v1044_v9 = vpack.c.b16 %v131_v8, %v131_v8  ;;  %v248_v15 = vunpack.c.l.b16 %v126_v10  ;;  %v121_v8 = vld [vmem:[#allocation7 + $0x4] sm:$0xf] }
  0x9b   :  { %v117_v11 = vpop.f32.mrf.mxu0 }
  0x9c   :  { %v118_v12 = vadd.f32 %v822_v3, %v117_v11  ;;  %133 = vrot.lane.b32.xlu1 %v1044_v9, %s971_s17  ;;  %252 = vrot.lane.b32.xlu0 %v1044_v9, %s972_s18  ;;  %v1050_v19 = vpack.c.b16 %v248_v15, %v248_v15 }
  0x9e   :  { %v125_v13 = vmul.f32 0.35355338, %v118_v12  ;;  %v129_v14 = vpack.c.bf16 %v118_v12, %v118_v12 }
  0xa0   :  { %v156_v16 = vunpack.c.l.b16 %v129_v14  ;;  %v127_v17 = vpack.c.bf16 %v125_v13, %v125_v13 }
  0xa2   :  { %v1048_v18 = vpack.c.b16 %v156_v16, %v156_v16  ;;  %v274_v20 = vunpack.c.l.b16 %v127_v17 }
  0xa4   :  { %278 = vrot.lane.b32.xlu2 %v1048_v18, %s972_s18  ;;  %158 = vrot.lane.b32.xlu1 %v1048_v18, %s971_s17  ;;  %v1055_v21 = vpack.c.b16 %v274_v20, %v274_v20 }
  0xa5   :  { %250 = vrot.lane.b32.xlu0 %v1050_v19, %s973_s2 }
  0xac   :  { %276 = vrot.lane.b32.xlu2 %v1055_v21, %s973_s2 }
  0xb4   :  { %323 = vrot.lane.b32.xlu2 %v1044_v9, %s974_s19 }
  0xfe   :  { %v279_v22 = vpop.permute.xlu2 %278 }
  0xff   :  { %v284_v28 = vsel %vm135_vm1, %v279_v22, 0 }
 0x106   :  { %v277_v23 = vpop.permute.xlu2 %276 }
 0x10e   :  { %v134_v24 = vpop.permute.xlu1 %133  ;;  %v253_v25 = vpop.permute.xlu0 %252 }
 0x10f   :  { %v140_v26 = vsel %vm135_vm1, %v134_v24, 0  ;;  %v258_v27 = vsel %vm135_vm1, %v253_v25, 0  ;;  %v324_v29 = vpop.permute.xlu2 %323 }
 0x110   :  { %149 = vmatpush.bf16.xpose.msra.mxu1 %v140_v26  ;;  %267 = vmatpush.bf16.xpose.msrb.mxu0 %v258_v27  ;;  %v329_v33 = vsel %vm208_vm2, %v324_v29, 0 }
 0x116   :  { %v159_v30 = vpop.permute.xlu1 %158 }
 0x117   :  { %v251_v31 = vpop.permute.xlu0 %250  ;;  %780 = vmatmul.msk.bf16.vlgmr.msra.gmra.mxu1 %vm135_vm1, %v126_v10  ;;  %v164_v32 = vsel %vm135_vm1, %v159_v30, 0  ;;  %v370_v10 = vsel %vm208_vm2, %v121_v8, 0 }
 0x118   :  { %293 = vmatpush.bf16.xpose.msrb.mxu1 %v284_v28  ;;  %784 = vmatmul.msk.bf16.vlgmr.msrb.gmra.mxu0 %vm135_vm1, %v251_v31 }
 0x119   :  { %173 = vmatpush.bf16.xpose.msra.mxu2 %v164_v32  ;;  %379 = vmatpush.bf16.msra.mxu0 %v370_v10 }
 0x120   :  { %781 = vmatmul.msk.bf16.vlgmr.msra.gmra.mxu2 %vm135_vm1, %v127_v17 }
 0x121   :  { %338 = vmatpush.bf16.msrb.mxu2 %v329_v33 }
 0x127   :  { %785 = vmatmul.msk.bf16.vlgmr.msrb.gmra.mxu1 %vm135_vm1, %v277_v23 }
 0x194   :  { %v151_v34 = vpop.f32.mrf.mxu1 }
 0x195   :  { %v269_v35 = vpop.f32.mrf.mxu0  ;;  %v179_v36 = vsel %vm135_vm1, %v151_v34, -inf }
 0x196   :  { %v299_v37 = vsel %vm135_vm1, %v269_v35, -inf  ;;  %180 = vmax.xlane.f32.xlu2 %v179_v36 }
 0x197   :  { %300 = vmax.xlane.f32.xlu0 %v299_v37 }
 0x19c   :  { %v153_v38 = vpop.f32.mrf.mxu1 }
 0x19d   :  { %v271_v39 = vpop.f32.mrf.mxu0 }
 0x1a3   :  { %v175_v40 = vpop.f32.mrf.mxu2 }
 0x1a4   :  { %v182_v41 = vsel %vm135_vm1, %v175_v40, -inf  ;;  %v295_v42 = vpop.f32.mrf.mxu1 }
 0x1a5   :  { %183 = vmax.xlane.f32.xlu2 %v182_v41  ;;  %v302_v44 = vsel %vm135_vm1, %v295_v42, -inf }
 0x1ab   :  { %v177_v43 = vpop.f32.mrf.mxu2  ;;  %408 = vrot.lane.b32.xlu0 %v1044_v9, %s975_s20 }
 0x1ac   :  { %v297_v45 = vpop.f32.mrf.mxu1 }
 0x1ad   :  { %303 = vmax.xlane.f32.xlu2 %v302_v44 }
 0x1c5   :  { %203 = vrot.lane.b32.xlu2 %v1044_v9, %s967_s9 }
 0x1cd   :  { %225 = vrot.lane.b32.xlu2 %v1048_v18, %s967_s9 }
 0x209   :  { %v181_v46 = vpop.xlane.xlu2 %180 }
 0x20a   :  { %v301_v47 = vpop.xlane.xlu0 %300  ;;  %v185_v48 = vsub.f32 %v151_v34, %v181_v46 }
 0x20b   :  { %v305_v49 = vsub.f32 %v269_v35, %v301_v47  ;;  %v120_v47 = vld [vmem:[#allocation7] sm:$0xf] }
 0x20c   :  { %v187_v50 = vmul.f32 1.442695, %v185_v48  ;;  %v390_v48 = vsel %vm208_vm2, %v120_v47, 0 }
 0x20d   :  { %v307_v51 = vmul.f32 1.442695, %v305_v49  ;;  %399 = vmatpush.bf16.msra.mxu1 %v390_v48 }
 0x20e   :  { %826 = vpow2.f32 %v187_v50 }
 0x20f   :  { %828 = vpow2.f32 %v307_v51 }
 0x214   :  { %v827_v52 = vpop.eup %826 }
 0x215   :  { %v829_v53 = vpop.eup %828  ;;  %v191_v54 = vsel %vm135_vm1, %v827_v52, 0.0 }
 0x216   :  { %v311_v55 = vsel %vm135_vm1, %v829_v53, 0.0  ;;  %192 = vadd.xlane.f32.xlu0 %v191_v54 }
 0x217   :  { %312 = vadd.xlane.f32.xlu1 %v311_v55 }
 0x218   :  { %v184_v56 = vpop.xlane.xlu2 %183 }
 0x219   :  { %v186_v4 = vsub.f32 %v175_v40, %v184_v56 }
 0x21b   :  { %v189_v5 = vmul.f32 1.442695, %v186_v4 }
 0x21d   :  { %v409_v57 = vpop.permute.xlu0 %408 }
 0x21e   :  { %v414_v58 = vsel %vm135_vm1, %v409_v57, 0 }
 0x21f   :  { %423 = vmatpush.bf16.xpose.msra.mxu2 %v414_v58 }
 0x220   :  { %v304_v59 = vpop.xlane.xlu2 %303 }
 0x221   :  { %v306_v60 = vsub.f32 %v295_v42, %v304_v59 }
 0x223   :  { %v309_v61 = vmul.f32 1.442695, %v306_v60 }
 0x225   :  { %830 = vpow2.f32 %v309_v61 }
 0x226   :  { %832 = vpow2.f32 %v189_v5 }
 0x228   :  { %v204_v62 = vpop.permute.xlu2 %203 }
 0x229   :  { %v210_v63 = vsel %vm208_vm2, %v204_v62, 0 }
 0x22a   :  { %219 = vmatpush.bf16.msra.mxu3 %v210_v63  ;;  %344 = vrot.lane.b32.xlu0 %v1048_v18, %s974_s19 }
 0x22b   :  { %v831_v0 = vpop.eup %830 }
 0x22c   :  { %v314_v1 = vsel %vm135_vm1, %v831_v0, 0.0  ;;  %v833_v6 = vpop.eup %832 }
 0x22d   :  { %315 = vadd.xlane.f32.xlu2 %v314_v1  ;;  %v194_v7 = vsel %vm135_vm1, %v833_v6, 0.0 }
 0x230   :  { %v226_v2 = vpop.permute.xlu2 %225  ;;  %406 = vrot.lane.b32.xlu1 %v1050_v19, %s976_s21 }
 0x231   :  { %v231_v3 = vsel %vm208_vm2, %v226_v2, 0 }
 0x232   :  { %240 = vmatpush.bf16.msrb.mxu3 %v231_v3  ;;  %429 = vrot.lane.b32.xlu0 %v1055_v21, %s976_s21 }
 0x245   :  { %476 = vrot.lane.b32.xlu2 %v1044_v9, %s977_s22 }
 0x24d   :  { %543 = vrot.lane.b32.xlu2 %v1044_v9, %s978_s23 }
 0x255   :  { %566 = vrot.lane.b32.xlu2 %v1048_v18, %s978_s23 }
 0x25a   :  { %195 = vadd.xlane.f32.xlu1 %v194_v7 }
 0x273   :  { %431 = vrot.lane.b32.xlu1 %v1048_v18, %s975_s20 }
 0x289   :  { %v193_v11 = vpop.xlane.xlu0 %192 }
 0x28a   :  { %v313_v12 = vpop.xlane.xlu1 %312  ;;  %834 = vrcp.f32 %v193_v11 }
 0x28b   :  { %836 = vrcp.f32 %v313_v12 }
 0x290   :  { %v835_v13 = vpop.eup %834 }
 0x291   :  { %v837_v14 = vpop.eup %836  ;;  %v199_v15 = vmul.f32 %v835_v13, %v827_v52 }
 0x292   :  { %v319_v16 = vmul.f32 %v837_v14, %v829_v53 }
 0x293   :  { %v201_v17 = vpack.c.bf16 %v199_v15, %v199_v15 }
 0x294   :  { %v321_v20 = vpack.c.bf16 %v319_v16, %v319_v16 }
 0x295   :  { %782 = vmatmul.msk.bf16.vlgmr.msra.gmra.mxu3 %vm135_vm1, %v201_v17 }
 0x296   :  { %786 = vmatmul.msk.bf16.vlgmr.msrb.gmra.mxu2 %vm135_vm1, %v321_v20 }
 0x29c   :  { %v345_v22 = vpop.permute.xlu0 %344 }
 0x29d   :  { %v350_v23 = vsel %vm208_vm2, %v345_v22, 0 }
 0x29e   :  { %359 = vmatpush.bf16.msra.mxu3 %v350_v23 }
 0x2a0   :  { %v316_v24 = vpop.xlane.xlu2 %315 }
 0x2a2   :  { %v407_v25 = vpop.permute.xlu1 %406 }
 0x2a4   :  { %v430_v39 = vpop.permute.xlu0 %429 }
 0x2a6   :  { %790 = vmatmul.msk.bf16.vlgmr.msra.gmra.mxu2 %vm135_vm1, %v407_v25 }
 0x2a8   :  { %v477_v26 = vpop.permute.xlu2 %476 }
 0x2a9   :  { %v482_v27 = vsel %vm208_vm2, %v477_v26, 0 }
 0x2aa   :  { %491 = vmatpush.bf16.msrb.mxu0 %v482_v27 }
 0x2b0   :  { %v544_v35 = vpop.permute.xlu2 %543 }
 0x2b1   :  { %v549_v38 = vsel %vm135_vm1, %v544_v35, 0 }
 0x2b8   :  { %v567_v52 = vpop.permute.xlu2 %566 }
 0x2b9   :  { %v572_v55 = vsel %vm135_vm1, %v567_v52, 0 }
 0x2cd   :  { %v196_v28 = vpop.xlane.xlu1 %195 }
 0x2ce   :  { %838 = vrcp.f32 %v196_v28 }
 0x2cf   :  { %840 = vrcp.f32 %v316_v24 }
 0x2d4   :  { %v839_v29 = vpop.eup %838 }
 0x2d5   :  { %v200_v30 = vmul.f32 %v839_v29, %v833_v6  ;;  %v841_v32 = vpop.eup %840 }
 0x2d6   :  { %v320_v33 = vmul.f32 %v841_v32, %v831_v0 }
 0x2d7   :  { %v202_v31 = vpack.c.bf16 %v200_v30, %v200_v30 }
 0x2d8   :  { %v322_v37 = vpack.c.bf16 %v320_v33, %v320_v33 }
 0x2d9   :  { %783 = vmatmul.msk.bf16.vlgmr.msrb.gmra.mxu3 %vm135_vm1, %v202_v31 }
 0x2e5   :  { %v432_v34 = vpop.permute.xlu1 %431 }
 0x2e6   :  { %v437_v36 = vsel %vm135_vm1, %v432_v34, 0 }
 0x2e7   :  { %446 = vmatpush.bf16.xpose.msrb.mxu3 %v437_v36 }
 0x2e9   :  { %787 = vmatmul.msk.bf16.vlgmr.msra.gmra.mxu3 %vm135_vm1, %v322_v37 }
 0x2ef   :  { %558 = vmatpush.bf16.xpose.msra.mxu3 %v549_v38 }
 0x2f9   :  { %791 = vmatmul.msk.bf16.vlgmr.msrb.gmra.mxu3 %vm135_vm1, %v430_v39 }
 0x318   :  { %v221_v40 = vpop.f32.mrf.mxu3 }
 0x319   :  { %v340_v41 = vpop.f32.mrf.mxu2 }
 0x320   :  { %v223_v42 = vpop.f32.mrf.mxu3 }
 0x321   :  { %v342_v43 = vpop.f32.mrf.mxu2 }
 0x329   :  { %v425_v44 = vpop.f32.mrf.mxu2 }
 0x32a   :  { %v452_v45 = vsel %vm135_vm1, %v425_v44, -inf }
 0x32b   :  { %453 = vmax.xlane.f32.xlu0 %v452_v45 }
 0x331   :  { %v427_v46 = vpop.f32.mrf.mxu2 }
 0x33f   :  { %541 = vrot.lane.b32.xlu0 %v1050_v19, %s979_s24 }
 0x35c   :  { %v242_v49 = vpop.f32.mrf.mxu3 }
 0x35d   :  { %v246_v50 = vpack.c.bf16 %v242_v49, %v221_v40 }
 0x35f   :  { %789 = vmatmul.msk.bf16.vlgmr.msra.gmra.mxu1 %vm135_vm1, %v246_v50 }
 0x364   :  { %v244_v51 = vpop.f32.mrf.mxu3 }
 0x36c   :  { %v361_v53 = vpop.f32.mrf.mxu3 }
 0x36d   :  { %v365_v54 = vpack.c.bf16 %v361_v53, %v340_v41 }
 0x36f   :  { %788 = vmatmul.msk.bf16.vlgmr.msra.gmra.mxu0 %vm135_vm1, %v365_v54 }
 0x370   :  { %581 = vmatpush.bf16.xpose.msra.mxu0 %v572_v55 }
 0x374   :  { %v363_v56 = vpop.f32.mrf.mxu3 }
 0x37c   :  { %v448_v57 = vpop.f32.mrf.mxu3 }
 0x37d   :  { %v455_v58 = vsel %vm135_vm1, %v448_v57, -inf }
 0x37e   :  { %456 = vmax.xlane.f32.xlu2 %v455_v58 }
 0x384   :  { %v450_v59 = vpop.f32.mrf.mxu3 }
 0x39e   :  { %v454_v19 = vpop.xlane.xlu0 %453 }
 0x39f   :  { %v458_v60 = vsub.f32 %v425_v44, %v454_v19 }
 0x3a1   :  { %v460_v61 = vmul.f32 1.442695, %v458_v60 }
 0x3a3   :  { %842 = vpow2.f32 %v460_v61 }
 0x3a9   :  { %v843_v62 = vpop.eup %842 }
 0x3aa   :  { %v464_v63 = vsel %vm135_vm1, %v843_v62, 0.0 }
 0x3ab   :  { %465 = vadd.xlane.f32.xlu1 %v464_v63 }
 0x3b1   :  { %v542_v0 = vpop.permute.xlu0 %541 }
 0x3b2   :  { %795 = vmatmul.msk.bf16.vlgmr.msra.gmra.mxu3 %vm135_vm1, %v542_v0 }
 0x3c4   :  { %564 = vrot.lane.b32.xlu1 %v1055_v21, %s979_s24 }
 0x3cc   :  { %497 = vrot.lane.b32.xlu1 %v1048_v18, %s977_s22 }
 0x3dc   :  { %v401_v1 = vpop.f32.mrf.mxu1 }
 0x3e4   :  { %v403_v40 = vpop.f32.mrf.mxu1 }
 0x3ec   :  { %v381_v2 = vpop.f32.mrf.mxu0 }
 0x3ed   :  { %v1119_v3 = vadd.f32 %v401_v1, %v381_v2 }
 0x3f1   :  { %v457_v4 = vpop.xlane.xlu2 %456 }
 0x3f2   :  { %v459_v5 = vsub.f32 %v448_v57, %v457_v4 }
 0x3f4   :  { %v462_v6 = vmul.f32 1.442695, %v459_v5  ;;  %v383_v29 = vpop.f32.mrf.mxu0 }
 0x3f6   :  { %844 = vpow2.f32 %v462_v6 }
 0x3fc   :  { %v845_v7 = vpop.eup %844 }
 0x3fd   :  { %v467_v8 = vsel %vm135_vm1, %v845_v7, 0.0 }
 0x3fe   :  { %468 = vadd.xlane.f32.xlu0 %v467_v8 }
 0x412   :  { %632 = vrot.lane.b32.xlu0 %v1048_v18, %s980_s25  ;;  %v122_v18 = vld [vmem:[#allocation7 + $0x8] sm:$0xf] }
 0x413   :  { %v523_v22 = vsel %vm208_vm2, %v122_v18, 0 }
 0x414   :  { %532 = vmatpush.bf16.msrb.mxu2 %v523_v22 }
 0x41e   :  { %v466_v21 = vpop.xlane.xlu1 %465 }
 0x41f   :  { %846 = vrcp.f32 %v466_v21 }
 0x425   :  { %v847_v10 = vpop.eup %846 }
 0x426   :  { %v472_v11 = vmul.f32 %v847_v10, %v843_v62 }
 0x428   :  { %v474_v12 = vpack.c.bf16 %v472_v11, %v472_v11 }
 0x42a   :  { %792 = vmatmul.msk.bf16.vlgmr.msrb.gmra.mxu0 %vm135_vm1, %v474_v12 }
 0x435   :  { %v560_v13 = vpop.f32.mrf.mxu3 }
 0x436   :  { %v565_v14 = vpop.permute.xlu1 %564  ;;  %v587_v15 = vsel %vm135_vm1, %v560_v13, -inf }
 0x437   :  { %588 = vmax.xlane.f32.xlu2 %v587_v15 }
 0x43a   :  { %796 = vmatmul.msk.bf16.vlgmr.msra.gmra.mxu0 %vm135_vm1, %v565_v14  ;;  %v981_v14 = vmov 32.0  }
 0x43d   :  { %v562_v16 = vpop.f32.mrf.mxu3 }
 0x43e   :  { %v498_v17 = vpop.permute.xlu1 %497 }
 0x43f   :  { %v503_v20 = vsel %vm208_vm2, %v498_v17, 0 }
 0x440   :  { %512 = vmatpush.bf16.msrb.mxu1 %v503_v20 }
 0x471   :  { %v469_v23 = vpop.xlane.xlu0 %468 }
 0x472   :  { %848 = vrcp.f32 %v469_v23 }
 0x478   :  { %v849_v24 = vpop.eup %848 }
 0x479   :  { %v473_v25 = vmul.f32 %v849_v24, %v845_v7  ;;  %v404_v7 = vadd.f32 %v403_v40, %v383_v29 }
 0x47b   :  { %v475_v26 = vpack.c.bf16 %v473_v25, %v473_v25 }
 0x47d   :  { %793 = vmatmul.msk.bf16.vlgmr.msrb.gmra.mxu1 %vm135_vm1, %v475_v26 }
 0x484   :  { %v633_v27 = vpop.permute.xlu0 %632 }
 0x485   :  { %v638_v28 = vsel %vm208_vm2, %v633_v27, 0 }
 0x486   :  { %647 = vmatpush.bf16.msra.mxu2 %v638_v28 }
 0x4a7   :  { %v493_v30 = vpop.f32.mrf.mxu0 }
 0x4aa   :  { %v589_v31 = vpop.xlane.xlu2 %588 }
 0x4ab   :  { %v593_v32 = vsub.f32 %v560_v13, %v589_v31 }
 0x4ad   :  { %v595_v33 = vmul.f32 1.442695, %v593_v32 }
 0x4af   :  { %850 = vpow2.f32 %v595_v33  ;;  %v495_v34 = vpop.f32.mrf.mxu0 }
 0x4b5   :  { %v851_v35 = vpop.eup %850 }
 0x4b6   :  { %v599_v36 = vsel %vm135_vm1, %v851_v35, 0.0 }
 0x4b7   :  { %v583_v37 = vpop.f32.mrf.mxu0  ;;  %600 = vadd.xlane.f32.xlu2 %v599_v36 }
 0x4b8   :  { %v590_v38 = vsel %vm135_vm1, %v583_v37, -inf }
 0x4b9   :  { %591 = vmax.xlane.f32.xlu1 %v590_v38 }
 0x4bf   :  { %v585_v39 = vpop.f32.mrf.mxu0 }
 0x4fa   :  { %v514_v41 = vpop.f32.mrf.mxu1 }
 0x4fb   :  { %v518_v42 = vpack.c.bf16 %v514_v41, %v493_v30 }
 0x4fd   :  { %794 = vmatmul.msk.bf16.vlgmr.msrb.gmra.mxu2 %vm135_vm1, %v518_v42 }
 0x502   :  { %v516_v43 = vpop.f32.mrf.mxu1 }
 0x52a   :  { %v601_v51 = vpop.xlane.xlu2 %600 }
 0x52c   :  { %v592_v44 = vpop.xlane.xlu1 %591 }
 0x52d   :  { %v594_v45 = vsub.f32 %v583_v37, %v592_v44 }
 0x52f   :  { %v597_v46 = vmul.f32 1.442695, %v594_v45 }
 0x531   :  { %852 = vpow2.f32 %v597_v46 }
 0x532   :  { %854 = vrcp.f32 %v601_v51 }
 0x537   :  { %v853_v47 = vpop.eup %852 }
 0x538   :  { %v602_v48 = vsel %vm135_vm1, %v853_v47, 0.0  ;;  %v855_v53 = vpop.eup %854 }
 0x539   :  { %603 = vadd.xlane.f32.xlu2 %v602_v48  ;;  %v607_v55 = vmul.f32 %v855_v53, %v851_v35 }
 0x53b   :  { %v609_v19 = vpack.c.bf16 %v607_v55, %v607_v55 }
 0x551   :  { %611 = vrot.lane.b32.xlu2 %v1044_v9, %s980_s25  ;;  %v123_v9 = vld [vmem:[#allocation7 + $0xc] sm:$0xf] }
 0x552   :  { %v658_v60 = vsel %vm208_vm2, %v123_v9, 0 }
 0x553   :  { %667 = vmatpush.bf16.msrb.mxu3 %v658_v60 }
 0x580   :  { %v534_v49 = vpop.f32.mrf.mxu2 }
 0x581   :  { %v539_v50 = vadd.f32 %v534_v49, %v1119_v3  ;;  %v823_v3 = vld [vmem:[%s1165_s4] ss:$0 sm:$0xff] }
 0x588   :  { %v536_v61 = vpop.f32.mrf.mxu2 }
 0x589   :  { %v540_v21 = vadd.f32 %v536_v61, %v404_v7 }
 0x5ac   :  { %v604_v52 = vpop.xlane.xlu2 %603 }
 0x5ad   :  { %856 = vrcp.f32 %v604_v52 }
 0x5ae   :  { %858 = vrcp.f32 %v981_v14 }
 0x5b3   :  { %v857_v54 = vpop.eup %856 }
 0x5b4   :  { %v608_v56 = vmul.f32 %v857_v54, %v853_v47  ;;  %v612_v57 = vpop.permute.xlu2 %611  ;;  %v859_v15 = vpop.eup %858  ;;  %v824_v47 = vld [vmem:[%s1166_s5] ss:$0 sm:$0xff]  ;;  %s982_s5 = smov [#allocation8]  }
 0x5b5   :  { %v617_v58 = vsel %vm208_vm2, %v612_v57, 0  ;;  %v689_v16 = vmul.f32 32.0, %v859_v15  ;;  %vm693_vm3 = vweird.f32 %v859_v15  ;;  %s751_s8 = sshll.u32 %s982_s5, 4  ;;  %s752_s8 = int_to_ptr.vmem [resolvable:$true] %s751_s8 }
 0x5b6   :  { %v610_v59 = vpack.c.bf16 %v608_v56, %v608_v56  ;;  %626 = vmatpush.bf16.msra.mxu1 %v617_v58 }
 0x5b7   :  { %v690_v17 = vsub.f32 1.0, %v689_v16 }
 0x5b8   :  { %798 = vmatmul.msk.bf16.vlgmr.msra.gmra.mxu2 %vm135_vm1, %v610_v59 }
 0x5b9   :  { %797 = vmatmul.msk.bf16.vlgmr.msra.gmra.mxu1 %vm135_vm1, %v609_v19  ;;  %v691_v20 = vmul.f32 %v859_v15, %v690_v17 }
 0x5bb   :  { %v692_v18 = vadd.f32 %v859_v15, %v691_v20 }
 0x5bd   :  { %v694_v22 = vsel %vm693_vm3, %v859_v15, %v692_v18 }
 0x636   :  { %v628_v62 = vpop.f32.mrf.mxu1 }
 0x63b   :  { %v649_v63 = vpop.f32.mrf.mxu2 }
 0x63c   :  { %v653_v0 = vpack.c.bf16 %v649_v63, %v628_v62 }
 0x63e   :  { %v630_v1 = vpop.f32.mrf.mxu1  ;;  %799 = vmatmul.msk.bf16.vlgmr.msrb.gmra.mxu3 %vm135_vm1, %v653_v0 }
 0x643   :  { %v651_v2 = vpop.f32.mrf.mxu2 }
 0x6c1   :  { %v669_v4 = vpop.f32.mrf.mxu3 }
 0x6c2   :  { %v674_v5 = vadd.f32 %v669_v4, %v539_v50  ;;  %v825_v50 = vld [vmem:[%s1167_s6] ss:$0 sm:$0xff]  ;;  %s983_s6 = smov 128  }
 0x6c4   :  { %v680_v6 = vadd.f32 %v823_v3, %v674_v5 }
 0x6c6   :  { %v682_v8 = vsel %vm102_vm0, %v680_v6, 0.0 }
 0x6c7   :  { %683 = vadd.xlane.f32.xlu1 %v682_v8 }
 0x6c9   :  { %v671_v10 = vpop.f32.mrf.mxu3 }
 0x6ca   :  { %v675_v11 = vadd.f32 %v671_v10, %v540_v21 }
 0x6cc   :  { %v681_v12 = vadd.f32 %v823_v3, %v675_v11 }
 0x6ce   :  { %v685_v13 = vsel %vm102_vm0, %v681_v12, 0.0 }
 0x6cf   :  { %686 = vadd.xlane.f32.xlu0 %v685_v13 }
 0x73a   :  { %v684_v23 = vpop.xlane.xlu1 %683 }
 0x73b   :  { %v695_v24 = vmul.f32 %v694_v22, %v684_v23 }
 0x73d   :  { %v697_v25 = vsub.f32 %v680_v6, %v695_v24 }
 0x73f   :  { %v699_v26 = vmul.f32 %v697_v25, %v697_v25 }
 0x741   :  { %v701_v27 = vsel %vm102_vm0, %v699_v26, 0.0 }
 0x742   :  { %v687_v28 = vpop.xlane.xlu0 %686  ;;  %702 = vadd.xlane.f32.xlu1 %v701_v27 }
 0x743   :  { %v696_v29 = vmul.f32 %v694_v22, %v687_v28 }
 0x745   :  { %v698_v30 = vsub.f32 %v681_v12, %v696_v29 }
 0x747   :  { %v700_v31 = vmul.f32 %v698_v30, %v698_v30 }
 0x749   :  { %v704_v32 = vsel %vm102_vm0, %v700_v31, 0.0 }
 0x74a   :  { %705 = vadd.xlane.f32.xlu1 %v704_v32 }
 0x7b5   :  { %v703_v33 = vpop.xlane.xlu1 %702 }
 0x7b6   :  { %v707_v34 = vmul.f32 %v703_v33, %v694_v22 }
 0x7b8   :  { %v709_v35 = vadd.f32 1e-05, %v707_v34 }
 0x7ba   :  { %860 = vrsqrt.f32 %v709_v35  ;;  %vm717_vm5 = vweird.f32 %v709_v35 }
 0x7bd   :  { %v706_v36 = vpop.xlane.xlu1 %705 }
 0x7be   :  { %v708_v37 = vmul.f32 %v706_v36, %v694_v22 }
 0x7c0   :  { %v861_v38 = vpop.eup %860  ;;  %v710_v39 = vadd.f32 1e-05, %v708_v37 }
 0x7c1   :  { %v712_v40 = vmul.f32 %v861_v38, %v709_v35  ;;  %vm718_vm4 = vweird.f32 %v861_v38 }
 0x7c2   :  { %862 = vrsqrt.f32 %v710_v39  ;;  %vm719_vm6 = vmor %vm717_vm5, %vm718_vm4  ;;  %vm727_vm8 = vweird.f32 %v710_v39 }
 0x7c3   :  { %v713_v41 = vmul.f32 %v861_v38, %v712_v40 }
 0x7c5   :  { %v714_v42 = vmul.f32 0.5, %v713_v41 }
 0x7c7   :  { %v715_v43 = vsub.f32 1.5, %v714_v42 }
 0x7c8   :  { %v863_v44 = vpop.eup %862 }
 0x7c9   :  { %v716_v45 = vmul.f32 %v861_v38, %v715_v43  ;;  %v722_v46 = vmul.f32 %v863_v44, %v710_v39  ;;  %vm728_vm7 = vweird.f32 %v863_v44 }
 0x7ca   :  { %vm729_vm9 = vmor %vm727_vm8, %vm728_vm7 }
 0x7cb   :  { %v720_v48 = vsel %vm719_vm6, %v861_v38, %v716_v45  ;;  %v723_v49 = vmul.f32 %v863_v44, %v722_v46 }
 0x7cc   :  { %v731_v51 = vmul.f32 %v720_v48, %v697_v25 }
 0x7cd   :  { %v724_v52 = vmul.f32 0.5, %v723_v49 }
 0x7ce   :  { %v737_v53 = vmul.f32 %v824_v47, %v731_v51 }
 0x7cf   :  { %v725_v54 = vsub.f32 1.5, %v724_v52 }
 0x7d0   :  { %v743_v55 = vadd.f32 %v825_v50, %v737_v53 }
 0x7d1   :  { %v726_v56 = vmul.f32 %v863_v44, %v725_v54 }
 0x7d2   :  { %745 = vst.msk [vmem:[#allocation8] sm:$0xff] %vm102_vm0, %v743_v55 }
 0x7d3   :  { %v730_v57 = vsel %vm729_vm9, %v863_v44, %v726_v56 }
 0x7d4   :  { %v732_v58 = vmul.f32 %v730_v57, %v698_v30 }
 0x7d6   :  { %v738_v59 = vmul.f32 %v824_v47, %v732_v58 }
 0x7d8   :  { %v744_v19 = vadd.f32 %v825_v50, %v738_v59 }
 0x7da   :  { %746 = vst.msk [vmem:[#allocation8 + $0x8] sm:$0xff] %vm102_vm0, %v744_v19 }
 0x7db   :  { %759 = dma.vmem_to_hbm [thread:$0]  %s752_s8, 256, %s754_s11, [#allocation4], %s983_s6, %s983_s6, %s984_s12  }
 0x7dc   :  { %964 = dma.done.wait [#allocation4], 256  }
 0x7dd   :  { %965 = vsyncadd [#allocation4], 4294967040 }
 0x7de   :  { %764 = vsyncpa [#allocation3], 1 }
 0x7df   :  { %765 = vsyncpa [#allocation6], 1 }
 0x7e0   :  { %766 = vsyncpa [#allocation4], 1 }

</bundles_post_ra>
